<compile_context>
chip_gen: v7x
topology: tpu7x:2x2x1
jax: 0.10.0
libtpu: 0.0.40
codegen_flags: <defaults>
</compile_context>

<pallas_src>
import jax
import jax.numpy as jnp
from jax import lax
from jax.experimental import pallas as pl
from jax.experimental.pallas import tpu as pltpu

SOS = 1          # config.SOS
NEG_BIG = -1e30  # finite "-inf" for masking


def _gru_fused(x, h, wih, whh, bih, bhh, H):
    """PyTorch nn.GRU cell with gate-fused weights.

    wih/whh: (H, 3H), gates [r, z, n] concatenated along the lane axis.
    bih/bhh: (1, 3H).  Two MXU issues per cell instead of six.
    """
    gi = jnp.dot(x, wih, preferred_element_type=jnp.float32) + bih   # (1, 3H)
    gh = jnp.dot(h, whh, preferred_element_type=jnp.float32) + bhh   # (1, 3H)
    r = jax.nn.sigmoid(gi[:, 0:H] + gh[:, 0:H])
    z = jax.nn.sigmoid(gi[:, H:2 * H] + gh[:, H:2 * H])
    n = jnp.tanh(gi[:, 2 * H:3 * H] + r * gh[:, 2 * H:3 * H])
    return (1.0 - z) * n + z * h


def greedy_kernel(seq_ref, length_ref,                          # SMEM
                  emb_ref,
                  e_wih_ref, e_whh_ref, e_bih_ref, e_bhh_ref,
                  d_wih_ref, d_whh_ref, d_bih_ref, d_bhh_ref,
                  wcat_h_ref, wcat_c_ref, bcat_ref,
                  wout_ref, bout_ref,                           # VMEM params
                  tokens_ref, scores_ref):                      # VMEM outs (1,T)
    S = seq_ref.shape[0]
    H = emb_ref.shape[1]
    V = wout_ref.shape[1]
    T = tokens_ref.shape[1]

    # TODO(synk): at realistic sizes (V~30k, H>=512) emb/wout do not fit VMEM
    # (v7x: 64 MiB); keep them HBM-resident (memory_space=pl.ANY), kick off
    # their async copies here so the DMA overlaps the encoder sweep, and tile
    # the (H,V) logits matmul over V with double-buffered make_async_copy +
    # an online argmax / running sum_exp per tile (also keeps v5e's single EUP
    # exp overlapped with the next tile's MXU push).

    # ---------------- encoder: single-layer GRU over the input sequence -----
    e_wih = e_wih_ref[...]
    e_whh = e_whh_ref[...]
    e_bih = e_bih_ref[...]
    e_bhh = e_bhh_ref[...]

    # Encoder outputs live in registers (sublane-select accumulate), written
    # nowhere: no per-row masked vst, no store->load round-trip, no scratch.
    row_ids = lax.broadcasted_iota(jnp.int32, (S, 1), 0)        # (S, 1)

    def enc_step(t, carry):
        h, enc_acc = carry
        tok = seq_ref[t]                                        # SMEM scalar
        x = emb_ref[pl.ds(tok, 1), :]                           # (1, H) row
        h = _gru_fused(x, h, e_wih, e_whh, e_bih, e_bhh, H)
        enc_acc = jnp.where(row_ids == t, h, enc_acc)           # place row t
        return h, enc_acc

    h0 = jnp.zeros((1, H), jnp.float32)
    enc0 = jnp.zeros((S, H), jnp.float32)
    enc_hidden, enc_outs = lax.fori_loop(0, S, enc_step, (h0, enc0),
                                         unroll=True)
    # decoder_hidden = encoder_hidden[:n_layers]  (n_layers == 1 here)

    # One-time transpose of the encoder outputs, hoisted out of the decode
    # loop.  Done as an exact identity matmul on the MXU (0*x sums drop out),
    # so the serial decode loop only ever issues plain row-major matmuls.
    eye = (lax.broadcasted_iota(jnp.int32, (H, H), 0) ==
           lax.broadcasted_iota(jnp.int32, (H, H), 1)).astype(jnp.float32)
    enc_outs_T = lax.dot_general(eye, enc_outs, (((1,), (1,)), ((), ())),
                                 preferred_element_type=jnp.float32)  # (H, S)

    # ---------------- hoisted, decode-loop-invariant loads -------------------
    # NOTE(perf): fine at H=32 (~30 of 64 vregs).  Once H >= ~128, index the
    # refs at the point of use instead (vld slots are idle) or the unrolled
    # loop flips into a spill-bound regime; emb is already handled that way.
    d_wih = d_wih_ref[...]
    d_whh = d_whh_ref[...]
    d_bih = d_bih_ref[...]
    d_bhh = d_bhh_ref[...]
    wcat_h = wcat_h_ref[...]                                    # (H, H)
    wcat_c = wcat_c_ref[...]                                    # (H, H)
    bcat = bcat_ref[...]                                        # (1, H)
    wout = wout_ref[...]                                        # (H, V)
    bout = bout_ref[...]                                        # (1, V)

    length = length_ref[0]
    valid = lax.broadcasted_iota(jnp.int32, (1, S), 1) < length  # (1, S)
    lane_v = lax.broadcasted_iota(jnp.int32, (1, V), 1)
    lane_t = lax.broadcasted_iota(jnp.int32, (1, T), 1)

    # ---------------- greedy decoding loop -----------------------------------
    def dec_step(step, carry):
        tok, h, toks, scs = carry                               # tok: (1,1) i32
        # TODO(synk): at realistic vocab sizes replace this one-hot MXU gather
        # with an SMEM-scalar dynamic emb-row load (O(H) vs O(V*H)/step) via a
        # VMEM->SMEM spill of the argmax; at V=64 the one-hot matmul is
        # cheaper than that scalar round-trip, so it is kept here.
        onehot = (lane_v == tok).astype(jnp.float32)            # (1, V)
        x = jnp.dot(onehot, emb_ref[...],
                    preferred_element_type=jnp.float32)         # (1, H)
        h = _gru_fused(x, h, d_wih, d_whh, d_bih, d_bhh, H)

        # Luong "dot" attention: plain (1,H)@(H,S) matmul, no per-step
        # relayout (enc_outs_T hoisted above).
        att = jnp.dot(h, enc_outs_T,
                      preferred_element_type=jnp.float32)       # (1, S)
        att = jnp.where(valid, att, NEG_BIG)
        att = att - jnp.max(att, axis=1, keepdims=True)
        e = jnp.where(valid, jnp.exp(att), 0.0)
        denom = jnp.maximum(jnp.sum(e, axis=1, keepdims=True), 1e-30)
        # Exact reciprocal*multiply (cheaper than an O(S) lane divide).  Kept
        # exact (approx=True would be a free EUP slot but perturbs the
        # recurrence that decides the greedy tokens).
        attn_w = e * pl.reciprocal(denom)                       # (1, S)
        ctx = jnp.dot(attn_w, enc_outs,
                      preferred_element_type=jnp.float32)       # (1, H)

        # Split wcat (H not a multiple of 128): avoids a mid-vreg lane concat
        # of [h, ctx]; the second MXU push pipelines behind the first.
        cat = jnp.tanh(jnp.dot(h, wcat_h, preferred_element_type=jnp.float32)
                       + jnp.dot(ctx, wcat_c,
                                 preferred_element_type=jnp.float32)
                       + bcat)                                  # (1, H)
        logits = (jnp.dot(cat, wout, preferred_element_type=jnp.float32)
                  + bout)                                       # (1, V)

        # Greedy pick straight on the logits (softmax is monotone); the score
        # of the winning token is exp(0)/sum(exp(l-max)) = 1/sum_exp.  No O(V)
        # normalization, no second cross-lane max.
        m = jnp.max(logits, axis=1, keepdims=True)              # (1, 1)
        new_tok = jnp.min(jnp.where(logits == m, lane_v, V),
                          axis=1, keepdims=True).astype(jnp.int32)
        sum_e = jnp.sum(jnp.exp(logits - m), axis=1, keepdims=True)
        best = pl.reciprocal(sum_e, approx=True)                # EUP; score only

        sel = lane_t == step
        toks = jnp.where(sel, new_tok, toks)
        scs = jnp.where(sel, best, scs)
        return new_tok, h, toks, scs

    tok0 = jnp.full((1, 1), SOS, dtype=jnp.int32)
    toks0 = jnp.zeros((1, T), jnp.int32)
    scs0 = jnp.zeros((1, T), jnp.float32)
    _, _, toks, scs = lax.fori_loop(
        0, T, dec_step, (tok0, enc_hidden, toks0, scs0), unroll=True)

    # single lane-dense store of each output row
    tokens_ref[...] = toks
    scores_ref[...] = scs


def greedy_search(input_seq, input_length, max_length, params):
    H = params["emb"].shape[1]

    # --- fuse GRU gates into lane-dense matrices (plain JAX, once) ----------
    def fuse_w(w):      # (3, H, H) -> (H, 3H)   gate order [r, z, n]
        return jnp.concatenate([w[0], w[1], w[2]], axis=1)

    def fuse_b(b):      # (3, H) -> (1, 3H)
        return b.reshape(1, -1)

    smem = pl.BlockSpec(memory_space=pltpu.MemorySpace.SMEM)
    vmem = pl.BlockSpec(memory_space=pltpu.MemorySpace.VMEM)

    # TODO(synk): for batched decoding on v7x, add a leading grid axis marked
    # "parallel" (dimension_semantics) so the second TensorCore is used.
    tokens, scores = pl.pallas_call(
        greedy_kernel,
        out_shape=(jax.ShapeDtypeStruct((1, max_length), jnp.int32),
                   jax.ShapeDtypeStruct((1, max_length), jnp.float32)),
        in_specs=[smem, smem] + [vmem] * 14,
        out_specs=(vmem, vmem),
    )(input_seq, input_length,
      params["emb"],
      fuse_w(params["e_wih"]), fuse_w(params["e_whh"]),
      fuse_b(params["e_bih"]), fuse_b(params["e_bhh"]),
      fuse_w(params["d_wih"]), fuse_w(params["d_whh"]),
      fuse_b(params["d_bih"]), fuse_b(params["d_bhh"]),
      params["wcat"][0], params["wcat"][1], params["bcat"],
      params["wout"], params["bout"])
    # all_tokens (T,), all_scores (T,)  — matches the PyTorch return
    return tokens[0], scores[0]


# ------------------------- pure-JAX reference --------------------------------
def greedy_search_ref(input_seq, input_length, max_length, params):
    H = params["emb"].shape[1]

    def gru(x, h, wih, whh, bih, bhh):
        r = jax.nn.sigmoid(x @ wih[0] + bih[0] + h @ whh[0] + bhh[0])
        z = jax.nn.sigmoid(x @ wih[1] + bih[1] + h @ whh[1] + bhh[1])
        n = jnp.tanh(x @ wih[2] + bih[2] + r * (h @ whh[2] + bhh[2]))
        return (1.0 - z) * n + z * h

    h = jnp.zeros((1, H), jnp.float32)
    enc_outs = []
    for t in range(input_seq.shape[0]):
        x = params["emb"][input_seq[t]][None, :]
        h = gru(x, h, params["e_wih"], params["e_whh"],
                params["e_bih"], params["e_bhh"])
        enc_outs.append(h)
    enc_outs = jnp.concatenate(enc_outs, axis=0)
    valid = (jnp.arange(enc_outs.shape[0]) < input_length[0])[:, None]

    tok = SOS
    toks, scs = [], []
    for _ in range(max_length):
        x = params["emb"][tok][None, :]
        h = gru(x, h, params["d_wih"], params["d_whh"],
                params["d_bih"], params["d_bhh"])
        att = jnp.sum(enc_outs * h, axis=1, keepdims=True)
        att = jnp.where(valid, att, NEG_BIG)
        w = jax.nn.softmax(att, axis=0)
        ctx = jnp.sum(enc_outs * w, axis=0, keepdims=True)
        cat = jnp.tanh(h @ params["wcat"][0] + ctx @ params["wcat"][1]
                       + params["bcat"])
        probs = jax.nn.softmax(cat @ params["wout"] + params["bout"], axis=1)
        tok = int(jnp.argmax(probs[0]))
        toks.append(tok)
        scs.append(float(probs[0, tok]))
    return jnp.array(toks, jnp.int32), jnp.array(scs, jnp.float32)


if __name__ == "__main__":
    V, H, S, T = 64, 32, 8, 8     # vocab, hidden, input seq len, max_length
    key = jax.random.PRNGKey(0)
    keys = jax.random.split(key, 16)

    def rn(k, shape):
        return jax.random.normal(k, shape, jnp.float32) * 0.1

    params = dict(
        emb=rn(keys[0], (V, H)),
        e_wih=rn(keys[1], (3, H, H)), e_whh=rn(keys[2], (3, H, H)),
        e_bih=rn(keys[3], (3, H)),    e_bhh=rn(keys[4], (3, H)),
        d_wih=rn(keys[5], (3, H, H)), d_whh=rn(keys[6], (3, H, H)),
        d_bih=rn(keys[7], (3, H)),    d_bhh=rn(keys[8], (3, H)),
        wcat=rn(keys[9], (2, H, H)),  bcat=rn(keys[10], (1, H)),
        wout=rn(keys[11], (H, V)),    bout=rn(keys[12], (1, V)),
    )
    input_seq = jax.random.randint(keys[13], (S,), 2, V, dtype=jnp.int32)
    # TODO(synk): pack_padded_sequence semantics (variable-length encoder state)
    # are approximated by an attention mask; here input_length == S.
    input_length = jnp.array([S], dtype=jnp.int32)

    all_tokens, all_scores = greedy_search(input_seq, input_length, T, params)
    jax.block_until_ready((all_tokens, all_scores))

    ref_tokens, ref_scores = greedy_search_ref(input_seq, input_length, T, params)
    assert all_tokens.shape == (T,) and all_scores.shape == (T,)
    # Tokens are computed on the exact path and must match bit-for-bit.
    assert jnp.array_equal(all_tokens, ref_tokens), (all_tokens, ref_tokens)
    # Scores use the EUP approximate reciprocal (score path only, ~1e-3 rel
    # error budget); the recurrence/token path is exact.
    assert jnp.allclose(all_scores, ref_scores, rtol=1e-2, atol=1e-5), (
        all_scores, ref_scores)

    print("KERNEL_OK")
</pallas_src>

<mosaic_0001>
module attributes {stable_mosaic.version = 11 : i64} {
  func.func @greedy_kernel(%arg0: memref<8xi32, #tpu.memory_space<smem>>, %arg1: memref<1xi32, #tpu.memory_space<smem>>, %arg2: memref<64x32xf32, #tpu.memory_space<vmem>>, %arg3: memref<32x96xf32, #tpu.memory_space<vmem>>, %arg4: memref<32x96xf32, #tpu.memory_space<vmem>>, %arg5: memref<1x96xf32, #tpu.memory_space<vmem>>, %arg6: memref<1x96xf32, #tpu.memory_space<vmem>>, %arg7: memref<32x96xf32, #tpu.memory_space<vmem>>, %arg8: memref<32x96xf32, #tpu.memory_space<vmem>>, %arg9: memref<1x96xf32, #tpu.memory_space<vmem>>, %arg10: memref<1x96xf32, #tpu.memory_space<vmem>>, %arg11: memref<32x32xf32, #tpu.memory_space<vmem>>, %arg12: memref<32x32xf32, #tpu.memory_space<vmem>>, %arg13: memref<1x32xf32, #tpu.memory_space<vmem>>, %arg14: memref<32x64xf32, #tpu.memory_space<vmem>>, %arg15: memref<1x64xf32, #tpu.memory_space<vmem>>, %arg16: memref<1x8xi32, #tpu.memory_space<vmem>>, %arg17: memref<1x8xf32, #tpu.memory_space<vmem>>) attributes {dimension_semantics = [], scalar_prefetch = 0 : i64, scratch_operands = 0 : i64, tpu.core_type = #tpu.core_type<tc>} {
    %c0 = arith.constant 0 : index
    %c0_0 = arith.constant 0 : index
    %0 = vector.load %arg3[%c0, %c0_0] : memref<32x96xf32, #tpu.memory_space<vmem>>, vector<32x96xf32>
    %c0_1 = arith.constant 0 : index
    %c0_2 = arith.constant 0 : index
    %1 = vector.load %arg4[%c0_1, %c0_2] : memref<32x96xf32, #tpu.memory_space<vmem>>, vector<32x96xf32>
    %c0_3 = arith.constant 0 : index
    %c0_4 = arith.constant 0 : index
    %2 = vector.load %arg5[%c0_3, %c0_4] : memref<1x96xf32, #tpu.memory_space<vmem>>, vector<1x96xf32>
    %c0_5 = arith.constant 0 : index
    %c0_6 = arith.constant 0 : index
    %3 = vector.load %arg6[%c0_5, %c0_6] : memref<1x96xf32, #tpu.memory_space<vmem>>, vector<1x96xf32>
    %4 = tpu.iota {dimensions = array<i32: 0>} : vector<8x1xi32>
    %cst = arith.constant 0.000000e+00 : f32
    %5 = vector.broadcast %cst : f32 to vector<1x32xf32>
    %cst_7 = arith.constant 0.000000e+00 : f32
    %6 = vector.broadcast %cst_7 : f32 to vector<8x32xf32>
    %c0_i32 = arith.constant 0 : i32
    %7 = arith.index_cast %c0_i32 : i32 to index
    %8 = memref.load %arg0[%7] : memref<8xi32, #tpu.memory_space<smem>>
    %9 = arith.index_cast %8 : i32 to index
    %c0_8 = arith.constant 0 : index
    %10 = vector.load %arg2[%9, %c0_8] : memref<64x32xf32, #tpu.memory_space<vmem>>, vector<1x32xf32>
    %cst_9 = arith.constant dense<0.000000e+00> : vector<1x96xf32>
    %11 = tpu.matmul %10, %0, %cst_9 {dimension_numbers = #tpu.dot_dimension_numbers<[1], [0], [0], [1], [0, 0, 1, 1], [], []>} : vector<1x32xf32>, vector<32x96xf32>, vector<1x96xf32> -> vector<1x96xf32>
    %12 = arith.addf %11, %2 : vector<1x96xf32>
    %cst_10 = arith.constant dense<0.000000e+00> : vector<1x96xf32>
    %13 = tpu.matmul %5, %1, %cst_10 {dimension_numbers = #tpu.dot_dimension_numbers<[1], [0], [0], [1], [0, 0, 1, 1], [], []>} : vector<1x32xf32>, vector<32x96xf32>, vector<1x96xf32> -> vector<1x96xf32>
    %14 = arith.addf %13, %3 : vector<1x96xf32>
    %15 = vector.extract_strided_slice %12 {offsets = [0, 0], sizes = [1, 32], strides = [1, 1]} : vector<1x96xf32> to vector<1x32xf32>
    %16 = vector.extract_strided_slice %14 {offsets = [0, 0], sizes = [1, 32], strides = [1, 1]} : vector<1x96xf32> to vector<1x32xf32>
    %17 = arith.addf %15, %16 : vector<1x32xf32>
    %18 = arith.negf %17 : vector<1x32xf32>
    %19 = math.exp %18 : vector<1x32xf32>
    %cst_11 = arith.constant 1.000000e+00 : f32
    %20 = vector.broadcast %cst_11 : f32 to vector<1x32xf32>
    %21 = arith.addf %20, %19 : vector<1x32xf32>
    %22 = arith.divf %20, %21 : vector<1x32xf32>
    %23 = vector.extract_strided_slice %12 {offsets = [0, 32], sizes = [1, 32], strides = [1, 1]} : vector<1x96xf32> to vector<1x32xf32>
    %24 = vector.extract_strided_slice %14 {offsets = [0, 32], sizes = [1, 32], strides = [1, 1]} : vector<1x96xf32> to vector<1x32xf32>
    %25 = arith.addf %23, %24 : vector<1x32xf32>
    %26 = arith.negf %25 : vector<1x32xf32>
    %27 = math.exp %26 : vector<1x32xf32>
    %cst_12 = arith.constant 1.000000e+00 : f32
    %28 = vector.broadcast %cst_12 : f32 to vector<1x32xf32>
    %29 = arith.addf %28, %27 : vector<1x32xf32>
    %30 = arith.divf %28, %29 : vector<1x32xf32>
    %31 = vector.extract_strided_slice %12 {offsets = [0, 64], sizes = [1, 32], strides = [1, 1]} : vector<1x96xf32> to vector<1x32xf32>
    %32 = vector.extract_strided_slice %14 {offsets = [0, 64], sizes = [1, 32], strides = [1, 1]} : vector<1x96xf32> to vector<1x32xf32>
    %33 = arith.mulf %22, %32 : vector<1x32xf32>
    %34 = arith.addf %31, %33 : vector<1x32xf32>
    %35 = math.tanh %34 : vector<1x32xf32>
    %cst_13 = arith.constant 1.000000e+00 : f32
    %36 = vector.broadcast %cst_13 : f32 to vector<1x32xf32>
    %37 = arith.subf %36, %30 : vector<1x32xf32>
    %38 = arith.mulf %37, %35 : vector<1x32xf32>
    %39 = arith.mulf %30, %5 : vector<1x32xf32>
    %40 = arith.addf %38, %39 : vector<1x32xf32>
    %41 = vector.broadcast %c0_i32 : i32 to vector<8x1xi32>
    %42 = arith.cmpi eq, %4, %41 : vector<8x1xi32>
    %43 = vector.shape_cast %42 : vector<8x1xi1> to vector<8x1xi1>
    %44 = vector.broadcast %43 : vector<8x1xi1> to vector<8x32xi1>
    %45 = vector.shape_cast %40 : vector<1x32xf32> to vector<1x32xf32>
    %46 = vector.broadcast %45 : vector<1x32xf32> to vector<8x32xf32>
    %47 = arith.select %44, %46, %6 : vector<8x32xi1>, vector<8x32xf32>
    %c1_i32 = arith.constant 1 : i32
    %48 = arith.index_cast %c1_i32 : i32 to index
    %49 = memref.load %arg0[%48] : memref<8xi32, #tpu.memory_space<smem>>
    %50 = arith.index_cast %49 : i32 to index
    %c0_14 = arith.constant 0 : index
    %51 = vector.load %arg2[%50, %c0_14] : memref<64x32xf32, #tpu.memory_space<vmem>>, vector<1x32xf32>
    %cst_15 = arith.constant dense<0.000000e+00> : vector<1x96xf32>
    %52 = tpu.matmul %51, %0, %cst_15 {dimension_numbers = #tpu.dot_dimension_numbers<[1], [0], [0], [1], [0, 0, 1, 1], [], []>} : vector<1x32xf32>, vector<32x96xf32>, vector<1x96xf32> -> vector<1x96xf32>
    %53 = arith.addf %52, %2 : vector<1x96xf32>
    %cst_16 = arith.constant dense<0.000000e+00> : vector<1x96xf32>
    %54 = tpu.matmul %40, %1, %cst_16 {dimension_numbers = #tpu.dot_dimension_numbers<[1], [0], [0], [1], [0, 0, 1, 1], [], []>} : vector<1x32xf32>, vector<32x96xf32>, vector<1x96xf32> -> vector<1x96xf32>
    %55 = arith.addf %54, %3 : vector<1x96xf32>
    %56 = vector.extract_strided_slice %53 {offsets = [0, 0], sizes = [1, 32], strides = [1, 1]} : vector<1x96xf32> to vector<1x32xf32>
    %57 = vector.extract_strided_slice %55 {offsets = [0, 0], sizes = [1, 32], strides = [1, 1]} : vector<1x96xf32> to vector<1x32xf32>
    %58 = arith.addf %56, %57 : vector<1x32xf32>
    %59 = arith.negf %58 : vector<1x32xf32>
    %60 = math.exp %59 : vector<1x32xf32>
    %cst_17 = arith.constant 1.000000e+00 : f32
    %61 = vector.broadcast %cst_17 : f32 to vector<1x32xf32>
    %62 = arith.addf %61, %60 : vector<1x32xf32>
    %63 = arith.divf %61, %62 : vector<1x32xf32>
    %64 = vector.extract_strided_slice %53 {offsets = [0, 32], sizes = [1, 32], strides = [1, 1]} : vector<1x96xf32> to vector<1x32xf32>
    %65 = vector.extract_strided_slice %55 {offsets = [0, 32], sizes = [1, 32], strides = [1, 1]} : vector<1x96xf32> to vector<1x32xf32>
    %66 = arith.addf %64, %65 : vector<1x32xf32>
    %67 = arith.negf %66 : vector<1x32xf32>
    %68 = math.exp %67 : vector<1x32xf32>
    %cst_18 = arith.constant 1.000000e+00 : f32
    %69 = vector.broadcast %cst_18 : f32 to vector<1x32xf32>
    %70 = arith.addf %69, %68 : vector<1x32xf32>
    %71 = arith.divf %69, %70 : vector<1x32xf32>
    %72 = vector.extract_strided_slice %53 {offsets = [0, 64], sizes = [1, 32], strides = [1, 1]} : vector<1x96xf32> to vector<1x32xf32>
    %73 = vector.extract_strided_slice %55 {offsets = [0, 64], sizes = [1, 32], strides = [1, 1]} : vector<1x96xf32> to vector<1x32xf32>
    %74 = arith.mulf %63, %73 : vector<1x32xf32>
    %75 = arith.addf %72, %74 : vector<1x32xf32>
    %76 = math.tanh %75 : vector<1x32xf32>
    %cst_19 = arith.constant 1.000000e+00 : f32
    %77 = vector.broadcast %cst_19 : f32 to vector<1x32xf32>
    %78 = arith.subf %77, %71 : vector<1x32xf32>
    %79 = arith.mulf %78, %76 : vector<1x32xf32>
    %80 = arith.mulf %71, %40 : vector<1x32xf32>
    %81 = arith.addf %79, %80 : vector<1x32xf32>
    %82 = vector.broadcast %c1_i32 : i32 to vector<8x1xi32>
    %83 = arith.cmpi eq, %4, %82 : vector<8x1xi32>
    %84 = vector.shape_cast %83 : vector<8x1xi1> to vector<8x1xi1>
    %85 = vector.broadcast %84 : vector<8x1xi1> to vector<8x32xi1>
    %86 = vector.shape_cast %81 : vector<1x32xf32> to vector<1x32xf32>
    %87 = vector.broadcast %86 : vector<1x32xf32> to vector<8x32xf32>
    %88 = arith.select %85, %87, %47 : vector<8x32xi1>, vector<8x32xf32>
    %c2_i32 = arith.constant 2 : i32
    %89 = arith.index_cast %c2_i32 : i32 to index
    %90 = memref.load %arg0[%89] : memref<8xi32, #tpu.memory_space<smem>>
    %91 = arith.index_cast %90 : i32 to index
    %c0_20 = arith.constant 0 : index
    %92 = vector.load %arg2[%91, %c0_20] : memref<64x32xf32, #tpu.memory_space<vmem>>, vector<1x32xf32>
    %cst_21 = arith.constant dense<0.000000e+00> : vector<1x96xf32>
    %93 = tpu.matmul %92, %0, %cst_21 {dimension_numbers = #tpu.dot_dimension_numbers<[1], [0], [0], [1], [0, 0, 1, 1], [], []>} : vector<1x32xf32>, vector<32x96xf32>, vector<1x96xf32> -> vector<1x96xf32>
    %94 = arith.addf %93, %2 : vector<1x96xf32>
    %cst_22 = arith.constant dense<0.000000e+00> : vector<1x96xf32>
    %95 = tpu.matmul %81, %1, %cst_22 {dimension_numbers = #tpu.dot_dimension_numbers<[1], [0], [0], [1], [0, 0, 1, 1], [], []>} : vector<1x32xf32>, vector<32x96xf32>, vector<1x96xf32> -> vector<1x96xf32>
    %96 = arith.addf %95, %3 : vector<1x96xf32>
    %97 = vector.extract_strided_slice %94 {offsets = [0, 0], sizes = [1, 32], strides = [1, 1]} : vector<1x96xf32> to vector<1x32xf32>
    %98 = vector.extract_strided_slice %96 {offsets = [0, 0], sizes = [1, 32], strides = [1, 1]} : vector<1x96xf32> to vector<1x32xf32>
    %99 = arith.addf %97, %98 : vector<1x32xf32>
    %100 = arith.negf %99 : vector<1x32xf32>
    %101 = math.exp %100 : vector<1x32xf32>
    %cst_23 = arith.constant 1.000000e+00 : f32
    %102 = vector.broadcast %cst_23 : f32 to vector<1x32xf32>
    %103 = arith.addf %102, %101 : vector<1x32xf32>
    %104 = arith.divf %102, %103 : vector<1x32xf32>
    %105 = vector.extract_strided_slice %94 {offsets = [0, 32], sizes = [1, 32], strides = [1, 1]} : vector<1x96xf32> to vector<1x32xf32>
    %106 = vector.extract_strided_slice %96 {offsets = [0, 32], sizes = [1, 32], strides = [1, 1]} : vector<1x96xf32> to vector<1x32xf32>
    %107 = arith.addf %105, %106 : vector<1x32xf32>
    %108 = arith.negf %107 : vector<1x32xf32>
    %109 = math.exp %108 : vector<1x32xf32>
    %cst_24 = arith.constant 1.000000e+00 : f32
    %110 = vector.broadcast %cst_24 : f32 to vector<1x32xf32>
    %111 = arith.addf %110, %109 : vector<1x32xf32>
    %112 = arith.divf %110, %111 : vector<1x32xf32>
    %113 = vector.extract_strided_slice %94 {offsets = [0, 64], sizes = [1, 32], strides = [1, 1]} : vector<1x96xf32> to vector<1x32xf32>
    %114 = vector.extract_strided_slice %96 {offsets = [0, 64], sizes = [1, 32], strides = [1, 1]} : vector<1x96xf32> to vector<1x32xf32>
    %115 = arith.mulf %104, %114 : vector<1x32xf32>
    %116 = arith.addf %113, %115 : vector<1x32xf32>
    %117 = math.tanh %116 : vector<1x32xf32>
    %cst_25 = arith.constant 1.000000e+00 : f32
    %118 = vector.broadcast %cst_25 : f32 to vector<1x32xf32>
    %119 = arith.subf %118, %112 : vector<1x32xf32>
    %120 = arith.mulf %119, %117 : vector<1x32xf32>
    %121 = arith.mulf %112, %81 : vector<1x32xf32>
    %122 = arith.addf %120, %121 : vector<1x32xf32>
    %123 = vector.broadcast %c2_i32 : i32 to vector<8x1xi32>
    %124 = arith.cmpi eq, %4, %123 : vector<8x1xi32>
    %125 = vector.shape_cast %124 : vector<8x1xi1> to vector<8x1xi1>
    %126 = vector.broadcast %125 : vector<8x1xi1> to vector<8x32xi1>
    %127 = vector.shape_cast %122 : vector<1x32xf32> to vector<1x32xf32>
    %128 = vector.broadcast %127 : vector<1x32xf32> to vector<8x32xf32>
    %129 = arith.select %126, %128, %88 : vector<8x32xi1>, vector<8x32xf32>
    %c3_i32 = arith.constant 3 : i32
    %130 = arith.index_cast %c3_i32 : i32 to index
    %131 = memref.load %arg0[%130] : memref<8xi32, #tpu.memory_space<smem>>
    %132 = arith.index_cast %131 : i32 to index
    %c0_26 = arith.constant 0 : index
    %133 = vector.load %arg2[%132, %c0_26] : memref<64x32xf32, #tpu.memory_space<vmem>>, vector<1x32xf32>
    %cst_27 = arith.constant dense<0.000000e+00> : vector<1x96xf32>
    %134 = tpu.matmul %133, %0, %cst_27 {dimension_numbers = #tpu.dot_dimension_numbers<[1], [0], [0], [1], [0, 0, 1, 1], [], []>} : vector<1x32xf32>, vector<32x96xf32>, vector<1x96xf32> -> vector<1x96xf32>
    %135 = arith.addf %134, %2 : vector<1x96xf32>
    %cst_28 = arith.constant dense<0.000000e+00> : vector<1x96xf32>
    %136 = tpu.matmul %122, %1, %cst_28 {dimension_numbers = #tpu.dot_dimension_numbers<[1], [0], [0], [1], [0, 0, 1, 1], [], []>} : vector<1x32xf32>, vector<32x96xf32>, vector<1x96xf32> -> vector<1x96xf32>
    %137 = arith.addf %136, %3 : vector<1x96xf32>
    %138 = vector.extract_strided_slice %135 {offsets = [0, 0], sizes = [1, 32], strides = [1, 1]} : vector<1x96xf32> to vector<1x32xf32>
    %139 = vector.extract_strided_slice %137 {offsets = [0, 0], sizes = [1, 32], strides = [1, 1]} : vector<1x96xf32> to vector<1x32xf32>
    %140 = arith.addf %138, %139 : vector<1x32xf32>
    %141 = arith.negf %140 : vector<1x32xf32>
    %142 = math.exp %141 : vector<1x32xf32>
    %cst_29 = arith.constant 1.000000e+00 : f32
    %143 = vector.broadcast %cst_29 : f32 to vector<1x32xf32>
    %144 = arith.addf %143, %142 : vector<1x32xf32>
    %145 = arith.divf %143, %144 : vector<1x32xf32>
    %146 = vector.extract_strided_slice %135 {offsets = [0, 32], sizes = [1, 32], strides = [1, 1]} : vector<1x96xf32> to vector<1x32xf32>
    %147 = vector.extract_strided_slice %137 {offsets = [0, 32], sizes = [1, 32], strides = [1, 1]} : vector<1x96xf32> to vector<1x32xf32>
    %148 = arith.addf %146, %147 : vector<1x32xf32>
    %149 = arith.negf %148 : vector<1x32xf32>
    %150 = math.exp %149 : vector<1x32xf32>
    %cst_30 = arith.constant 1.000000e+00 : f32
    %151 = vector.broadcast %cst_30 : f32 to vector<1x32xf32>
    %152 = arith.addf %151, %150 : vector<1x32xf32>
    %153 = arith.divf %151, %152 : vector<1x32xf32>
    %154 = vector.extract_strided_slice %135 {offsets = [0, 64], sizes = [1, 32], strides = [1, 1]} : vector<1x96xf32> to vector<1x32xf32>
    %155 = vector.extract_strided_slice %137 {offsets = [0, 64], sizes = [1, 32], strides = [1, 1]} : vector<1x96xf32> to vector<1x32xf32>
    %156 = arith.mulf %145, %155 : vector<1x32xf32>
    %157 = arith.addf %154, %156 : vector<1x32xf32>
    %158 = math.tanh %157 : vector<1x32xf32>
    %cst_31 = arith.constant 1.000000e+00 : f32
    %159 = vector.broadcast %cst_31 : f32 to vector<1x32xf32>
    %160 = arith.subf %159, %153 : vector<1x32xf32>
    %161 = arith.mulf %160, %158 : vector<1x32xf32>
    %162 = arith.mulf %153, %122 : vector<1x32xf32>
    %163 = arith.addf %161, %162 : vector<1x32xf32>
    %164 = vector.broadcast %c3_i32 : i32 to vector<8x1xi32>
    %165 = arith.cmpi eq, %4, %164 : vector<8x1xi32>
    %166 = vector.shape_cast %165 : vector<8x1xi1> to vector<8x1xi1>
    %167 = vector.broadcast %166 : vector<8x1xi1> to vector<8x32xi1>
    %168 = vector.shape_cast %163 : vector<1x32xf32> to vector<1x32xf32>
    %169 = vector.broadcast %168 : vector<1x32xf32> to vector<8x32xf32>
    %170 = arith.select %167, %169, %129 : vector<8x32xi1>, vector<8x32xf32>
    %c4_i32 = arith.constant 4 : i32
    %171 = arith.index_cast %c4_i32 : i32 to index
    %172 = memref.load %arg0[%171] : memref<8xi32, #tpu.memory_space<smem>>
    %173 = arith.index_cast %172 : i32 to index
    %c0_32 = arith.constant 0 : index
    %174 = vector.load %arg2[%173, %c0_32] : memref<64x32xf32, #tpu.memory_space<vmem>>, vector<1x32xf32>
    %cst_33 = arith.constant dense<0.000000e+00> : vector<1x96xf32>
    %175 = tpu.matmul %174, %0, %cst_33 {dimension_numbers = #tpu.dot_dimension_numbers<[1], [0], [0], [1], [0, 0, 1, 1], [], []>} : vector<1x32xf32>, vector<32x96xf32>, vector<1x96xf32> -> vector<1x96xf32>
    %176 = arith.addf %175, %2 : vector<1x96xf32>
    %cst_34 = arith.constant dense<0.000000e+00> : vector<1x96xf32>
    %177 = tpu.matmul %163, %1, %cst_34 {dimension_numbers = #tpu.dot_dimension_numbers<[1], [0], [0], [1], [0, 0, 1, 1], [], []>} : vector<1x32xf32>, vector<32x96xf32>, vector<1x96xf32> -> vector<1x96xf32>
    %178 = arith.addf %177, %3 : vector<1x96xf32>
    %179 = vector.extract_strided_slice %176 {offsets = [0, 0], sizes = [1, 32], strides = [1, 1]} : vector<1x96xf32> to vector<1x32xf32>
    %180 = vector.extract_strided_slice %178 {offsets = [0, 0], sizes = [1, 32], strides = [1, 1]} : vector<1x96xf32> to vector<1x32xf32>
    %181 = arith.addf %179, %180 : vector<1x32xf32>
    %182 = arith.negf %181 : vector<1x32xf32>
    %183 = math.exp %182 : vector<1x32xf32>
    %cst_35 = arith.constant 1.000000e+00 : f32
    %184 = vector.broadcast %cst_35 : f32 to vector<1x32xf32>
    %185 = arith.addf %184, %183 : vector<1x32xf32>
    %186 = arith.divf %184, %185 : vector<1x32xf32>
    %187 = vector.extract_strided_slice %176 {offsets = [0, 32], sizes = [1, 32], strides = [1, 1]} : vector<1x96xf32> to vector<1x32xf32>
    %188 = vector.extract_strided_slice %178 {offsets = [0, 32], sizes = [1, 32], strides = [1, 1]} : vector<1x96xf32> to vector<1x32xf32>
    %189 = arith.addf %187, %188 : vector<1x32xf32>
    %190 = arith.negf %189 : vector<1x32xf32>
    %191 = math.exp %190 : vector<1x32xf32>
    %cst_36 = arith.constant 1.000000e+00 : f32
    %192 = vector.broadcast %cst_36 : f32 to vector<1x32xf32>
    %193 = arith.addf %192, %191 : vector<1x32xf32>
    %194 = arith.divf %192, %193 : vector<1x32xf32>
    %195 = vector.extract_strided_slice %176 {offsets = [0, 64], sizes = [1, 32], strides = [1, 1]} : vector<1x96xf32> to vector<1x32xf32>
    %196 = vector.extract_strided_slice %178 {offsets = [0, 64], sizes = [1, 32], strides = [1, 1]} : vector<1x96xf32> to vector<1x32xf32>
    %197 = arith.mulf %186, %196 : vector<1x32xf32>
    %198 = arith.addf %195, %197 : vector<1x32xf32>
    %199 = math.tanh %198 : vector<1x32xf32>
    %cst_37 = arith.constant 1.000000e+00 : f32
    %200 = vector.broadcast %cst_37 : f32 to vector<1x32xf32>
    %201 = arith.subf %200, %194 : vector<1x32xf32>
    %202 = arith.mulf %201, %199 : vector<1x32xf32>
    %203 = arith.mulf %194, %163 : vector<1x32xf32>
    %204 = arith.addf %202, %203 : vector<1x32xf32>
    %205 = vector.broadcast %c4_i32 : i32 to vector<8x1xi32>
    %206 = arith.cmpi eq, %4, %205 : vector<8x1xi32>
    %207 = vector.shape_cast %206 : vector<8x1xi1> to vector<8x1xi1>
    %208 = vector.broadcast %207 : vector<8x1xi1> to vector<8x32xi1>
    %209 = vector.shape_cast %204 : vector<1x32xf32> to vector<1x32xf32>
    %210 = vector.broadcast %209 : vector<1x32xf32> to vector<8x32xf32>
    %211 = arith.select %208, %210, %170 : vector<8x32xi1>, vector<8x32xf32>
    %c5_i32 = arith.constant 5 : i32
    %212 = arith.index_cast %c5_i32 : i32 to index
    %213 = memref.load %arg0[%212] : memref<8xi32, #tpu.memory_space<smem>>
    %214 = arith.index_cast %213 : i32 to index
    %c0_38 = arith.constant 0 : index
    %215 = vector.load %arg2[%214, %c0_38] : memref<64x32xf32, #tpu.memory_space<vmem>>, vector<1x32xf32>
    %cst_39 = arith.constant dense<0.000000e+00> : vector<1x96xf32>
    %216 = tpu.matmul %215, %0, %cst_39 {dimension_numbers = #tpu.dot_dimension_numbers<[1], [0], [0], [1], [0, 0, 1, 1], [], []>} : vector<1x32xf32>, vector<32x96xf32>, vector<1x96xf32> -> vector<1x96xf32>
    %217 = arith.addf %216, %2 : vector<1x96xf32>
    %cst_40 = arith.constant dense<0.000000e+00> : vector<1x96xf32>
    %218 = tpu.matmul %204, %1, %cst_40 {dimension_numbers = #tpu.dot_dimension_numbers<[1], [0], [0], [1], [0, 0, 1, 1], [], []>} : vector<1x32xf32>, vector<32x96xf32>, vector<1x96xf32> -> vector<1x96xf32>
    %219 = arith.addf %218, %3 : vector<1x96xf32>
    %220 = vector.extract_strided_slice %217 {offsets = [0, 0], sizes = [1, 32], strides = [1, 1]} : vector<1x96xf32> to vector<1x32xf32>
    %221 = vector.extract_strided_slice %219 {offsets = [0, 0], sizes = [1, 32], strides = [1, 1]} : vector<1x96xf32> to vector<1x32xf32>
    %222 = arith.addf %220, %221 : vector<1x32xf32>
    %223 = arith.negf %222 : vector<1x32xf32>
    %224 = math.exp %223 : vector<1x32xf32>
    %cst_41 = arith.constant 1.000000e+00 : f32
    %225 = vector.broadcast %cst_41 : f32 to vector<1x32xf32>
    %226 = arith.addf %225, %224 : vector<1x32xf32>
    %227 = arith.divf %225, %226 : vector<1x32xf32>
    %228 = vector.extract_strided_slice %217 {offsets = [0, 32], sizes = [1, 32], strides = [1, 1]} : vector<1x96xf32> to vector<1x32xf32>
    %229 = vector.extract_strided_slice %219 {offsets = [0, 32], sizes = [1, 32], strides = [1, 1]} : vector<1x96xf32> to vector<1x32xf32>
    %230 = arith.addf %228, %229 : vector<1x32xf32>
    %231 = arith.negf %230 : vector<1x32xf32>
    %232 = math.exp %231 : vector<1x32xf32>
    %cst_42 = arith.constant 1.000000e+00 : f32
    %233 = vector.broadcast %cst_42 : f32 to vector<1x32xf32>
    %234 = arith.addf %233, %232 : vector<1x32xf32>
    %235 = arith.divf %233, %234 : vector<1x32xf32>
    %236 = vector.extract_strided_slice %217 {offsets = [0, 64], sizes = [1, 32], strides = [1, 1]} : vector<1x96xf32> to vector<1x32xf32>
    %237 = vector.extract_strided_slice %219 {offsets = [0, 64], sizes = [1, 32], strides = [1, 1]} : vector<1x96xf32> to vector<1x32xf32>
    %238 = arith.mulf %227, %237 : vector<1x32xf32>
    %239 = arith.addf %236, %238 : vector<1x32xf32>
    %240 = math.tanh %239 : vector<1x32xf32>
    %cst_43 = arith.constant 1.000000e+00 : f32
    %241 = vector.broadcast %cst_43 : f32 to vector<1x32xf32>
    %242 = arith.subf %241, %235 : vector<1x32xf32>
    %243 = arith.mulf %242, %240 : vector<1x32xf32>
    %244 = arith.mulf %235, %204 : vector<1x32xf32>
    %245 = arith.addf %243, %244 : vector<1x32xf32>
    %246 = vector.broadcast %c5_i32 : i32 to vector<8x1xi32>
    %247 = arith.cmpi eq, %4, %246 : vector<8x1xi32>
    %248 = vector.shape_cast %247 : vector<8x1xi1> to vector<8x1xi1>
    %249 = vector.broadcast %248 : vector<8x1xi1> to vector<8x32xi1>
    %250 = vector.shape_cast %245 : vector<1x32xf32> to vector<1x32xf32>
    %251 = vector.broadcast %250 : vector<1x32xf32> to vector<8x32xf32>
    %252 = arith.select %249, %251, %211 : vector<8x32xi1>, vector<8x32xf32>
    %c6_i32 = arith.constant 6 : i32
    %253 = arith.index_cast %c6_i32 : i32 to index
    %254 = memref.load %arg0[%253] : memref<8xi32, #tpu.memory_space<smem>>
    %255 = arith.index_cast %254 : i32 to index
    %c0_44 = arith.constant 0 : index
    %256 = vector.load %arg2[%255, %c0_44] : memref<64x32xf32, #tpu.memory_space<vmem>>, vector<1x32xf32>
    %cst_45 = arith.constant dense<0.000000e+00> : vector<1x96xf32>
    %257 = tpu.matmul %256, %0, %cst_45 {dimension_numbers = #tpu.dot_dimension_numbers<[1], [0], [0], [1], [0, 0, 1, 1], [], []>} : vector<1x32xf32>, vector<32x96xf32>, vector<1x96xf32> -> vector<1x96xf32>
    %258 = arith.addf %257, %2 : vector<1x96xf32>
    %cst_46 = arith.constant dense<0.000000e+00> : vector<1x96xf32>
    %259 = tpu.matmul %245, %1, %cst_46 {dimension_numbers = #tpu.dot_dimension_numbers<[1], [0], [0], [1], [0, 0, 1, 1], [], []>} : vector<1x32xf32>, vector<32x96xf32>, vector<1x96xf32> -> vector<1x96xf32>
    %260 = arith.addf %259, %3 : vector<1x96xf32>
    %261 = vector.extract_strided_slice %258 {offsets = [0, 0], sizes = [1, 32], strides = [1, 1]} : vector<1x96xf32> to vector<1x32xf32>
    %262 = vector.extract_strided_slice %260 {offsets = [0, 0], sizes = [1, 32], strides = [1, 1]} : vector<1x96xf32> to vector<1x32xf32>
    %263 = arith.addf %261, %262 : vector<1x32xf32>
    %264 = arith.negf %263 : vector<1x32xf32>
    %265 = math.exp %264 : vector<1x32xf32>
    %cst_47 = arith.constant 1.000000e+00 : f32
    %266 = vector.broadcast %cst_47 : f32 to vector<1x32xf32>
    %267 = arith.addf %266, %265 : vector<1x32xf32>
    %268 = arith.divf %266, %267 : vector<1x32xf32>
    %269 = vector.extract_strided_slice %258 {offsets = [0, 32], sizes = [1, 32], strides = [1, 1]} : vector<1x96xf32> to vector<1x32xf32>
    %270 = vector.extract_strided_slice %260 {offsets = [0, 32], sizes = [1, 32], strides = [1, 1]} : vector<1x96xf32> to vector<1x32xf32>
    %271 = arith.addf %269, %270 : vector<1x32xf32>
    %272 = arith.negf %271 : vector<1x32xf32>
    %273 = math.exp %272 : vector<1x32xf32>
    %cst_48 = arith.constant 1.000000e+00 : f32
    %274 = vector.broadcast %cst_48 : f32 to vector<1x32xf32>
    %275 = arith.addf %274, %273 : vector<1x32xf32>
    %276 = arith.divf %274, %275 : vector<1x32xf32>
    %277 = vector.extract_strided_slice %258 {offsets = [0, 64], sizes = [1, 32], strides = [1, 1]} : vector<1x96xf32> to vector<1x32xf32>
    %278 = vector.extract_strided_slice %260 {offsets = [0, 64], sizes = [1, 32], strides = [1, 1]} : vector<1x96xf32> to vector<1x32xf32>
    %279 = arith.mulf %268, %278 : vector<1x32xf32>
    %280 = arith.addf %277, %279 : vector<1x32xf32>
    %281 = math.tanh %280 : vector<1x32xf32>
    %cst_49 = arith.constant 1.000000e+00 : f32
    %282 = vector.broadcast %cst_49 : f32 to vector<1x32xf32>
    %283 = arith.subf %282, %276 : vector<1x32xf32>
    %284 = arith.mulf %283, %281 : vector<1x32xf32>
    %285 = arith.mulf %276, %245 : vector<1x32xf32>
    %286 = arith.addf %284, %285 : vector<1x32xf32>
    %287 = vector.broadcast %c6_i32 : i32 to vector<8x1xi32>
    %288 = arith.cmpi eq, %4, %287 : vector<8x1xi32>
    %289 = vector.shape_cast %288 : vector<8x1xi1> to vector<8x1xi1>
    %290 = vector.broadcast %289 : vector<8x1xi1> to vector<8x32xi1>
    %291 = vector.shape_cast %286 : vector<1x32xf32> to vector<1x32xf32>
    %292 = vector.broadcast %291 : vector<1x32xf32> to vector<8x32xf32>
    %293 = arith.select %290, %292, %252 : vector<8x32xi1>, vector<8x32xf32>
    %c7_i32 = arith.constant 7 : i32
    %294 = arith.index_cast %c7_i32 : i32 to index
    %295 = memref.load %arg0[%294] : memref<8xi32, #tpu.memory_space<smem>>
    %296 = arith.index_cast %295 : i32 to index
    %c0_50 = arith.constant 0 : index
    %297 = vector.load %arg2[%296, %c0_50] : memref<64x32xf32, #tpu.memory_space<vmem>>, vector<1x32xf32>
    %cst_51 = arith.constant dense<0.000000e+00> : vector<1x96xf32>
    %298 = tpu.matmul %297, %0, %cst_51 {dimension_numbers = #tpu.dot_dimension_numbers<[1], [0], [0], [1], [0, 0, 1, 1], [], []>} : vector<1x32xf32>, vector<32x96xf32>, vector<1x96xf32> -> vector<1x96xf32>
    %299 = arith.addf %298, %2 : vector<1x96xf32>
    %cst_52 = arith.constant dense<0.000000e+00> : vector<1x96xf32>
    %300 = tpu.matmul %286, %1, %cst_52 {dimension_numbers = #tpu.dot_dimension_numbers<[1], [0], [0], [1], [0, 0, 1, 1], [], []>} : vector<1x32xf32>, vector<32x96xf32>, vector<1x96xf32> -> vector<1x96xf32>
    %301 = arith.addf %300, %3 : vector<1x96xf32>
    %302 = vector.extract_strided_slice %299 {offsets = [0, 0], sizes = [1, 32], strides = [1, 1]} : vector<1x96xf32> to vector<1x32xf32>
    %303 = vector.extract_strided_slice %301 {offsets = [0, 0], sizes = [1, 32], strides = [1, 1]} : vector<1x96xf32> to vector<1x32xf32>
    %304 = arith.addf %302, %303 : vector<1x32xf32>
    %305 = arith.negf %304 : vector<1x32xf32>
    %306 = math.exp %305 : vector<1x32xf32>
    %cst_53 = arith.constant 1.000000e+00 : f32
    %307 = vector.broadcast %cst_53 : f32 to vector<1x32xf32>
    %308 = arith.addf %307, %306 : vector<1x32xf32>
    %309 = arith.divf %307, %308 : vector<1x32xf32>
    %310 = vector.extract_strided_slice %299 {offsets = [0, 32], sizes = [1, 32], strides = [1, 1]} : vector<1x96xf32> to vector<1x32xf32>
    %311 = vector.extract_strided_slice %301 {offsets = [0, 32], sizes = [1, 32], strides = [1, 1]} : vector<1x96xf32> to vector<1x32xf32>
    %312 = arith.addf %310, %311 : vector<1x32xf32>
    %313 = arith.negf %312 : vector<1x32xf32>
    %314 = math.exp %313 : vector<1x32xf32>
    %cst_54 = arith.constant 1.000000e+00 : f32
    %315 = vector.broadcast %cst_54 : f32 to vector<1x32xf32>
    %316 = arith.addf %315, %314 : vector<1x32xf32>
    %317 = arith.divf %315, %316 : vector<1x32xf32>
    %318 = vector.extract_strided_slice %299 {offsets = [0, 64], sizes = [1, 32], strides = [1, 1]} : vector<1x96xf32> to vector<1x32xf32>
    %319 = vector.extract_strided_slice %301 {offsets = [0, 64], sizes = [1, 32], strides = [1, 1]} : vector<1x96xf32> to vector<1x32xf32>
    %320 = arith.mulf %309, %319 : vector<1x32xf32>
    %321 = arith.addf %318, %320 : vector<1x32xf32>
    %322 = math.tanh %321 : vector<1x32xf32>
    %cst_55 = arith.constant 1.000000e+00 : f32
    %323 = vector.broadcast %cst_55 : f32 to vector<1x32xf32>
    %324 = arith.subf %323, %317 : vector<1x32xf32>
    %325 = arith.mulf %324, %322 : vector<1x32xf32>
    %326 = arith.mulf %317, %286 : vector<1x32xf32>
    %327 = arith.addf %325, %326 : vector<1x32xf32>
    %328 = vector.broadcast %c7_i32 : i32 to vector<8x1xi32>
    %329 = arith.cmpi eq, %4, %328 : vector<8x1xi32>
    %330 = vector.shape_cast %329 : vector<8x1xi1> to vector<8x1xi1>
    %331 = vector.broadcast %330 : vector<8x1xi1> to vector<8x32xi1>
    %332 = vector.shape_cast %327 : vector<1x32xf32> to vector<1x32xf32>
    %333 = vector.broadcast %332 : vector<1x32xf32> to vector<8x32xf32>
    %334 = arith.select %331, %333, %293 : vector<8x32xi1>, vector<8x32xf32>
    %c8_i32 = arith.constant 8 : i32
    %335 = tpu.iota {dimensions = array<i32: 0>} : vector<32x32xi32>
    %336 = tpu.iota {dimensions = array<i32: 1>} : vector<32x32xi32>
    %337 = arith.cmpi eq, %335, %336 : vector<32x32xi32>
    %338 = arith.extui %337 : vector<32x32xi1> to vector<32x32xi32>
    %339 = arith.sitofp %338 : vector<32x32xi32> to vector<32x32xf32>
    %cst_56 = arith.constant dense<0.000000e+00> : vector<32x8xf32>
    %340 = tpu.matmul %339, %334, %cst_56 {dimension_numbers = #tpu.dot_dimension_numbers<[1], [1], [0], [0], [0, 0, 1, 0], [], []>} : vector<32x32xf32>, vector<8x32xf32>, vector<32x8xf32> -> vector<32x8xf32>
    %c0_57 = arith.constant 0 : index
    %c0_58 = arith.constant 0 : index
    %341 = vector.load %arg7[%c0_57, %c0_58] : memref<32x96xf32, #tpu.memory_space<vmem>>, vector<32x96xf32>
    %c0_59 = arith.constant 0 : index
    %c0_60 = arith.constant 0 : index
    %342 = vector.load %arg8[%c0_59, %c0_60] : memref<32x96xf32, #tpu.memory_space<vmem>>, vector<32x96xf32>
    %c0_61 = arith.constant 0 : index
    %c0_62 = arith.constant 0 : index
    %343 = vector.load %arg9[%c0_61, %c0_62] : memref<1x96xf32, #tpu.memory_space<vmem>>, vector<1x96xf32>
    %c0_63 = arith.constant 0 : index
    %c0_64 = arith.constant 0 : index
    %344 = vector.load %arg10[%c0_63, %c0_64] : memref<1x96xf32, #tpu.memory_space<vmem>>, vector<1x96xf32>
    %c0_65 = arith.constant 0 : index
    %c0_66 = arith.constant 0 : index
    %345 = vector.load %arg11[%c0_65, %c0_66] : memref<32x32xf32, #tpu.memory_space<vmem>>, vector<32x32xf32>
    %c0_67 = arith.constant 0 : index
    %c0_68 = arith.constant 0 : index
    %346 = vector.load %arg12[%c0_67, %c0_68] : memref<32x32xf32, #tpu.memory_space<vmem>>, vector<32x32xf32>
    %c0_69 = arith.constant 0 : index
    %c0_70 = arith.constant 0 : index
    %347 = vector.load %arg13[%c0_69, %c0_70] : memref<1x32xf32, #tpu.memory_space<vmem>>, vector<1x32xf32>
    %c0_71 = arith.constant 0 : index
    %c0_72 = arith.constant 0 : index
    %348 = vector.load %arg14[%c0_71, %c0_72] : memref<32x64xf32, #tpu.memory_space<vmem>>, vector<32x64xf32>
    %c0_73 = arith.constant 0 : index
    %c0_74 = arith.constant 0 : index
    %349 = vector.load %arg15[%c0_73, %c0_74] : memref<1x64xf32, #tpu.memory_space<vmem>>, vector<1x64xf32>
    %c0_75 = arith.constant 0 : index
    %350 = memref.load %arg1[%c0_75] : memref<1xi32, #tpu.memory_space<smem>>
    %351 = tpu.iota {dimensions = array<i32: 1>} : vector<1x8xi32>
    %352 = vector.broadcast %350 : i32 to vector<1x8xi32>
    %353 = arith.cmpi slt, %351, %352 : vector<1x8xi32>
    %354 = tpu.iota {dimensions = array<i32: 1>} : vector<1x64xi32>
    %355 = tpu.iota {dimensions = array<i32: 1>} : vector<1x8xi32>
    %c1_i32_76 = arith.constant 1 : i32
    %356 = vector.broadcast %c1_i32_76 : i32 to vector<1x1xi32>
    %c0_i32_77 = arith.constant 0 : i32
    %357 = vector.broadcast %c0_i32_77 : i32 to vector<1x8xi32>
    %cst_78 = arith.constant 0.000000e+00 : f32
    %358 = vector.broadcast %cst_78 : f32 to vector<1x8xf32>
    %c0_i32_79 = arith.constant 0 : i32
    %359 = vector.broadcast %356 : vector<1x1xi32> to vector<1x64xi32>
    %360 = arith.cmpi eq, %354, %359 : vector<1x64xi32>
    %361 = arith.extui %360 : vector<1x64xi1> to vector<1x64xi32>
    %362 = arith.sitofp %361 : vector<1x64xi32> to vector<1x64xf32>
    %c0_80 = arith.constant 0 : index
    %c0_81 = arith.constant 0 : index
    %363 = vector.load %arg2[%c0_80, %c0_81] : memref<64x32xf32, #tpu.memory_space<vmem>>, vector<64x32xf32>
    %cst_82 = arith.constant dense<0.000000e+00> : vector<1x32xf32>
    %364 = tpu.matmul %362, %363, %cst_82 {dimension_numbers = #tpu.dot_dimension_numbers<[1], [0], [0], [1], [0, 0, 1, 1], [], []>} : vector<1x64xf32>, vector<64x32xf32>, vector<1x32xf32> -> vector<1x32xf32>
    %cst_83 = arith.constant dense<0.000000e+00> : vector<1x96xf32>
    %365 = tpu.matmul %364, %341, %cst_83 {dimension_numbers = #tpu.dot_dimension_numbers<[1], [0], [0], [1], [0, 0, 1, 1], [], []>} : vector<1x32xf32>, vector<32x96xf32>, vector<1x96xf32> -> vector<1x96xf32>
    %366 = arith.addf %365, %343 : vector<1x96xf32>
    %cst_84 = arith.constant dense<0.000000e+00> : vector<1x96xf32>
    %367 = tpu.matmul %327, %342, %cst_84 {dimension_numbers = #tpu.dot_dimension_numbers<[1], [0], [0], [1], [0, 0, 1, 1], [], []>} : vector<1x32xf32>, vector<32x96xf32>, vector<1x96xf32> -> vector<1x96xf32>
    %368 = arith.addf %367, %344 : vector<1x96xf32>
    %369 = vector.extract_strided_slice %366 {offsets = [0, 0], sizes = [1, 32], strides = [1, 1]} : vector<1x96xf32> to vector<1x32xf32>
    %370 = vector.extract_strided_slice %368 {offsets = [0, 0], sizes = [1, 32], strides = [1, 1]} : vector<1x96xf32> to vector<1x32xf32>
    %371 = arith.addf %369, %370 : vector<1x32xf32>
    %372 = arith.negf %371 : vector<1x32xf32>
    %373 = math.exp %372 : vector<1x32xf32>
    %cst_85 = arith.constant 1.000000e+00 : f32
    %374 = vector.broadcast %cst_85 : f32 to vector<1x32xf32>
    %375 = arith.addf %374, %373 : vector<1x32xf32>
    %376 = arith.divf %374, %375 : vector<1x32xf32>
    %377 = vector.extract_strided_slice %366 {offsets = [0, 32], sizes = [1, 32], strides = [1, 1]} : vector<1x96xf32> to vector<1x32xf32>
    %378 = vector.extract_strided_slice %368 {offsets = [0, 32], sizes = [1, 32], strides = [1, 1]} : vector<1x96xf32> to vector<1x32xf32>
    %379 = arith.addf %377, %378 : vector<1x32xf32>
    %380 = arith.negf %379 : vector<1x32xf32>
    %381 = math.exp %380 : vector<1x32xf32>
    %cst_86 = arith.constant 1.000000e+00 : f32
    %382 = vector.broadcast %cst_86 : f32 to vector<1x32xf32>
    %383 = arith.addf %382, %381 : vector<1x32xf32>
    %384 = arith.divf %382, %383 : vector<1x32xf32>
    %385 = vector.extract_strided_slice %366 {offsets = [0, 64], sizes = [1, 32], strides = [1, 1]} : vector<1x96xf32> to vector<1x32xf32>
    %386 = vector.extract_strided_slice %368 {offsets = [0, 64], sizes = [1, 32], strides = [1, 1]} : vector<1x96xf32> to vector<1x32xf32>
    %387 = arith.mulf %376, %386 : vector<1x32xf32>
    %388 = arith.addf %385, %387 : vector<1x32xf32>
    %389 = math.tanh %388 : vector<1x32xf32>
    %cst_87 = arith.constant 1.000000e+00 : f32
    %390 = vector.broadcast %cst_87 : f32 to vector<1x32xf32>
    %391 = arith.subf %390, %384 : vector<1x32xf32>
    %392 = arith.mulf %391, %389 : vector<1x32xf32>
    %393 = arith.mulf %384, %327 : vector<1x32xf32>
    %394 = arith.addf %392, %393 : vector<1x32xf32>
    %cst_88 = arith.constant dense<0.000000e+00> : vector<1x8xf32>
    %395 = tpu.matmul %394, %340, %cst_88 {dimension_numbers = #tpu.dot_dimension_numbers<[1], [0], [0], [1], [0, 0, 1, 1], [], []>} : vector<1x32xf32>, vector<32x8xf32>, vector<1x8xf32> -> vector<1x8xf32>
    %cst_89 = arith.constant -1.000000e+30 : f32
    %396 = vector.broadcast %cst_89 : f32 to vector<1x8xf32>
    %397 = arith.select %353, %395, %396 : vector<1x8xi1>, vector<1x8xf32>
    %cst_90 = arith.constant dense<0xFF800000> : vector<1xf32>
    %398 = vector.multi_reduction <maximumf>, %397, %cst_90 [1] : vector<1x8xf32> to vector<1xf32>
    %399 = vector.shape_cast %398 : vector<1xf32> to vector<1x1xf32>
    %400 = vector.broadcast %399 : vector<1x1xf32> to vector<1x8xf32>
    %401 = arith.subf %397, %400 : vector<1x8xf32>
    %402 = math.exp %401 : vector<1x8xf32>
    %cst_91 = arith.constant 0.000000e+00 : f32
    %403 = vector.broadcast %cst_91 : f32 to vector<1x8xf32>
    %404 = arith.select %353, %402, %403 : vector<1x8xi1>, vector<1x8xf32>
    %cst_92 = arith.constant dense<0.000000e+00> : vector<1xf32>
    %405 = vector.multi_reduction <add>, %404, %cst_92 [1] : vector<1x8xf32> to vector<1xf32>
    %406 = vector.shape_cast %405 : vector<1xf32> to vector<1x1xf32>
    %cst_93 = arith.constant 1.000000e-30 : f32
    %407 = vector.broadcast %cst_93 : f32 to vector<1x1xf32>
    %408 = arith.maximumf %406, %407 : vector<1x1xf32>
    %409 = tpu.reciprocal %408 : vector<1x1xf32> -> vector<1x1xf32>
    %410 = vector.broadcast %409 : vector<1x1xf32> to vector<1x8xf32>
    %411 = arith.mulf %404, %410 : vector<1x8xf32>
    %cst_94 = arith.constant dense<0.000000e+00> : vector<1x32xf32>
    %412 = tpu.matmul %411, %334, %cst_94 {dimension_numbers = #tpu.dot_dimension_numbers<[1], [0], [0], [1], [0, 0, 1, 1], [], []>} : vector<1x8xf32>, vector<8x32xf32>, vector<1x32xf32> -> vector<1x32xf32>
    %cst_95 = arith.constant dense<0.000000e+00> : vector<1x32xf32>
    %413 = tpu.matmul %394, %345, %cst_95 {dimension_numbers = #tpu.dot_dimension_numbers<[1], [0], [0], [1], [0, 0, 1, 1], [], []>} : vector<1x32xf32>, vector<32x32xf32>, vector<1x32xf32> -> vector<1x32xf32>
    %cst_96 = arith.constant dense<0.000000e+00> : vector<1x32xf32>
    %414 = tpu.matmul %412, %346, %cst_96 {dimension_numbers = #tpu.dot_dimension_numbers<[1], [0], [0], [1], [0, 0, 1, 1], [], []>} : vector<1x32xf32>, vector<32x32xf32>, vector<1x32xf32> -> vector<1x32xf32>
    %415 = arith.addf %413, %414 : vector<1x32xf32>
    %416 = arith.addf %415, %347 : vector<1x32xf32>
    %417 = math.tanh %416 : vector<1x32xf32>
    %cst_97 = arith.constant dense<0.000000e+00> : vector<1x64xf32>
    %418 = tpu.matmul %417, %348, %cst_97 {dimension_numbers = #tpu.dot_dimension_numbers<[1], [0], [0], [1], [0, 0, 1, 1], [], []>} : vector<1x32xf32>, vector<32x64xf32>, vector<1x64xf32> -> vector<1x64xf32>
    %419 = arith.addf %418, %349 : vector<1x64xf32>
    %cst_98 = arith.constant dense<0xFF800000> : vector<1xf32>
    %420 = vector.multi_reduction <maximumf>, %419, %cst_98 [1] : vector<1x64xf32> to vector<1xf32>
    %421 = vector.shape_cast %420 : vector<1xf32> to vector<1x1xf32>
    %422 = vector.broadcast %421 : vector<1x1xf32> to vector<1x64xf32>
    %423 = arith.cmpf oeq, %419, %422 : vector<1x64xf32>
    %c64_i32 = arith.constant 64 : i32
    %424 = vector.broadcast %c64_i32 : i32 to vector<1x64xi32>
    %425 = arith.select %423, %354, %424 : vector<1x64xi1>, vector<1x64xi32>
    %cst_99 = arith.constant dense<2147483647> : vector<1xi32>
    %426 = vector.multi_reduction <minsi>, %425, %cst_99 [1] : vector<1x64xi32> to vector<1xi32>
    %427 = vector.shape_cast %426 : vector<1xi32> to vector<1x1xi32>
    %428 = vector.broadcast %421 : vector<1x1xf32> to vector<1x64xf32>
    %429 = arith.subf %419, %428 : vector<1x64xf32>
    %430 = math.exp %429 : vector<1x64xf32>
    %cst_100 = arith.constant dense<0.000000e+00> : vector<1xf32>
    %431 = vector.multi_reduction <add>, %430, %cst_100 [1] : vector<1x64xf32> to vector<1xf32>
    %432 = vector.shape_cast %431 : vector<1xf32> to vector<1x1xf32>
    %433 = tpu.reciprocal %432 {approx = true} : vector<1x1xf32> -> vector<1x1xf32>
    %434 = vector.broadcast %c0_i32_79 : i32 to vector<1x8xi32>
    %435 = arith.cmpi eq, %355, %434 : vector<1x8xi32>
    %436 = vector.shape_cast %427 : vector<1x1xi32> to vector<1x1xi32>
    %437 = vector.broadcast %436 : vector<1x1xi32> to vector<1x8xi32>
    %438 = arith.select %435, %437, %357 : vector<1x8xi1>, vector<1x8xi32>
    %439 = vector.shape_cast %433 : vector<1x1xf32> to vector<1x1xf32>
    %440 = vector.broadcast %439 : vector<1x1xf32> to vector<1x8xf32>
    %441 = arith.select %435, %440, %358 : vector<1x8xi1>, vector<1x8xf32>
    %c1_i32_101 = arith.constant 1 : i32
    %442 = vector.broadcast %427 : vector<1x1xi32> to vector<1x64xi32>
    %443 = arith.cmpi eq, %354, %442 : vector<1x64xi32>
    %444 = arith.extui %443 : vector<1x64xi1> to vector<1x64xi32>
    %445 = arith.sitofp %444 : vector<1x64xi32> to vector<1x64xf32>
    %c0_102 = arith.constant 0 : index
    %c0_103 = arith.constant 0 : index
    %446 = vector.load %arg2[%c0_102, %c0_103] : memref<64x32xf32, #tpu.memory_space<vmem>>, vector<64x32xf32>
    %cst_104 = arith.constant dense<0.000000e+00> : vector<1x32xf32>
    %447 = tpu.matmul %445, %446, %cst_104 {dimension_numbers = #tpu.dot_dimension_numbers<[1], [0], [0], [1], [0, 0, 1, 1], [], []>} : vector<1x64xf32>, vector<64x32xf32>, vector<1x32xf32> -> vector<1x32xf32>
    %cst_105 = arith.constant dense<0.000000e+00> : vector<1x96xf32>
    %448 = tpu.matmul %447, %341, %cst_105 {dimension_numbers = #tpu.dot_dimension_numbers<[1], [0], [0], [1], [0, 0, 1, 1], [], []>} : vector<1x32xf32>, vector<32x96xf32>, vector<1x96xf32> -> vector<1x96xf32>
    %449 = arith.addf %448, %343 : vector<1x96xf32>
    %cst_106 = arith.constant dense<0.000000e+00> : vector<1x96xf32>
    %450 = tpu.matmul %394, %342, %cst_106 {dimension_numbers = #tpu.dot_dimension_numbers<[1], [0], [0], [1], [0, 0, 1, 1], [], []>} : vector<1x32xf32>, vector<32x96xf32>, vector<1x96xf32> -> vector<1x96xf32>
    %451 = arith.addf %450, %344 : vector<1x96xf32>
    %452 = vector.extract_strided_slice %449 {offsets = [0, 0], sizes = [1, 32], strides = [1, 1]} : vector<1x96xf32> to vector<1x32xf32>
    %453 = vector.extract_strided_slice %451 {offsets = [0, 0], sizes = [1, 32], strides = [1, 1]} : vector<1x96xf32> to vector<1x32xf32>
    %454 = arith.addf %452, %453 : vector<1x32xf32>
    %455 = arith.negf %454 : vector<1x32xf32>
    %456 = math.exp %455 : vector<1x32xf32>
    %cst_107 = arith.constant 1.000000e+00 : f32
    %457 = vector.broadcast %cst_107 : f32 to vector<1x32xf32>
    %458 = arith.addf %457, %456 : vector<1x32xf32>
    %459 = arith.divf %457, %458 : vector<1x32xf32>
    %460 = vector.extract_strided_slice %449 {offsets = [0, 32], sizes = [1, 32], strides = [1, 1]} : vector<1x96xf32> to vector<1x32xf32>
    %461 = vector.extract_strided_slice %451 {offsets = [0, 32], sizes = [1, 32], strides = [1, 1]} : vector<1x96xf32> to vector<1x32xf32>
    %462 = arith.addf %460, %461 : vector<1x32xf32>
    %463 = arith.negf %462 : vector<1x32xf32>
    %464 = math.exp %463 : vector<1x32xf32>
    %cst_108 = arith.constant 1.000000e+00 : f32
    %465 = vector.broadcast %cst_108 : f32 to vector<1x32xf32>
    %466 = arith.addf %465, %464 : vector<1x32xf32>
    %467 = arith.divf %465, %466 : vector<1x32xf32>
    %468 = vector.extract_strided_slice %449 {offsets = [0, 64], sizes = [1, 32], strides = [1, 1]} : vector<1x96xf32> to vector<1x32xf32>
    %469 = vector.extract_strided_slice %451 {offsets = [0, 64], sizes = [1, 32], strides = [1, 1]} : vector<1x96xf32> to vector<1x32xf32>
    %470 = arith.mulf %459, %469 : vector<1x32xf32>
    %471 = arith.addf %468, %470 : vector<1x32xf32>
    %472 = math.tanh %471 : vector<1x32xf32>
    %cst_109 = arith.constant 1.000000e+00 : f32
    %473 = vector.broadcast %cst_109 : f32 to vector<1x32xf32>
    %474 = arith.subf %473, %467 : vector<1x32xf32>
    %475 = arith.mulf %474, %472 : vector<1x32xf32>
    %476 = arith.mulf %467, %394 : vector<1x32xf32>
    %477 = arith.addf %475, %476 : vector<1x32xf32>
    %cst_110 = arith.constant dense<0.000000e+00> : vector<1x8xf32>
    %478 = tpu.matmul %477, %340, %cst_110 {dimension_numbers = #tpu.dot_dimension_numbers<[1], [0], [0], [1], [0, 0, 1, 1], [], []>} : vector<1x32xf32>, vector<32x8xf32>, vector<1x8xf32> -> vector<1x8xf32>
    %cst_111 = arith.constant -1.000000e+30 : f32
    %479 = vector.broadcast %cst_111 : f32 to vector<1x8xf32>
    %480 = arith.select %353, %478, %479 : vector<1x8xi1>, vector<1x8xf32>
    %cst_112 = arith.constant dense<0xFF800000> : vector<1xf32>
    %481 = vector.multi_reduction <maximumf>, %480, %cst_112 [1] : vector<1x8xf32> to vector<1xf32>
    %482 = vector.shape_cast %481 : vector<1xf32> to vector<1x1xf32>
    %483 = vector.broadcast %482 : vector<1x1xf32> to vector<1x8xf32>
    %484 = arith.subf %480, %483 : vector<1x8xf32>
    %485 = math.exp %484 : vector<1x8xf32>
    %cst_113 = arith.constant 0.000000e+00 : f32
    %486 = vector.broadcast %cst_113 : f32 to vector<1x8xf32>
    %487 = arith.select %353, %485, %486 : vector<1x8xi1>, vector<1x8xf32>
    %cst_114 = arith.constant dense<0.000000e+00> : vector<1xf32>
    %488 = vector.multi_reduction <add>, %487, %cst_114 [1] : vector<1x8xf32> to vector<1xf32>
    %489 = vector.shape_cast %488 : vector<1xf32> to vector<1x1xf32>
    %cst_115 = arith.constant 1.000000e-30 : f32
    %490 = vector.broadcast %cst_115 : f32 to vector<1x1xf32>
    %491 = arith.maximumf %489, %490 : vector<1x1xf32>
    %492 = tpu.reciprocal %491 : vector<1x1xf32> -> vector<1x1xf32>
    %493 = vector.broadcast %492 : vector<1x1xf32> to vector<1x8xf32>
    %494 = arith.mulf %487, %493 : vector<1x8xf32>
    %cst_116 = arith.constant dense<0.000000e+00> : vector<1x32xf32>
    %495 = tpu.matmul %494, %334, %cst_116 {dimension_numbers = #tpu.dot_dimension_numbers<[1], [0], [0], [1], [0, 0, 1, 1], [], []>} : vector<1x8xf32>, vector<8x32xf32>, vector<1x32xf32> -> vector<1x32xf32>
    %cst_117 = arith.constant dense<0.000000e+00> : vector<1x32xf32>
    %496 = tpu.matmul %477, %345, %cst_117 {dimension_numbers = #tpu.dot_dimension_numbers<[1], [0], [0], [1], [0, 0, 1, 1], [], []>} : vector<1x32xf32>, vector<32x32xf32>, vector<1x32xf32> -> vector<1x32xf32>
    %cst_118 = arith.constant dense<0.000000e+00> : vector<1x32xf32>
    %497 = tpu.matmul %495, %346, %cst_118 {dimension_numbers = #tpu.dot_dimension_numbers<[1], [0], [0], [1], [0, 0, 1, 1], [], []>} : vector<1x32xf32>, vector<32x32xf32>, vector<1x32xf32> -> vector<1x32xf32>
    %498 = arith.addf %496, %497 : vector<1x32xf32>
    %499 = arith.addf %498, %347 : vector<1x32xf32>
    %500 = math.tanh %499 : vector<1x32xf32>
    %cst_119 = arith.constant dense<0.000000e+00> : vector<1x64xf32>
    %501 = tpu.matmul %500, %348, %cst_119 {dimension_numbers = #tpu.dot_dimension_numbers<[1], [0], [0], [1], [0, 0, 1, 1], [], []>} : vector<1x32xf32>, vector<32x64xf32>, vector<1x64xf32> -> vector<1x64xf32>
    %502 = arith.addf %501, %349 : vector<1x64xf32>
    %cst_120 = arith.constant dense<0xFF800000> : vector<1xf32>
    %503 = vector.multi_reduction <maximumf>, %502, %cst_120 [1] : vector<1x64xf32> to vector<1xf32>
    %504 = vector.shape_cast %503 : vector<1xf32> to vector<1x1xf32>
    %505 = vector.broadcast %504 : vector<1x1xf32> to vector<1x64xf32>
    %506 = arith.cmpf oeq, %502, %505 : vector<1x64xf32>
    %c64_i32_121 = arith.constant 64 : i32
    %507 = vector.broadcast %c64_i32_121 : i32 to vector<1x64xi32>
    %508 = arith.select %506, %354, %507 : vector<1x64xi1>, vector<1x64xi32>
    %cst_122 = arith.constant dense<2147483647> : vector<1xi32>
    %509 = vector.multi_reduction <minsi>, %508, %cst_122 [1] : vector<1x64xi32> to vector<1xi32>
    %510 = vector.shape_cast %509 : vector<1xi32> to vector<1x1xi32>
    %511 = vector.broadcast %504 : vector<1x1xf32> to vector<1x64xf32>
    %512 = arith.subf %502, %511 : vector<1x64xf32>
    %513 = math.exp %512 : vector<1x64xf32>
    %cst_123 = arith.constant dense<0.000000e+00> : vector<1xf32>
    %514 = vector.multi_reduction <add>, %513, %cst_123 [1] : vector<1x64xf32> to vector<1xf32>
    %515 = vector.shape_cast %514 : vector<1xf32> to vector<1x1xf32>
    %516 = tpu.reciprocal %515 {approx = true} : vector<1x1xf32> -> vector<1x1xf32>
    %517 = vector.broadcast %c1_i32_101 : i32 to vector<1x8xi32>
    %518 = arith.cmpi eq, %355, %517 : vector<1x8xi32>
    %519 = vector.shape_cast %510 : vector<1x1xi32> to vector<1x1xi32>
    %520 = vector.broadcast %519 : vector<1x1xi32> to vector<1x8xi32>
    %521 = arith.select %518, %520, %438 : vector<1x8xi1>, vector<1x8xi32>
    %522 = vector.shape_cast %516 : vector<1x1xf32> to vector<1x1xf32>
    %523 = vector.broadcast %522 : vector<1x1xf32> to vector<1x8xf32>
    %524 = arith.select %518, %523, %441 : vector<1x8xi1>, vector<1x8xf32>
    %c2_i32_124 = arith.constant 2 : i32
    %525 = vector.broadcast %510 : vector<1x1xi32> to vector<1x64xi32>
    %526 = arith.cmpi eq, %354, %525 : vector<1x64xi32>
    %527 = arith.extui %526 : vector<1x64xi1> to vector<1x64xi32>
    %528 = arith.sitofp %527 : vector<1x64xi32> to vector<1x64xf32>
    %c0_125 = arith.constant 0 : index
    %c0_126 = arith.constant 0 : index
    %529 = vector.load %arg2[%c0_125, %c0_126] : memref<64x32xf32, #tpu.memory_space<vmem>>, vector<64x32xf32>
    %cst_127 = arith.constant dense<0.000000e+00> : vector<1x32xf32>
    %530 = tpu.matmul %528, %529, %cst_127 {dimension_numbers = #tpu.dot_dimension_numbers<[1], [0], [0], [1], [0, 0, 1, 1], [], []>} : vector<1x64xf32>, vector<64x32xf32>, vector<1x32xf32> -> vector<1x32xf32>
    %cst_128 = arith.constant dense<0.000000e+00> : vector<1x96xf32>
    %531 = tpu.matmul %530, %341, %cst_128 {dimension_numbers = #tpu.dot_dimension_numbers<[1], [0], [0], [1], [0, 0, 1, 1], [], []>} : vector<1x32xf32>, vector<32x96xf32>, vector<1x96xf32> -> vector<1x96xf32>
    %532 = arith.addf %531, %343 : vector<1x96xf32>
    %cst_129 = arith.constant dense<0.000000e+00> : vector<1x96xf32>
    %533 = tpu.matmul %477, %342, %cst_129 {dimension_numbers = #tpu.dot_dimension_numbers<[1], [0], [0], [1], [0, 0, 1, 1], [], []>} : vector<1x32xf32>, vector<32x96xf32>, vector<1x96xf32> -> vector<1x96xf32>
    %534 = arith.addf %533, %344 : vector<1x96xf32>
    %535 = vector.extract_strided_slice %532 {offsets = [0, 0], sizes = [1, 32], strides = [1, 1]} : vector<1x96xf32> to vector<1x32xf32>
    %536 = vector.extract_strided_slice %534 {offsets = [0, 0], sizes = [1, 32], strides = [1, 1]} : vector<1x96xf32> to vector<1x32xf32>
    %537 = arith.addf %535, %536 : vector<1x32xf32>
    %538 = arith.negf %537 : vector<1x32xf32>
    %539 = math.exp %538 : vector<1x32xf32>
    %cst_130 = arith.constant 1.000000e+00 : f32
    %540 = vector.broadcast %cst_130 : f32 to vector<1x32xf32>
    %541 = arith.addf %540, %539 : vector<1x32xf32>
    %542 = arith.divf %540, %541 : vector<1x32xf32>
    %543 = vector.extract_strided_slice %532 {offsets = [0, 32], sizes = [1, 32], strides = [1, 1]} : vector<1x96xf32> to vector<1x32xf32>
    %544 = vector.extract_strided_slice %534 {offsets = [0, 32], sizes = [1, 32], strides = [1, 1]} : vector<1x96xf32> to vector<1x32xf32>
    %545 = arith.addf %543, %544 : vector<1x32xf32>
    %546 = arith.negf %545 : vector<1x32xf32>
    %547 = math.exp %546 : vector<1x32xf32>
    %cst_131 = arith.constant 1.000000e+00 : f32
    %548 = vector.broadcast %cst_131 : f32 to vector<1x32xf32>
    %549 = arith.addf %548, %547 : vector<1x32xf32>
    %550 = arith.divf %548, %549 : vector<1x32xf32>
    %551 = vector.extract_strided_slice %532 {offsets = [0, 64], sizes = [1, 32], strides = [1, 1]} : vector<1x96xf32> to vector<1x32xf32>
    %552 = vector.extract_strided_slice %534 {offsets = [0, 64], sizes = [1, 32], strides = [1, 1]} : vector<1x96xf32> to vector<1x32xf32>
    %553 = arith.mulf %542, %552 : vector<1x32xf32>
    %554 = arith.addf %551, %553 : vector<1x32xf32>
    %555 = math.tanh %554 : vector<1x32xf32>
    %cst_132 = arith.constant 1.000000e+00 : f32
    %556 = vector.broadcast %cst_132 : f32 to vector<1x32xf32>
    %557 = arith.subf %556, %550 : vector<1x32xf32>
    %558 = arith.mulf %557, %555 : vector<1x32xf32>
    %559 = arith.mulf %550, %477 : vector<1x32xf32>
    %560 = arith.addf %558, %559 : vector<1x32xf32>
    %cst_133 = arith.constant dense<0.000000e+00> : vector<1x8xf32>
    %561 = tpu.matmul %560, %340, %cst_133 {dimension_numbers = #tpu.dot_dimension_numbers<[1], [0], [0], [1], [0, 0, 1, 1], [], []>} : vector<1x32xf32>, vector<32x8xf32>, vector<1x8xf32> -> vector<1x8xf32>
    %cst_134 = arith.constant -1.000000e+30 : f32
    %562 = vector.broadcast %cst_134 : f32 to vector<1x8xf32>
    %563 = arith.select %353, %561, %562 : vector<1x8xi1>, vector<1x8xf32>
    %cst_135 = arith.constant dense<0xFF800000> : vector<1xf32>
    %564 = vector.multi_reduction <maximumf>, %563, %cst_135 [1] : vector<1x8xf32> to vector<1xf32>
    %565 = vector.shape_cast %564 : vector<1xf32> to vector<1x1xf32>
    %566 = vector.broadcast %565 : vector<1x1xf32> to vector<1x8xf32>
    %567 = arith.subf %563, %566 : vector<1x8xf32>
    %568 = math.exp %567 : vector<1x8xf32>
    %cst_136 = arith.constant 0.000000e+00 : f32
    %569 = vector.broadcast %cst_136 : f32 to vector<1x8xf32>
    %570 = arith.select %353, %568, %569 : vector<1x8xi1>, vector<1x8xf32>
    %cst_137 = arith.constant dense<0.000000e+00> : vector<1xf32>
    %571 = vector.multi_reduction <add>, %570, %cst_137 [1] : vector<1x8xf32> to vector<1xf32>
    %572 = vector.shape_cast %571 : vector<1xf32> to vector<1x1xf32>
    %cst_138 = arith.constant 1.000000e-30 : f32
    %573 = vector.broadcast %cst_138 : f32 to vector<1x1xf32>
    %574 = arith.maximumf %572, %573 : vector<1x1xf32>
    %575 = tpu.reciprocal %574 : vector<1x1xf32> -> vector<1x1xf32>
    %576 = vector.broadcast %575 : vector<1x1xf32> to vector<1x8xf32>
    %577 = arith.mulf %570, %576 : vector<1x8xf32>
    %cst_139 = arith.constant dense<0.000000e+00> : vector<1x32xf32>
    %578 = tpu.matmul %577, %334, %cst_139 {dimension_numbers = #tpu.dot_dimension_numbers<[1], [0], [0], [1], [0, 0, 1, 1], [], []>} : vector<1x8xf32>, vector<8x32xf32>, vector<1x32xf32> -> vector<1x32xf32>
    %cst_140 = arith.constant dense<0.000000e+00> : vector<1x32xf32>
    %579 = tpu.matmul %560, %345, %cst_140 {dimension_numbers = #tpu.dot_dimension_numbers<[1], [0], [0], [1], [0, 0, 1, 1], [], []>} : vector<1x32xf32>, vector<32x32xf32>, vector<1x32xf32> -> vector<1x32xf32>
    %cst_141 = arith.constant dense<0.000000e+00> : vector<1x32xf32>
    %580 = tpu.matmul %578, %346, %cst_141 {dimension_numbers = #tpu.dot_dimension_numbers<[1], [0], [0], [1], [0, 0, 1, 1], [], []>} : vector<1x32xf32>, vector<32x32xf32>, vector<1x32xf32> -> vector<1x32xf32>
    %581 = arith.addf %579, %580 : vector<1x32xf32>
    %582 = arith.addf %581, %347 : vector<1x32xf32>
    %583 = math.tanh %582 : vector<1x32xf32>
    %cst_142 = arith.constant dense<0.000000e+00> : vector<1x64xf32>
    %584 = tpu.matmul %583, %348, %cst_142 {dimension_numbers = #tpu.dot_dimension_numbers<[1], [0], [0], [1], [0, 0, 1, 1], [], []>} : vector<1x32xf32>, vector<32x64xf32>, vector<1x64xf32> -> vector<1x64xf32>
    %585 = arith.addf %584, %349 : vector<1x64xf32>
    %cst_143 = arith.constant dense<0xFF800000> : vector<1xf32>
    %586 = vector.multi_reduction <maximumf>, %585, %cst_143 [1] : vector<1x64xf32> to vector<1xf32>
    %587 = vector.shape_cast %586 : vector<1xf32> to vector<1x1xf32>
    %588 = vector.broadcast %587 : vector<1x1xf32> to vector<1x64xf32>
    %589 = arith.cmpf oeq, %585, %588 : vector<1x64xf32>
    %c64_i32_144 = arith.constant 64 : i32
    %590 = vector.broadcast %c64_i32_144 : i32 to vector<1x64xi32>
    %591 = arith.select %589, %354, %590 : vector<1x64xi1>, vector<1x64xi32>
    %cst_145 = arith.constant dense<2147483647> : vector<1xi32>
    %592 = vector.multi_reduction <minsi>, %591, %cst_145 [1] : vector<1x64xi32> to vector<1xi32>
    %593 = vector.shape_cast %592 : vector<1xi32> to vector<1x1xi32>
    %594 = vector.broadcast %587 : vector<1x1xf32> to vector<1x64xf32>
    %595 = arith.subf %585, %594 : vector<1x64xf32>
    %596 = math.exp %595 : vector<1x64xf32>
    %cst_146 = arith.constant dense<0.000000e+00> : vector<1xf32>
    %597 = vector.multi_reduction <add>, %596, %cst_146 [1] : vector<1x64xf32> to vector<1xf32>
    %598 = vector.shape_cast %597 : vector<1xf32> to vector<1x1xf32>
    %599 = tpu.reciprocal %598 {approx = true} : vector<1x1xf32> -> vector<1x1xf32>
    %600 = vector.broadcast %c2_i32_124 : i32 to vector<1x8xi32>
    %601 = arith.cmpi eq, %355, %600 : vector<1x8xi32>
    %602 = vector.shape_cast %593 : vector<1x1xi32> to vector<1x1xi32>
    %603 = vector.broadcast %602 : vector<1x1xi32> to vector<1x8xi32>
    %604 = arith.select %601, %603, %521 : vector<1x8xi1>, vector<1x8xi32>
    %605 = vector.shape_cast %599 : vector<1x1xf32> to vector<1x1xf32>
    %606 = vector.broadcast %605 : vector<1x1xf32> to vector<1x8xf32>
    %607 = arith.select %601, %606, %524 : vector<1x8xi1>, vector<1x8xf32>
    %c3_i32_147 = arith.constant 3 : i32
    %608 = vector.broadcast %593 : vector<1x1xi32> to vector<1x64xi32>
    %609 = arith.cmpi eq, %354, %608 : vector<1x64xi32>
    %610 = arith.extui %609 : vector<1x64xi1> to vector<1x64xi32>
    %611 = arith.sitofp %610 : vector<1x64xi32> to vector<1x64xf32>
    %c0_148 = arith.constant 0 : index
    %c0_149 = arith.constant 0 : index
    %612 = vector.load %arg2[%c0_148, %c0_149] : memref<64x32xf32, #tpu.memory_space<vmem>>, vector<64x32xf32>
    %cst_150 = arith.constant dense<0.000000e+00> : vector<1x32xf32>
    %613 = tpu.matmul %611, %612, %cst_150 {dimension_numbers = #tpu.dot_dimension_numbers<[1], [0], [0], [1], [0, 0, 1, 1], [], []>} : vector<1x64xf32>, vector<64x32xf32>, vector<1x32xf32> -> vector<1x32xf32>
    %cst_151 = arith.constant dense<0.000000e+00> : vector<1x96xf32>
    %614 = tpu.matmul %613, %341, %cst_151 {dimension_numbers = #tpu.dot_dimension_numbers<[1], [0], [0], [1], [0, 0, 1, 1], [], []>} : vector<1x32xf32>, vector<32x96xf32>, vector<1x96xf32> -> vector<1x96xf32>
    %615 = arith.addf %614, %343 : vector<1x96xf32>
    %cst_152 = arith.constant dense<0.000000e+00> : vector<1x96xf32>
    %616 = tpu.matmul %560, %342, %cst_152 {dimension_numbers = #tpu.dot_dimension_numbers<[1], [0], [0], [1], [0, 0, 1, 1], [], []>} : vector<1x32xf32>, vector<32x96xf32>, vector<1x96xf32> -> vector<1x96xf32>
    %617 = arith.addf %616, %344 : vector<1x96xf32>
    %618 = vector.extract_strided_slice %615 {offsets = [0, 0], sizes = [1, 32], strides = [1, 1]} : vector<1x96xf32> to vector<1x32xf32>
    %619 = vector.extract_strided_slice %617 {offsets = [0, 0], sizes = [1, 32], strides = [1, 1]} : vector<1x96xf32> to vector<1x32xf32>
    %620 = arith.addf %618, %619 : vector<1x32xf32>
    %621 = arith.negf %620 : vector<1x32xf32>
    %622 = math.exp %621 : vector<1x32xf32>
    %cst_153 = arith.constant 1.000000e+00 : f32
    %623 = vector.broadcast %cst_153 : f32 to vector<1x32xf32>
    %624 = arith.addf %623, %622 : vector<1x32xf32>
    %625 = arith.divf %623, %624 : vector<1x32xf32>
    %626 = vector.extract_strided_slice %615 {offsets = [0, 32], sizes = [1, 32], strides = [1, 1]} : vector<1x96xf32> to vector<1x32xf32>
    %627 = vector.extract_strided_slice %617 {offsets = [0, 32], sizes = [1, 32], strides = [1, 1]} : vector<1x96xf32> to vector<1x32xf32>
    %628 = arith.addf %626, %627 : vector<1x32xf32>
    %629 = arith.negf %628 : vector<1x32xf32>
    %630 = math.exp %629 : vector<1x32xf32>
    %cst_154 = arith.constant 1.000000e+00 : f32
    %631 = vector.broadcast %cst_154 : f32 to vector<1x32xf32>
    %632 = arith.addf %631, %630 : vector<1x32xf32>
    %633 = arith.divf %631, %632 : vector<1x32xf32>
    %634 = vector.extract_strided_slice %615 {offsets = [0, 64], sizes = [1, 32], strides = [1, 1]} : vector<1x96xf32> to vector<1x32xf32>
    %635 = vector.extract_strided_slice %617 {offsets = [0, 64], sizes = [1, 32], strides = [1, 1]} : vector<1x96xf32> to vector<1x32xf32>
    %636 = arith.mulf %625, %635 : vector<1x32xf32>
    %637 = arith.addf %634, %636 : vector<1x32xf32>
    %638 = math.tanh %637 : vector<1x32xf32>
    %cst_155 = arith.constant 1.000000e+00 : f32
    %639 = vector.broadcast %cst_155 : f32 to vector<1x32xf32>
    %640 = arith.subf %639, %633 : vector<1x32xf32>
    %641 = arith.mulf %640, %638 : vector<1x32xf32>
    %642 = arith.mulf %633, %560 : vector<1x32xf32>
    %643 = arith.addf %641, %642 : vector<1x32xf32>
    %cst_156 = arith.constant dense<0.000000e+00> : vector<1x8xf32>
    %644 = tpu.matmul %643, %340, %cst_156 {dimension_numbers = #tpu.dot_dimension_numbers<[1], [0], [0], [1], [0, 0, 1, 1], [], []>} : vector<1x32xf32>, vector<32x8xf32>, vector<1x8xf32> -> vector<1x8xf32>
    %cst_157 = arith.constant -1.000000e+30 : f32
    %645 = vector.broadcast %cst_157 : f32 to vector<1x8xf32>
    %646 = arith.select %353, %644, %645 : vector<1x8xi1>, vector<1x8xf32>
    %cst_158 = arith.constant dense<0xFF800000> : vector<1xf32>
    %647 = vector.multi_reduction <maximumf>, %646, %cst_158 [1] : vector<1x8xf32> to vector<1xf32>
    %648 = vector.shape_cast %647 : vector<1xf32> to vector<1x1xf32>
    %649 = vector.broadcast %648 : vector<1x1xf32> to vector<1x8xf32>
    %650 = arith.subf %646, %649 : vector<1x8xf32>
    %651 = math.exp %650 : vector<1x8xf32>
    %cst_159 = arith.constant 0.000000e+00 : f32
    %652 = vector.broadcast %cst_159 : f32 to vector<1x8xf32>
    %653 = arith.select %353, %651, %652 : vector<1x8xi1>, vector<1x8xf32>
    %cst_160 = arith.constant dense<0.000000e+00> : vector<1xf32>
    %654 = vector.multi_reduction <add>, %653, %cst_160 [1] : vector<1x8xf32> to vector<1xf32>
    %655 = vector.shape_cast %654 : vector<1xf32> to vector<1x1xf32>
    %cst_161 = arith.constant 1.000000e-30 : f32
    %656 = vector.broadcast %cst_161 : f32 to vector<1x1xf32>
    %657 = arith.maximumf %655, %656 : vector<1x1xf32>
    %658 = tpu.reciprocal %657 : vector<1x1xf32> -> vector<1x1xf32>
    %659 = vector.broadcast %658 : vector<1x1xf32> to vector<1x8xf32>
    %660 = arith.mulf %653, %659 : vector<1x8xf32>
    %cst_162 = arith.constant dense<0.000000e+00> : vector<1x32xf32>
    %661 = tpu.matmul %660, %334, %cst_162 {dimension_numbers = #tpu.dot_dimension_numbers<[1], [0], [0], [1], [0, 0, 1, 1], [], []>} : vector<1x8xf32>, vector<8x32xf32>, vector<1x32xf32> -> vector<1x32xf32>
    %cst_163 = arith.constant dense<0.000000e+00> : vector<1x32xf32>
    %662 = tpu.matmul %643, %345, %cst_163 {dimension_numbers = #tpu.dot_dimension_numbers<[1], [0], [0], [1], [0, 0, 1, 1], [], []>} : vector<1x32xf32>, vector<32x32xf32>, vector<1x32xf32> -> vector<1x32xf32>
    %cst_164 = arith.constant dense<0.000000e+00> : vector<1x32xf32>
    %663 = tpu.matmul %661, %346, %cst_164 {dimension_numbers = #tpu.dot_dimension_numbers<[1], [0], [0], [1], [0, 0, 1, 1], [], []>} : vector<1x32xf32>, vector<32x32xf32>, vector<1x32xf32> -> vector<1x32xf32>
    %664 = arith.addf %662, %663 : vector<1x32xf32>
    %665 = arith.addf %664, %347 : vector<1x32xf32>
    %666 = math.tanh %665 : vector<1x32xf32>
    %cst_165 = arith.constant dense<0.000000e+00> : vector<1x64xf32>
    %667 = tpu.matmul %666, %348, %cst_165 {dimension_numbers = #tpu.dot_dimension_numbers<[1], [0], [0], [1], [0, 0, 1, 1], [], []>} : vector<1x32xf32>, vector<32x64xf32>, vector<1x64xf32> -> vector<1x64xf32>
    %668 = arith.addf %667, %349 : vector<1x64xf32>
    %cst_166 = arith.constant dense<0xFF800000> : vector<1xf32>
    %669 = vector.multi_reduction <maximumf>, %668, %cst_166 [1] : vector<1x64xf32> to vector<1xf32>
    %670 = vector.shape_cast %669 : vector<1xf32> to vector<1x1xf32>
    %671 = vector.broadcast %670 : vector<1x1xf32> to vector<1x64xf32>
    %672 = arith.cmpf oeq, %668, %671 : vector<1x64xf32>
    %c64_i32_167 = arith.constant 64 : i32
    %673 = vector.broadcast %c64_i32_167 : i32 to vector<1x64xi32>
    %674 = arith.select %672, %354, %673 : vector<1x64xi1>, vector<1x64xi32>
    %cst_168 = arith.constant dense<2147483647> : vector<1xi32>
    %675 = vector.multi_reduction <minsi>, %674, %cst_168 [1] : vector<1x64xi32> to vector<1xi32>
    %676 = vector.shape_cast %675 : vector<1xi32> to vector<1x1xi32>
    %677 = vector.broadcast %670 : vector<1x1xf32> to vector<1x64xf32>
    %678 = arith.subf %668, %677 : vector<1x64xf32>
    %679 = math.exp %678 : vector<1x64xf32>
    %cst_169 = arith.constant dense<0.000000e+00> : vector<1xf32>
    %680 = vector.multi_reduction <add>, %679, %cst_169 [1] : vector<1x64xf32> to vector<1xf32>
    %681 = vector.shape_cast %680 : vector<1xf32> to vector<1x1xf32>
    %682 = tpu.reciprocal %681 {approx = true} : vector<1x1xf32> -> vector<1x1xf32>
    %683 = vector.broadcast %c3_i32_147 : i32 to vector<1x8xi32>
    %684 = arith.cmpi eq, %355, %683 : vector<1x8xi32>
    %685 = vector.shape_cast %676 : vector<1x1xi32> to vector<1x1xi32>
    %686 = vector.broadcast %685 : vector<1x1xi32> to vector<1x8xi32>
    %687 = arith.select %684, %686, %604 : vector<1x8xi1>, vector<1x8xi32>
    %688 = vector.shape_cast %682 : vector<1x1xf32> to vector<1x1xf32>
    %689 = vector.broadcast %688 : vector<1x1xf32> to vector<1x8xf32>
    %690 = arith.select %684, %689, %607 : vector<1x8xi1>, vector<1x8xf32>
    %c4_i32_170 = arith.constant 4 : i32
    %691 = vector.broadcast %676 : vector<1x1xi32> to vector<1x64xi32>
    %692 = arith.cmpi eq, %354, %691 : vector<1x64xi32>
    %693 = arith.extui %692 : vector<1x64xi1> to vector<1x64xi32>
    %694 = arith.sitofp %693 : vector<1x64xi32> to vector<1x64xf32>
    %c0_171 = arith.constant 0 : index
    %c0_172 = arith.constant 0 : index
    %695 = vector.load %arg2[%c0_171, %c0_172] : memref<64x32xf32, #tpu.memory_space<vmem>>, vector<64x32xf32>
    %cst_173 = arith.constant dense<0.000000e+00> : vector<1x32xf32>
    %696 = tpu.matmul %694, %695, %cst_173 {dimension_numbers = #tpu.dot_dimension_numbers<[1], [0], [0], [1], [0, 0, 1, 1], [], []>} : vector<1x64xf32>, vector<64x32xf32>, vector<1x32xf32> -> vector<1x32xf32>
    %cst_174 = arith.constant dense<0.000000e+00> : vector<1x96xf32>
    %697 = tpu.matmul %696, %341, %cst_174 {dimension_numbers = #tpu.dot_dimension_numbers<[1], [0], [0], [1], [0, 0, 1, 1], [], []>} : vector<1x32xf32>, vector<32x96xf32>, vector<1x96xf32> -> vector<1x96xf32>
    %698 = arith.addf %697, %343 : vector<1x96xf32>
    %cst_175 = arith.constant dense<0.000000e+00> : vector<1x96xf32>
    %699 = tpu.matmul %643, %342, %cst_175 {dimension_numbers = #tpu.dot_dimension_numbers<[1], [0], [0], [1], [0, 0, 1, 1], [], []>} : vector<1x32xf32>, vector<32x96xf32>, vector<1x96xf32> -> vector<1x96xf32>
    %700 = arith.addf %699, %344 : vector<1x96xf32>
    %701 = vector.extract_strided_slice %698 {offsets = [0, 0], sizes = [1, 32], strides = [1, 1]} : vector<1x96xf32> to vector<1x32xf32>
    %702 = vector.extract_strided_slice %700 {offsets = [0, 0], sizes = [1, 32], strides = [1, 1]} : vector<1x96xf32> to vector<1x32xf32>
    %703 = arith.addf %701, %702 : vector<1x32xf32>
    %704 = arith.negf %703 : vector<1x32xf32>
    %705 = math.exp %704 : vector<1x32xf32>
    %cst_176 = arith.constant 1.000000e+00 : f32
    %706 = vector.broadcast %cst_176 : f32 to vector<1x32xf32>
    %707 = arith.addf %706, %705 : vector<1x32xf32>
    %708 = arith.divf %706, %707 : vector<1x32xf32>
    %709 = vector.extract_strided_slice %698 {offsets = [0, 32], sizes = [1, 32], strides = [1, 1]} : vector<1x96xf32> to vector<1x32xf32>
    %710 = vector.extract_strided_slice %700 {offsets = [0, 32], sizes = [1, 32], strides = [1, 1]} : vector<1x96xf32> to vector<1x32xf32>
    %711 = arith.addf %709, %710 : vector<1x32xf32>
    %712 = arith.negf %711 : vector<1x32xf32>
    %713 = math.exp %712 : vector<1x32xf32>
    %cst_177 = arith.constant 1.000000e+00 : f32
    %714 = vector.broadcast %cst_177 : f32 to vector<1x32xf32>
    %715 = arith.addf %714, %713 : vector<1x32xf32>
    %716 = arith.divf %714, %715 : vector<1x32xf32>
    %717 = vector.extract_strided_slice %698 {offsets = [0, 64], sizes = [1, 32], strides = [1, 1]} : vector<1x96xf32> to vector<1x32xf32>
    %718 = vector.extract_strided_slice %700 {offsets = [0, 64], sizes = [1, 32], strides = [1, 1]} : vector<1x96xf32> to vector<1x32xf32>
    %719 = arith.mulf %708, %718 : vector<1x32xf32>
    %720 = arith.addf %717, %719 : vector<1x32xf32>
    %721 = math.tanh %720 : vector<1x32xf32>
    %cst_178 = arith.constant 1.000000e+00 : f32
    %722 = vector.broadcast %cst_178 : f32 to vector<1x32xf32>
    %723 = arith.subf %722, %716 : vector<1x32xf32>
    %724 = arith.mulf %723, %721 : vector<1x32xf32>
    %725 = arith.mulf %716, %643 : vector<1x32xf32>
    %726 = arith.addf %724, %725 : vector<1x32xf32>
    %cst_179 = arith.constant dense<0.000000e+00> : vector<1x8xf32>
    %727 = tpu.matmul %726, %340, %cst_179 {dimension_numbers = #tpu.dot_dimension_numbers<[1], [0], [0], [1], [0, 0, 1, 1], [], []>} : vector<1x32xf32>, vector<32x8xf32>, vector<1x8xf32> -> vector<1x8xf32>
    %cst_180 = arith.constant -1.000000e+30 : f32
    %728 = vector.broadcast %cst_180 : f32 to vector<1x8xf32>
    %729 = arith.select %353, %727, %728 : vector<1x8xi1>, vector<1x8xf32>
    %cst_181 = arith.constant dense<0xFF800000> : vector<1xf32>
    %730 = vector.multi_reduction <maximumf>, %729, %cst_181 [1] : vector<1x8xf32> to vector<1xf32>
    %731 = vector.shape_cast %730 : vector<1xf32> to vector<1x1xf32>
    %732 = vector.broadcast %731 : vector<1x1xf32> to vector<1x8xf32>
    %733 = arith.subf %729, %732 : vector<1x8xf32>
    %734 = math.exp %733 : vector<1x8xf32>
    %cst_182 = arith.constant 0.000000e+00 : f32
    %735 = vector.broadcast %cst_182 : f32 to vector<1x8xf32>
    %736 = arith.select %353, %734, %735 : vector<1x8xi1>, vector<1x8xf32>
    %cst_183 = arith.constant dense<0.000000e+00> : vector<1xf32>
    %737 = vector.multi_reduction <add>, %736, %cst_183 [1] : vector<1x8xf32> to vector<1xf32>
    %738 = vector.shape_cast %737 : vector<1xf32> to vector<1x1xf32>
    %cst_184 = arith.constant 1.000000e-30 : f32
    %739 = vector.broadcast %cst_184 : f32 to vector<1x1xf32>
    %740 = arith.maximumf %738, %739 : vector<1x1xf32>
    %741 = tpu.reciprocal %740 : vector<1x1xf32> -> vector<1x1xf32>
    %742 = vector.broadcast %741 : vector<1x1xf32> to vector<1x8xf32>
    %743 = arith.mulf %736, %742 : vector<1x8xf32>
    %cst_185 = arith.constant dense<0.000000e+00> : vector<1x32xf32>
    %744 = tpu.matmul %743, %334, %cst_185 {dimension_numbers = #tpu.dot_dimension_numbers<[1], [0], [0], [1], [0, 0, 1, 1], [], []>} : vector<1x8xf32>, vector<8x32xf32>, vector<1x32xf32> -> vector<1x32xf32>
    %cst_186 = arith.constant dense<0.000000e+00> : vector<1x32xf32>
    %745 = tpu.matmul %726, %345, %cst_186 {dimension_numbers = #tpu.dot_dimension_numbers<[1], [0], [0], [1], [0, 0, 1, 1], [], []>} : vector<1x32xf32>, vector<32x32xf32>, vector<1x32xf32> -> vector<1x32xf32>
    %cst_187 = arith.constant dense<0.000000e+00> : vector<1x32xf32>
    %746 = tpu.matmul %744, %346, %cst_187 {dimension_numbers = #tpu.dot_dimension_numbers<[1], [0], [0], [1], [0, 0, 1, 1], [], []>} : vector<1x32xf32>, vector<32x32xf32>, vector<1x32xf32> -> vector<1x32xf32>
    %747 = arith.addf %745, %746 : vector<1x32xf32>
    %748 = arith.addf %747, %347 : vector<1x32xf32>
    %749 = math.tanh %748 : vector<1x32xf32>
    %cst_188 = arith.constant dense<0.000000e+00> : vector<1x64xf32>
    %750 = tpu.matmul %749, %348, %cst_188 {dimension_numbers = #tpu.dot_dimension_numbers<[1], [0], [0], [1], [0, 0, 1, 1], [], []>} : vector<1x32xf32>, vector<32x64xf32>, vector<1x64xf32> -> vector<1x64xf32>
    %751 = arith.addf %750, %349 : vector<1x64xf32>
    %cst_189 = arith.constant dense<0xFF800000> : vector<1xf32>
    %752 = vector.multi_reduction <maximumf>, %751, %cst_189 [1] : vector<1x64xf32> to vector<1xf32>
    %753 = vector.shape_cast %752 : vector<1xf32> to vector<1x1xf32>
    %754 = vector.broadcast %753 : vector<1x1xf32> to vector<1x64xf32>
    %755 = arith.cmpf oeq, %751, %754 : vector<1x64xf32>
    %c64_i32_190 = arith.constant 64 : i32
    %756 = vector.broadcast %c64_i32_190 : i32 to vector<1x64xi32>
    %757 = arith.select %755, %354, %756 : vector<1x64xi1>, vector<1x64xi32>
    %cst_191 = arith.constant dense<2147483647> : vector<1xi32>
    %758 = vector.multi_reduction <minsi>, %757, %cst_191 [1] : vector<1x64xi32> to vector<1xi32>
    %759 = vector.shape_cast %758 : vector<1xi32> to vector<1x1xi32>
    %760 = vector.broadcast %753 : vector<1x1xf32> to vector<1x64xf32>
    %761 = arith.subf %751, %760 : vector<1x64xf32>
    %762 = math.exp %761 : vector<1x64xf32>
    %cst_192 = arith.constant dense<0.000000e+00> : vector<1xf32>
    %763 = vector.multi_reduction <add>, %762, %cst_192 [1] : vector<1x64xf32> to vector<1xf32>
    %764 = vector.shape_cast %763 : vector<1xf32> to vector<1x1xf32>
    %765 = tpu.reciprocal %764 {approx = true} : vector<1x1xf32> -> vector<1x1xf32>
    %766 = vector.broadcast %c4_i32_170 : i32 to vector<1x8xi32>
    %767 = arith.cmpi eq, %355, %766 : vector<1x8xi32>
    %768 = vector.shape_cast %759 : vector<1x1xi32> to vector<1x1xi32>
    %769 = vector.broadcast %768 : vector<1x1xi32> to vector<1x8xi32>
    %770 = arith.select %767, %769, %687 : vector<1x8xi1>, vector<1x8xi32>
    %771 = vector.shape_cast %765 : vector<1x1xf32> to vector<1x1xf32>
    %772 = vector.broadcast %771 : vector<1x1xf32> to vector<1x8xf32>
    %773 = arith.select %767, %772, %690 : vector<1x8xi1>, vector<1x8xf32>
    %c5_i32_193 = arith.constant 5 : i32
    %774 = vector.broadcast %759 : vector<1x1xi32> to vector<1x64xi32>
    %775 = arith.cmpi eq, %354, %774 : vector<1x64xi32>
    %776 = arith.extui %775 : vector<1x64xi1> to vector<1x64xi32>
    %777 = arith.sitofp %776 : vector<1x64xi32> to vector<1x64xf32>
    %c0_194 = arith.constant 0 : index
    %c0_195 = arith.constant 0 : index
    %778 = vector.load %arg2[%c0_194, %c0_195] : memref<64x32xf32, #tpu.memory_space<vmem>>, vector<64x32xf32>
    %cst_196 = arith.constant dense<0.000000e+00> : vector<1x32xf32>
    %779 = tpu.matmul %777, %778, %cst_196 {dimension_numbers = #tpu.dot_dimension_numbers<[1], [0], [0], [1], [0, 0, 1, 1], [], []>} : vector<1x64xf32>, vector<64x32xf32>, vector<1x32xf32> -> vector<1x32xf32>
    %cst_197 = arith.constant dense<0.000000e+00> : vector<1x96xf32>
    %780 = tpu.matmul %779, %341, %cst_197 {dimension_numbers = #tpu.dot_dimension_numbers<[1], [0], [0], [1], [0, 0, 1, 1], [], []>} : vector<1x32xf32>, vector<32x96xf32>, vector<1x96xf32> -> vector<1x96xf32>
    %781 = arith.addf %780, %343 : vector<1x96xf32>
    %cst_198 = arith.constant dense<0.000000e+00> : vector<1x96xf32>
    %782 = tpu.matmul %726, %342, %cst_198 {dimension_numbers = #tpu.dot_dimension_numbers<[1], [0], [0], [1], [0, 0, 1, 1], [], []>} : vector<1x32xf32>, vector<32x96xf32>, vector<1x96xf32> -> vector<1x96xf32>
    %783 = arith.addf %782, %344 : vector<1x96xf32>
    %784 = vector.extract_strided_slice %781 {offsets = [0, 0], sizes = [1, 32], strides = [1, 1]} : vector<1x96xf32> to vector<1x32xf32>
    %785 = vector.extract_strided_slice %783 {offsets = [0, 0], sizes = [1, 32], strides = [1, 1]} : vector<1x96xf32> to vector<1x32xf32>
    %786 = arith.addf %784, %785 : vector<1x32xf32>
    %787 = arith.negf %786 : vector<1x32xf32>
    %788 = math.exp %787 : vector<1x32xf32>
    %cst_199 = arith.constant 1.000000e+00 : f32
    %789 = vector.broadcast %cst_199 : f32 to vector<1x32xf32>
    %790 = arith.addf %789, %788 : vector<1x32xf32>
    %791 = arith.divf %789, %790 : vector<1x32xf32>
    %792 = vector.extract_strided_slice %781 {offsets = [0, 32], sizes = [1, 32], strides = [1, 1]} : vector<1x96xf32> to vector<1x32xf32>
    %793 = vector.extract_strided_slice %783 {offsets = [0, 32], sizes = [1, 32], strides = [1, 1]} : vector<1x96xf32> to vector<1x32xf32>
    %794 = arith.addf %792, %793 : vector<1x32xf32>
    %795 = arith.negf %794 : vector<1x32xf32>
    %796 = math.exp %795 : vector<1x32xf32>
    %cst_200 = arith.constant 1.000000e+00 : f32
    %797 = vector.broadcast %cst_200 : f32 to vector<1x32xf32>
    %798 = arith.addf %797, %796 : vector<1x32xf32>
    %799 = arith.divf %797, %798 : vector<1x32xf32>
    %800 = vector.extract_strided_slice %781 {offsets = [0, 64], sizes = [1, 32], strides = [1, 1]} : vector<1x96xf32> to vector<1x32xf32>
    %801 = vector.extract_strided_slice %783 {offsets = [0, 64], sizes = [1, 32], strides = [1, 1]} : vector<1x96xf32> to vector<1x32xf32>
    %802 = arith.mulf %791, %801 : vector<1x32xf32>
    %803 = arith.addf %800, %802 : vector<1x32xf32>
    %804 = math.tanh %803 : vector<1x32xf32>
    %cst_201 = arith.constant 1.000000e+00 : f32
    %805 = vector.broadcast %cst_201 : f32 to vector<1x32xf32>
    %806 = arith.subf %805, %799 : vector<1x32xf32>
    %807 = arith.mulf %806, %804 : vector<1x32xf32>
    %808 = arith.mulf %799, %726 : vector<1x32xf32>
    %809 = arith.addf %807, %808 : vector<1x32xf32>
    %cst_202 = arith.constant dense<0.000000e+00> : vector<1x8xf32>
    %810 = tpu.matmul %809, %340, %cst_202 {dimension_numbers = #tpu.dot_dimension_numbers<[1], [0], [0], [1], [0, 0, 1, 1], [], []>} : vector<1x32xf32>, vector<32x8xf32>, vector<1x8xf32> -> vector<1x8xf32>
    %cst_203 = arith.constant -1.000000e+30 : f32
    %811 = vector.broadcast %cst_203 : f32 to vector<1x8xf32>
    %812 = arith.select %353, %810, %811 : vector<1x8xi1>, vector<1x8xf32>
    %cst_204 = arith.constant dense<0xFF800000> : vector<1xf32>
    %813 = vector.multi_reduction <maximumf>, %812, %cst_204 [1] : vector<1x8xf32> to vector<1xf32>
    %814 = vector.shape_cast %813 : vector<1xf32> to vector<1x1xf32>
    %815 = vector.broadcast %814 : vector<1x1xf32> to vector<1x8xf32>
    %816 = arith.subf %812, %815 : vector<1x8xf32>
    %817 = math.exp %816 : vector<1x8xf32>
    %cst_205 = arith.constant 0.000000e+00 : f32
    %818 = vector.broadcast %cst_205 : f32 to vector<1x8xf32>
    %819 = arith.select %353, %817, %818 : vector<1x8xi1>, vector<1x8xf32>
    %cst_206 = arith.constant dense<0.000000e+00> : vector<1xf32>
    %820 = vector.multi_reduction <add>, %819, %cst_206 [1] : vector<1x8xf32> to vector<1xf32>
    %821 = vector.shape_cast %820 : vector<1xf32> to vector<1x1xf32>
    %cst_207 = arith.constant 1.000000e-30 : f32
    %822 = vector.broadcast %cst_207 : f32 to vector<1x1xf32>
    %823 = arith.maximumf %821, %822 : vector<1x1xf32>
    %824 = tpu.reciprocal %823 : vector<1x1xf32> -> vector<1x1xf32>
    %825 = vector.broadcast %824 : vector<1x1xf32> to vector<1x8xf32>
    %826 = arith.mulf %819, %825 : vector<1x8xf32>
    %cst_208 = arith.constant dense<0.000000e+00> : vector<1x32xf32>
    %827 = tpu.matmul %826, %334, %cst_208 {dimension_numbers = #tpu.dot_dimension_numbers<[1], [0], [0], [1], [0, 0, 1, 1], [], []>} : vector<1x8xf32>, vector<8x32xf32>, vector<1x32xf32> -> vector<1x32xf32>
    %cst_209 = arith.constant dense<0.000000e+00> : vector<1x32xf32>
    %828 = tpu.matmul %809, %345, %cst_209 {dimension_numbers = #tpu.dot_dimension_numbers<[1], [0], [0], [1], [0, 0, 1, 1], [], []>} : vector<1x32xf32>, vector<32x32xf32>, vector<1x32xf32> -> vector<1x32xf32>
    %cst_210 = arith.constant dense<0.000000e+00> : vector<1x32xf32>
    %829 = tpu.matmul %827, %346, %cst_210 {dimension_numbers = #tpu.dot_dimension_numbers<[1], [0], [0], [1], [0, 0, 1, 1], [], []>} : vector<1x32xf32>, vector<32x32xf32>, vector<1x32xf32> -> vector<1x32xf32>
    %830 = arith.addf %828, %829 : vector<1x32xf32>
    %831 = arith.addf %830, %347 : vector<1x32xf32>
    %832 = math.tanh %831 : vector<1x32xf32>
    %cst_211 = arith.constant dense<0.000000e+00> : vector<1x64xf32>
    %833 = tpu.matmul %832, %348, %cst_211 {dimension_numbers = #tpu.dot_dimension_numbers<[1], [0], [0], [1], [0, 0, 1, 1], [], []>} : vector<1x32xf32>, vector<32x64xf32>, vector<1x64xf32> -> vector<1x64xf32>
    %834 = arith.addf %833, %349 : vector<1x64xf32>
    %cst_212 = arith.constant dense<0xFF800000> : vector<1xf32>
    %835 = vector.multi_reduction <maximumf>, %834, %cst_212 [1] : vector<1x64xf32> to vector<1xf32>
    %836 = vector.shape_cast %835 : vector<1xf32> to vector<1x1xf32>
    %837 = vector.broadcast %836 : vector<1x1xf32> to vector<1x64xf32>
    %838 = arith.cmpf oeq, %834, %837 : vector<1x64xf32>
    %c64_i32_213 = arith.constant 64 : i32
    %839 = vector.broadcast %c64_i32_213 : i32 to vector<1x64xi32>
    %840 = arith.select %838, %354, %839 : vector<1x64xi1>, vector<1x64xi32>
    %cst_214 = arith.constant dense<2147483647> : vector<1xi32>
    %841 = vector.multi_reduction <minsi>, %840, %cst_214 [1] : vector<1x64xi32> to vector<1xi32>
    %842 = vector.shape_cast %841 : vector<1xi32> to vector<1x1xi32>
    %843 = vector.broadcast %836 : vector<1x1xf32> to vector<1x64xf32>
    %844 = arith.subf %834, %843 : vector<1x64xf32>
    %845 = math.exp %844 : vector<1x64xf32>
    %cst_215 = arith.constant dense<0.000000e+00> : vector<1xf32>
    %846 = vector.multi_reduction <add>, %845, %cst_215 [1] : vector<1x64xf32> to vector<1xf32>
    %847 = vector.shape_cast %846 : vector<1xf32> to vector<1x1xf32>
    %848 = tpu.reciprocal %847 {approx = true} : vector<1x1xf32> -> vector<1x1xf32>
    %849 = vector.broadcast %c5_i32_193 : i32 to vector<1x8xi32>
    %850 = arith.cmpi eq, %355, %849 : vector<1x8xi32>
    %851 = vector.shape_cast %842 : vector<1x1xi32> to vector<1x1xi32>
    %852 = vector.broadcast %851 : vector<1x1xi32> to vector<1x8xi32>
    %853 = arith.select %850, %852, %770 : vector<1x8xi1>, vector<1x8xi32>
    %854 = vector.shape_cast %848 : vector<1x1xf32> to vector<1x1xf32>
    %855 = vector.broadcast %854 : vector<1x1xf32> to vector<1x8xf32>
    %856 = arith.select %850, %855, %773 : vector<1x8xi1>, vector<1x8xf32>
    %c6_i32_216 = arith.constant 6 : i32
    %857 = vector.broadcast %842 : vector<1x1xi32> to vector<1x64xi32>
    %858 = arith.cmpi eq, %354, %857 : vector<1x64xi32>
    %859 = arith.extui %858 : vector<1x64xi1> to vector<1x64xi32>
    %860 = arith.sitofp %859 : vector<1x64xi32> to vector<1x64xf32>
    %c0_217 = arith.constant 0 : index
    %c0_218 = arith.constant 0 : index
    %861 = vector.load %arg2[%c0_217, %c0_218] : memref<64x32xf32, #tpu.memory_space<vmem>>, vector<64x32xf32>
    %cst_219 = arith.constant dense<0.000000e+00> : vector<1x32xf32>
    %862 = tpu.matmul %860, %861, %cst_219 {dimension_numbers = #tpu.dot_dimension_numbers<[1], [0], [0], [1], [0, 0, 1, 1], [], []>} : vector<1x64xf32>, vector<64x32xf32>, vector<1x32xf32> -> vector<1x32xf32>
    %cst_220 = arith.constant dense<0.000000e+00> : vector<1x96xf32>
    %863 = tpu.matmul %862, %341, %cst_220 {dimension_numbers = #tpu.dot_dimension_numbers<[1], [0], [0], [1], [0, 0, 1, 1], [], []>} : vector<1x32xf32>, vector<32x96xf32>, vector<1x96xf32> -> vector<1x96xf32>
    %864 = arith.addf %863, %343 : vector<1x96xf32>
    %cst_221 = arith.constant dense<0.000000e+00> : vector<1x96xf32>
    %865 = tpu.matmul %809, %342, %cst_221 {dimension_numbers = #tpu.dot_dimension_numbers<[1], [0], [0], [1], [0, 0, 1, 1], [], []>} : vector<1x32xf32>, vector<32x96xf32>, vector<1x96xf32> -> vector<1x96xf32>
    %866 = arith.addf %865, %344 : vector<1x96xf32>
    %867 = vector.extract_strided_slice %864 {offsets = [0, 0], sizes = [1, 32], strides = [1, 1]} : vector<1x96xf32> to vector<1x32xf32>
    %868 = vector.extract_strided_slice %866 {offsets = [0, 0], sizes = [1, 32], strides = [1, 1]} : vector<1x96xf32> to vector<1x32xf32>
    %869 = arith.addf %867, %868 : vector<1x32xf32>
    %870 = arith.negf %869 : vector<1x32xf32>
    %871 = math.exp %870 : vector<1x32xf32>
    %cst_222 = arith.constant 1.000000e+00 : f32
    %872 = vector.broadcast %cst_222 : f32 to vector<1x32xf32>
    %873 = arith.addf %872, %871 : vector<1x32xf32>
    %874 = arith.divf %872, %873 : vector<1x32xf32>
    %875 = vector.extract_strided_slice %864 {offsets = [0, 32], sizes = [1, 32], strides = [1, 1]} : vector<1x96xf32> to vector<1x32xf32>
    %876 = vector.extract_strided_slice %866 {offsets = [0, 32], sizes = [1, 32], strides = [1, 1]} : vector<1x96xf32> to vector<1x32xf32>
    %877 = arith.addf %875, %876 : vector<1x32xf32>
    %878 = arith.negf %877 : vector<1x32xf32>
    %879 = math.exp %878 : vector<1x32xf32>
    %cst_223 = arith.constant 1.000000e+00 : f32
    %880 = vector.broadcast %cst_223 : f32 to vector<1x32xf32>
    %881 = arith.addf %880, %879 : vector<1x32xf32>
    %882 = arith.divf %880, %881 : vector<1x32xf32>
    %883 = vector.extract_strided_slice %864 {offsets = [0, 64], sizes = [1, 32], strides = [1, 1]} : vector<1x96xf32> to vector<1x32xf32>
    %884 = vector.extract_strided_slice %866 {offsets = [0, 64], sizes = [1, 32], strides = [1, 1]} : vector<1x96xf32> to vector<1x32xf32>
    %885 = arith.mulf %874, %884 : vector<1x32xf32>
    %886 = arith.addf %883, %885 : vector<1x32xf32>
    %887 = math.tanh %886 : vector<1x32xf32>
    %cst_224 = arith.constant 1.000000e+00 : f32
    %888 = vector.broadcast %cst_224 : f32 to vector<1x32xf32>
    %889 = arith.subf %888, %882 : vector<1x32xf32>
    %890 = arith.mulf %889, %887 : vector<1x32xf32>
    %891 = arith.mulf %882, %809 : vector<1x32xf32>
    %892 = arith.addf %890, %891 : vector<1x32xf32>
    %cst_225 = arith.constant dense<0.000000e+00> : vector<1x8xf32>
    %893 = tpu.matmul %892, %340, %cst_225 {dimension_numbers = #tpu.dot_dimension_numbers<[1], [0], [0], [1], [0, 0, 1, 1], [], []>} : vector<1x32xf32>, vector<32x8xf32>, vector<1x8xf32> -> vector<1x8xf32>
    %cst_226 = arith.constant -1.000000e+30 : f32
    %894 = vector.broadcast %cst_226 : f32 to vector<1x8xf32>
    %895 = arith.select %353, %893, %894 : vector<1x8xi1>, vector<1x8xf32>
    %cst_227 = arith.constant dense<0xFF800000> : vector<1xf32>
    %896 = vector.multi_reduction <maximumf>, %895, %cst_227 [1] : vector<1x8xf32> to vector<1xf32>
    %897 = vector.shape_cast %896 : vector<1xf32> to vector<1x1xf32>
    %898 = vector.broadcast %897 : vector<1x1xf32> to vector<1x8xf32>
    %899 = arith.subf %895, %898 : vector<1x8xf32>
    %900 = math.exp %899 : vector<1x8xf32>
    %cst_228 = arith.constant 0.000000e+00 : f32
    %901 = vector.broadcast %cst_228 : f32 to vector<1x8xf32>
    %902 = arith.select %353, %900, %901 : vector<1x8xi1>, vector<1x8xf32>
    %cst_229 = arith.constant dense<0.000000e+00> : vector<1xf32>
    %903 = vector.multi_reduction <add>, %902, %cst_229 [1] : vector<1x8xf32> to vector<1xf32>
    %904 = vector.shape_cast %903 : vector<1xf32> to vector<1x1xf32>
    %cst_230 = arith.constant 1.000000e-30 : f32
    %905 = vector.broadcast %cst_230 : f32 to vector<1x1xf32>
    %906 = arith.maximumf %904, %905 : vector<1x1xf32>
    %907 = tpu.reciprocal %906 : vector<1x1xf32> -> vector<1x1xf32>
    %908 = vector.broadcast %907 : vector<1x1xf32> to vector<1x8xf32>
    %909 = arith.mulf %902, %908 : vector<1x8xf32>
    %cst_231 = arith.constant dense<0.000000e+00> : vector<1x32xf32>
    %910 = tpu.matmul %909, %334, %cst_231 {dimension_numbers = #tpu.dot_dimension_numbers<[1], [0], [0], [1], [0, 0, 1, 1], [], []>} : vector<1x8xf32>, vector<8x32xf32>, vector<1x32xf32> -> vector<1x32xf32>
    %cst_232 = arith.constant dense<0.000000e+00> : vector<1x32xf32>
    %911 = tpu.matmul %892, %345, %cst_232 {dimension_numbers = #tpu.dot_dimension_numbers<[1], [0], [0], [1], [0, 0, 1, 1], [], []>} : vector<1x32xf32>, vector<32x32xf32>, vector<1x32xf32> -> vector<1x32xf32>
    %cst_233 = arith.constant dense<0.000000e+00> : vector<1x32xf32>
    %912 = tpu.matmul %910, %346, %cst_233 {dimension_numbers = #tpu.dot_dimension_numbers<[1], [0], [0], [1], [0, 0, 1, 1], [], []>} : vector<1x32xf32>, vector<32x32xf32>, vector<1x32xf32> -> vector<1x32xf32>
    %913 = arith.addf %911, %912 : vector<1x32xf32>
    %914 = arith.addf %913, %347 : vector<1x32xf32>
    %915 = math.tanh %914 : vector<1x32xf32>
    %cst_234 = arith.constant dense<0.000000e+00> : vector<1x64xf32>
    %916 = tpu.matmul %915, %348, %cst_234 {dimension_numbers = #tpu.dot_dimension_numbers<[1], [0], [0], [1], [0, 0, 1, 1], [], []>} : vector<1x32xf32>, vector<32x64xf32>, vector<1x64xf32> -> vector<1x64xf32>
    %917 = arith.addf %916, %349 : vector<1x64xf32>
    %cst_235 = arith.constant dense<0xFF800000> : vector<1xf32>
    %918 = vector.multi_reduction <maximumf>, %917, %cst_235 [1] : vector<1x64xf32> to vector<1xf32>
    %919 = vector.shape_cast %918 : vector<1xf32> to vector<1x1xf32>
    %920 = vector.broadcast %919 : vector<1x1xf32> to vector<1x64xf32>
    %921 = arith.cmpf oeq, %917, %920 : vector<1x64xf32>
    %c64_i32_236 = arith.constant 64 : i32
    %922 = vector.broadcast %c64_i32_236 : i32 to vector<1x64xi32>
    %923 = arith.select %921, %354, %922 : vector<1x64xi1>, vector<1x64xi32>
    %cst_237 = arith.constant dense<2147483647> : vector<1xi32>
    %924 = vector.multi_reduction <minsi>, %923, %cst_237 [1] : vector<1x64xi32> to vector<1xi32>
    %925 = vector.shape_cast %924 : vector<1xi32> to vector<1x1xi32>
    %926 = vector.broadcast %919 : vector<1x1xf32> to vector<1x64xf32>
    %927 = arith.subf %917, %926 : vector<1x64xf32>
    %928 = math.exp %927 : vector<1x64xf32>
    %cst_238 = arith.constant dense<0.000000e+00> : vector<1xf32>
    %929 = vector.multi_reduction <add>, %928, %cst_238 [1] : vector<1x64xf32> to vector<1xf32>
    %930 = vector.shape_cast %929 : vector<1xf32> to vector<1x1xf32>
    %931 = tpu.reciprocal %930 {approx = true} : vector<1x1xf32> -> vector<1x1xf32>
    %932 = vector.broadcast %c6_i32_216 : i32 to vector<1x8xi32>
    %933 = arith.cmpi eq, %355, %932 : vector<1x8xi32>
    %934 = vector.shape_cast %925 : vector<1x1xi32> to vector<1x1xi32>
    %935 = vector.broadcast %934 : vector<1x1xi32> to vector<1x8xi32>
    %936 = arith.select %933, %935, %853 : vector<1x8xi1>, vector<1x8xi32>
    %937 = vector.shape_cast %931 : vector<1x1xf32> to vector<1x1xf32>
    %938 = vector.broadcast %937 : vector<1x1xf32> to vector<1x8xf32>
    %939 = arith.select %933, %938, %856 : vector<1x8xi1>, vector<1x8xf32>
    %c7_i32_239 = arith.constant 7 : i32
    %940 = vector.broadcast %925 : vector<1x1xi32> to vector<1x64xi32>
    %941 = arith.cmpi eq, %354, %940 : vector<1x64xi32>
    %942 = arith.extui %941 : vector<1x64xi1> to vector<1x64xi32>
    %943 = arith.sitofp %942 : vector<1x64xi32> to vector<1x64xf32>
    %c0_240 = arith.constant 0 : index
    %c0_241 = arith.constant 0 : index
    %944 = vector.load %arg2[%c0_240, %c0_241] : memref<64x32xf32, #tpu.memory_space<vmem>>, vector<64x32xf32>
    %cst_242 = arith.constant dense<0.000000e+00> : vector<1x32xf32>
    %945 = tpu.matmul %943, %944, %cst_242 {dimension_numbers = #tpu.dot_dimension_numbers<[1], [0], [0], [1], [0, 0, 1, 1], [], []>} : vector<1x64xf32>, vector<64x32xf32>, vector<1x32xf32> -> vector<1x32xf32>
    %cst_243 = arith.constant dense<0.000000e+00> : vector<1x96xf32>
    %946 = tpu.matmul %945, %341, %cst_243 {dimension_numbers = #tpu.dot_dimension_numbers<[1], [0], [0], [1], [0, 0, 1, 1], [], []>} : vector<1x32xf32>, vector<32x96xf32>, vector<1x96xf32> -> vector<1x96xf32>
    %947 = arith.addf %946, %343 : vector<1x96xf32>
    %cst_244 = arith.constant dense<0.000000e+00> : vector<1x96xf32>
    %948 = tpu.matmul %892, %342, %cst_244 {dimension_numbers = #tpu.dot_dimension_numbers<[1], [0], [0], [1], [0, 0, 1, 1], [], []>} : vector<1x32xf32>, vector<32x96xf32>, vector<1x96xf32> -> vector<1x96xf32>
    %949 = arith.addf %948, %344 : vector<1x96xf32>
    %950 = vector.extract_strided_slice %947 {offsets = [0, 0], sizes = [1, 32], strides = [1, 1]} : vector<1x96xf32> to vector<1x32xf32>
    %951 = vector.extract_strided_slice %949 {offsets = [0, 0], sizes = [1, 32], strides = [1, 1]} : vector<1x96xf32> to vector<1x32xf32>
    %952 = arith.addf %950, %951 : vector<1x32xf32>
    %953 = arith.negf %952 : vector<1x32xf32>
    %954 = math.exp %953 : vector<1x32xf32>
    %cst_245 = arith.constant 1.000000e+00 : f32
    %955 = vector.broadcast %cst_245 : f32 to vector<1x32xf32>
    %956 = arith.addf %955, %954 : vector<1x32xf32>
    %957 = arith.divf %955, %956 : vector<1x32xf32>
    %958 = vector.extract_strided_slice %947 {offsets = [0, 32], sizes = [1, 32], strides = [1, 1]} : vector<1x96xf32> to vector<1x32xf32>
    %959 = vector.extract_strided_slice %949 {offsets = [0, 32], sizes = [1, 32], strides = [1, 1]} : vector<1x96xf32> to vector<1x32xf32>
    %960 = arith.addf %958, %959 : vector<1x32xf32>
    %961 = arith.negf %960 : vector<1x32xf32>
    %962 = math.exp %961 : vector<1x32xf32>
    %cst_246 = arith.constant 1.000000e+00 : f32
    %963 = vector.broadcast %cst_246 : f32 to vector<1x32xf32>
    %964 = arith.addf %963, %962 : vector<1x32xf32>
    %965 = arith.divf %963, %964 : vector<1x32xf32>
    %966 = vector.extract_strided_slice %947 {offsets = [0, 64], sizes = [1, 32], strides = [1, 1]} : vector<1x96xf32> to vector<1x32xf32>
    %967 = vector.extract_strided_slice %949 {offsets = [0, 64], sizes = [1, 32], strides = [1, 1]} : vector<1x96xf32> to vector<1x32xf32>
    %968 = arith.mulf %957, %967 : vector<1x32xf32>
    %969 = arith.addf %966, %968 : vector<1x32xf32>
    %970 = math.tanh %969 : vector<1x32xf32>
    %cst_247 = arith.constant 1.000000e+00 : f32
    %971 = vector.broadcast %cst_247 : f32 to vector<1x32xf32>
    %972 = arith.subf %971, %965 : vector<1x32xf32>
    %973 = arith.mulf %972, %970 : vector<1x32xf32>
    %974 = arith.mulf %965, %892 : vector<1x32xf32>
    %975 = arith.addf %973, %974 : vector<1x32xf32>
    %cst_248 = arith.constant dense<0.000000e+00> : vector<1x8xf32>
    %976 = tpu.matmul %975, %340, %cst_248 {dimension_numbers = #tpu.dot_dimension_numbers<[1], [0], [0], [1], [0, 0, 1, 1], [], []>} : vector<1x32xf32>, vector<32x8xf32>, vector<1x8xf32> -> vector<1x8xf32>
    %cst_249 = arith.constant -1.000000e+30 : f32
    %977 = vector.broadcast %cst_249 : f32 to vector<1x8xf32>
    %978 = arith.select %353, %976, %977 : vector<1x8xi1>, vector<1x8xf32>
    %cst_250 = arith.constant dense<0xFF800000> : vector<1xf32>
    %979 = vector.multi_reduction <maximumf>, %978, %cst_250 [1] : vector<1x8xf32> to vector<1xf32>
    %980 = vector.shape_cast %979 : vector<1xf32> to vector<1x1xf32>
    %981 = vector.broadcast %980 : vector<1x1xf32> to vector<1x8xf32>
    %982 = arith.subf %978, %981 : vector<1x8xf32>
    %983 = math.exp %982 : vector<1x8xf32>
    %cst_251 = arith.constant 0.000000e+00 : f32
    %984 = vector.broadcast %cst_251 : f32 to vector<1x8xf32>
    %985 = arith.select %353, %983, %984 : vector<1x8xi1>, vector<1x8xf32>
    %cst_252 = arith.constant dense<0.000000e+00> : vector<1xf32>
    %986 = vector.multi_reduction <add>, %985, %cst_252 [1] : vector<1x8xf32> to vector<1xf32>
    %987 = vector.shape_cast %986 : vector<1xf32> to vector<1x1xf32>
    %cst_253 = arith.constant 1.000000e-30 : f32
    %988 = vector.broadcast %cst_253 : f32 to vector<1x1xf32>
    %989 = arith.maximumf %987, %988 : vector<1x1xf32>
    %990 = tpu.reciprocal %989 : vector<1x1xf32> -> vector<1x1xf32>
    %991 = vector.broadcast %990 : vector<1x1xf32> to vector<1x8xf32>
    %992 = arith.mulf %985, %991 : vector<1x8xf32>
    %cst_254 = arith.constant dense<0.000000e+00> : vector<1x32xf32>
    %993 = tpu.matmul %992, %334, %cst_254 {dimension_numbers = #tpu.dot_dimension_numbers<[1], [0], [0], [1], [0, 0, 1, 1], [], []>} : vector<1x8xf32>, vector<8x32xf32>, vector<1x32xf32> -> vector<1x32xf32>
    %cst_255 = arith.constant dense<0.000000e+00> : vector<1x32xf32>
    %994 = tpu.matmul %975, %345, %cst_255 {dimension_numbers = #tpu.dot_dimension_numbers<[1], [0], [0], [1], [0, 0, 1, 1], [], []>} : vector<1x32xf32>, vector<32x32xf32>, vector<1x32xf32> -> vector<1x32xf32>
    %cst_256 = arith.constant dense<0.000000e+00> : vector<1x32xf32>
    %995 = tpu.matmul %993, %346, %cst_256 {dimension_numbers = #tpu.dot_dimension_numbers<[1], [0], [0], [1], [0, 0, 1, 1], [], []>} : vector<1x32xf32>, vector<32x32xf32>, vector<1x32xf32> -> vector<1x32xf32>
    %996 = arith.addf %994, %995 : vector<1x32xf32>
    %997 = arith.addf %996, %347 : vector<1x32xf32>
    %998 = math.tanh %997 : vector<1x32xf32>
    %cst_257 = arith.constant dense<0.000000e+00> : vector<1x64xf32>
    %999 = tpu.matmul %998, %348, %cst_257 {dimension_numbers = #tpu.dot_dimension_numbers<[1], [0], [0], [1], [0, 0, 1, 1], [], []>} : vector<1x32xf32>, vector<32x64xf32>, vector<1x64xf32> -> vector<1x64xf32>
    %1000 = arith.addf %999, %349 : vector<1x64xf32>
    %cst_258 = arith.constant dense<0xFF800000> : vector<1xf32>
    %1001 = vector.multi_reduction <maximumf>, %1000, %cst_258 [1] : vector<1x64xf32> to vector<1xf32>
    %1002 = vector.shape_cast %1001 : vector<1xf32> to vector<1x1xf32>
    %1003 = vector.broadcast %1002 : vector<1x1xf32> to vector<1x64xf32>
    %1004 = arith.cmpf oeq, %1000, %1003 : vector<1x64xf32>
    %c64_i32_259 = arith.constant 64 : i32
    %1005 = vector.broadcast %c64_i32_259 : i32 to vector<1x64xi32>
    %1006 = arith.select %1004, %354, %1005 : vector<1x64xi1>, vector<1x64xi32>
    %cst_260 = arith.constant dense<2147483647> : vector<1xi32>
    %1007 = vector.multi_reduction <minsi>, %1006, %cst_260 [1] : vector<1x64xi32> to vector<1xi32>
    %1008 = vector.shape_cast %1007 : vector<1xi32> to vector<1x1xi32>
    %1009 = vector.broadcast %1002 : vector<1x1xf32> to vector<1x64xf32>
    %1010 = arith.subf %1000, %1009 : vector<1x64xf32>
    %1011 = math.exp %1010 : vector<1x64xf32>
    %cst_261 = arith.constant dense<0.000000e+00> : vector<1xf32>
    %1012 = vector.multi_reduction <add>, %1011, %cst_261 [1] : vector<1x64xf32> to vector<1xf32>
    %1013 = vector.shape_cast %1012 : vector<1xf32> to vector<1x1xf32>
    %1014 = tpu.reciprocal %1013 {approx = true} : vector<1x1xf32> -> vector<1x1xf32>
    %1015 = vector.broadcast %c7_i32_239 : i32 to vector<1x8xi32>
    %1016 = arith.cmpi eq, %355, %1015 : vector<1x8xi32>
    %1017 = vector.shape_cast %1008 : vector<1x1xi32> to vector<1x1xi32>
    %1018 = vector.broadcast %1017 : vector<1x1xi32> to vector<1x8xi32>
    %1019 = arith.select %1016, %1018, %936 : vector<1x8xi1>, vector<1x8xi32>
    %1020 = vector.shape_cast %1014 : vector<1x1xf32> to vector<1x1xf32>
    %1021 = vector.broadcast %1020 : vector<1x1xf32> to vector<1x8xf32>
    %1022 = arith.select %1016, %1021, %939 : vector<1x8xi1>, vector<1x8xf32>
    %c8_i32_262 = arith.constant 8 : i32
    %c0_263 = arith.constant 0 : index
    %c0_264 = arith.constant 0 : index
    %1023 = vector.load %arg16[%c0_263, %c0_264] : memref<1x8xi32, #tpu.memory_space<vmem>>, vector<1x8xi32>
    tpu.vector_store %arg16[%c0_263, %c0_264], %1019 {strides = array<i32>} : memref<1x8xi32, #tpu.memory_space<vmem>>, vector<1x8xi32>,
    %c0_265 = arith.constant 0 : index
    %c0_266 = arith.constant 0 : index
    %1024 = vector.load %arg17[%c0_265, %c0_266] : memref<1x8xf32, #tpu.memory_space<vmem>>, vector<1x8xf32>
    tpu.vector_store %arg17[%c0_265, %c0_266], %1022 {strides = array<i32>} : memref<1x8xf32, #tpu.memory_space<vmem>>, vector<1x8xf32>,
    return
  }
}

</mosaic_0001>

<bundles_post_ra>
// kernel: tpu_custom_call.1
= control target key start
LH: loop header
LB: loop body
LE: loop exit
PB: predicated region body
PF: predicated region fallthrough
CT: control target
= control target key end

     0   :  { %s10782_s0 = inlined_call_operand.vmem [shape: s32[8], index: 0, kind: input, shape index: {}]   ;;  %s10783_s1 = inlined_call_operand.<no memory space> [shape: s32[1], index: 1, kind: input, shape index: {}]   ;;  %s10784_s2 = inlined_call_operand.vmem [shape: f32[64,32], index: 2, kind: input, shape index: {}]   ;;  %s10785_s3 = inlined_call_operand.vmem [shape: f32[32,96], index: 3, kind: input, shape index: {}]   ;;  %s10786_s4 = inlined_call_operand.vmem [shape: f32[32,96], index: 4, kind: input, shape index: {}]   ;;  %s10787_s5 = inlined_call_operand.vmem [shape: f32[1,96], index: 5, kind: input, shape index: {}]   ;;  %s10788_s6 = inlined_call_operand.hbm [shape: f32[1,96], index: 6, kind: input, shape index: {}]   ;;  %s10789_s7 = inlined_call_operand.vmem [shape: f32[32,96], index: 7, kind: input, shape index: {}]   ;;  %s10790_s8 = inlined_call_operand.hbm [shape: f32[32,96], index: 8, kind: input, shape index: {}]   ;;  %s10791_s9 = inlined_call_operand.hbm [shape: f32[1,96], index: 9, kind: input, shape index: {}]   ;;  %s10792_s10 = inlined_call_operand.vmem [shape: f32[1,96], index: 10, kind: input, shape index: {}]   ;;  %s10793_s11 = inlined_call_operand.vmem [shape: f32[32,32], index: 11, kind: input, shape index: {}]   ;;  %s10794_s12 = inlined_call_operand.hbm [shape: f32[32,32], index: 12, kind: input, shape index: {}]   ;;  %s10795_s13 = inlined_call_operand.vmem [shape: f32[1,32], index: 13, kind: input, shape index: {}]   ;;  %s10796_s14 = inlined_call_operand.hbm [shape: f32[32,64], index: 14, kind: input, shape index: {}]   ;;  %s10797_s15 = inlined_call_operand.vmem [shape: f32[1,64], index: 15, kind: input, shape index: {}]   ;;  %s10798_s16 = inlined_call_operand.hbm [shape: s32[1,8], index: 16, kind: output, shape index: {0}]   ;;  %s10799_s17 = inlined_call_operand.hbm [shape: f32[1,8], index: 17, kind: output, shape index: {1}]  }
   0x1   :  { %10803 = sst [smem:[#allocation23_spill]] %s10782_s0 }
   0x2   :  { %10804 = sst [smem:[#allocation24_spill]] %s10783_s1 }
   0x3   :  { %10805 = sst [smem:[#allocation25_spill]] %s10797_s15 }
   0x4   :  { %10806 = sst [smem:[#allocation26_spill]] %s10798_s16 }
   0x5   :  { %10807 = sst [smem:[#allocation27_spill]] %s10799_s17 }
   0x6   :  { %24 = vsyncpa [#allocation6], 0 }
   0x7   :  { %25 = vsyncpa [#allocation4], 0 }
   0x8   :  { %26 = vsyncpa [#allocation9], 0 }
   0x9   :  { %27 = vsyncpa [#allocation12], 0 }
   0xa   :  { %28 = vsyncpa [#allocation5], 0 }
   0xb   :  { %29 = vsyncpa [#allocation16], 0  ;;  %s9360_s24 = smov [#allocation8]   ;;  %s9182_s28 = scalar_lea.hbm %s10790_s8, 512 }
   0xc   :  { %s67_s25 = sshll.u32 %s9360_s24, 4  ;;  %p9183_p0 = scmp.ne.s32.totalorder %s10790_s8, %s9182_s28  ;;  %s68_s25 = int_to_ptr.vmem [resolvable:$true] %s67_s25 }
   0xd   :  { %p9186_p1 = scmp.lt.u32.totalorder %s9182_s28, %s10790_s8 }
   0xf   :  { %p9188_p2 = pnand %p9186_p1, %p9183_p0 }
  0x11   :  { %9191 = shalt.err (!%p9188_p2)
}
  0x12   :  { %s9192_s19 = scalar_lea.vmem %s68_s25, 512  ;;  %p9197_p4 = scmp.lt.s32.totalorder %s68_s25, %s68_s25 }
  0x13   :  { %p9193_p3 = scmp.ne.s32.totalorder %s68_s25, %s9192_s19  ;;  %p9198_p5 = scmp.lt.s32.totalorder %s9192_s19, %s9192_s19 }
  0x15   :  { %p9199_p6 = por %p9198_p5, %p9197_p4 }
  0x17   :  { %p9200_p7 = pnand %p9199_p6, %p9193_p3 }
  0x19   :  { %9203 = shalt.err (!%p9200_p7)
}
  0x1a   :  { %s9361_s1 = smov 128   ;;  %s9362_s20 = smov 8  }
  0x1b   :  { %73 = dma.hbm_to_vmem [thread:$0]  %s10790_s8, 512, %s68_s25, [#allocation9], %s9361_s1, %s9361_s1, %s9362_s20  }
  0x1c   :  { %s9363_s23 = smov [#allocation11]   ;;  %s10808_s28 = sld [smem:[#allocation23_spill]] }
  0x1d   :  { %s93_s24 = sshll.u32 %s9363_s23, 4  ;;  %s9204_s18 = scalar_lea.hbm %s10794_s12, 512  ;;  %s94_s24 = int_to_ptr.vmem [resolvable:$true] %s93_s24 }
  0x1e   :  { %p9205_p8 = scmp.ne.s32.totalorder %s10794_s12, %s9204_s18  ;;  %p9208_p9 = scmp.lt.u32.totalorder %s9204_s18, %s10794_s12 }
  0x20   :  { %p9210_p10 = pnand %p9208_p9, %p9205_p8 }
  0x22   :  { %s36_s29 = sshll.u32 %s10808_s28, 4  ;;  %s37_s29 = int_to_ptr.vmem [resolvable:$true] %s36_s29 }
  0x23   :  { %9213 = shalt.err (!%p9210_p10)
}
  0x24   :  { %s9214_s8 = scalar_lea.vmem %s94_s24, 512  ;;  %p9219_p12 = scmp.lt.s32.totalorder %s94_s24, %s94_s24 }
  0x25   :  { %p9215_p11 = scmp.ne.s32.totalorder %s94_s24, %s9214_s8  ;;  %p9220_p13 = scmp.lt.s32.totalorder %s9214_s8, %s9214_s8 }
  0x27   :  { %p9221_p0 = por %p9220_p13, %p9219_p12 }
  0x29   :  { %p9222_p1 = pnand %p9221_p0, %p9215_p11 }
  0x2b   :  { %9225 = shalt.err (!%p9222_p1)
}
  0x2c   :  { %99 = dma.hbm_to_vmem [thread:$0]  %s10794_s12, 512, %s94_s24, [#allocation12], %s9361_s1, %s9361_s1, %s9362_s20  }
  0x2d   :  { %s9226_s16 = scalar_lea.vmem %s37_s29, 16  ;;  %p9231_p3 = scmp.lt.s32.totalorder %s37_s29, %s37_s29 }
  0x2e   :  { %p9227_p2 = scmp.ne.s32.totalorder %s37_s29, %s9226_s16  ;;  %p9232_p4 = scmp.lt.s32.totalorder %s9226_s16, %s9226_s16 }
  0x30   :  { %p9233_p5 = por %p9232_p4, %p9231_p3 }
  0x32   :  { %p9234_p6 = pnand %p9233_p5, %p9227_p2 }
  0x34   :  { %9237 = shalt.err (!%p9234_p6)
}
  0x35   :  { %s9364_s15 = smov [#allocation3]   ;;  %s9365_s17 = smov [#allocation7]  }
  0x36   :  { %39 = dma.vmem_to_smem %s37_s29, 16, %s9364_s15, [#allocation6]  }
  0x37   :  { %s56_s22 = sshll.u32 %s9365_s17, 4  ;;  %s9366_s23 = smov [#allocation10]   ;;  %s57_s22 = int_to_ptr.vmem [resolvable:$true] %s56_s22 }
  0x38   :  { %s80_s26 = sshll.u32 %s9366_s23, 4  ;;  %s9238_s0 = scalar_lea.hbm %s10788_s6, 16  ;;  %s81_s26 = int_to_ptr.vmem [resolvable:$true] %s80_s26 }
  0x39   :  { %p9239_p7 = scmp.ne.s32.totalorder %s10788_s6, %s9238_s0  ;;  %p9242_p8 = scmp.lt.u32.totalorder %s9238_s0, %s10788_s6 }
  0x3b   :  { %p9244_p9 = pnand %p9242_p8, %p9239_p7 }
  0x3d   :  { %9247 = shalt.err (!%p9244_p9)
}
  0x3e   :  { %s9248_s29 = scalar_lea.vmem %s57_s22, 16  ;;  %s9252_s19 = scalar_lea.vmem %s57_s22, 32 }
  0x3f   :  { %p9249_p10 = scmp.ne.s32.totalorder %s57_s22, %s9248_s29  ;;  %p9253_p11 = scmp.lt.s32.totalorder %s57_s22, %s57_s22 }
  0x40   :  { %p9254_p12 = scmp.lt.s32.totalorder %s9252_s19, %s9248_s29 }
  0x42   :  { %p9255_p13 = por %p9254_p12, %p9253_p11 }
  0x44   :  { %p9256_p0 = pnand %p9255_p13, %p9249_p10 }
  0x46   :  { %9259 = shalt.err (!%p9256_p0)
}
  0x47   :  { %59 = dma.hbm_to_vmem [thread:$0]  %s10788_s6, 16, %s57_s22, [#allocation4]  }
  0x48   :  { %s9260_s15 = scalar_lea.hbm %s10791_s9, 16 }
  0x49   :  { %p9261_p1 = scmp.ne.s32.totalorder %s10791_s9, %s9260_s15  ;;  %p9264_p2 = scmp.lt.u32.totalorder %s9260_s15, %s10791_s9 }
  0x4b   :  { %p9266_p3 = pnand %p9264_p2, %p9261_p1 }
  0x4d   :  { %9269 = shalt.err (!%p9266_p3)
}
  0x4e   :  { %s9270_s0 = scalar_lea.vmem %s81_s26, 16  ;;  %s9274_s30 = scalar_lea.vmem %s81_s26, 32 }
  0x4f   :  { %p9271_p4 = scmp.ne.s32.totalorder %s81_s26, %s9270_s0  ;;  %p9275_p5 = scmp.lt.s32.totalorder %s81_s26, %s81_s26 }
  0x50   :  { %p9276_p6 = scmp.lt.s32.totalorder %s9274_s30, %s9270_s0 }
  0x52   :  { %p9277_p7 = por %p9276_p6, %p9275_p5 }
  0x54   :  { %p9278_p8 = pnand %p9277_p7, %p9271_p4 }
  0x56   :  { %9281 = shalt.err (!%p9278_p8)
}
  0x57   :  { %83 = dma.hbm_to_vmem [thread:$0]  %s10791_s9, 16, %s81_s26, [#allocation9]  }
  0x58   :  { %s9367_s12 = smov [#allocation13]   ;;  %s9282_s19 = scalar_lea.hbm %s10796_s14, 512 }
  0x59   :  { %s107_s24 = sshll.u32 %s9367_s12, 4  ;;  %p9283_p9 = scmp.ne.s32.totalorder %s10796_s14, %s9282_s19  ;;  %s108_s24 = int_to_ptr.vmem [resolvable:$true] %s107_s24 }
  0x5a   :  { %p9286_p10 = scmp.lt.u32.totalorder %s9282_s19, %s10796_s14 }
  0x5c   :  { %p9288_p11 = pnand %p9286_p10, %p9283_p9 }
  0x5e   :  { %9291 = shalt.err (!%p9288_p11)
}
  0x5f   :  { %s9292_s15 = scalar_lea.vmem %s108_s24, 512  ;;  %p9297_p13 = scmp.lt.s32.totalorder %s108_s24, %s108_s24 }
  0x60   :  { %p9293_p12 = scmp.ne.s32.totalorder %s108_s24, %s9292_s15  ;;  %p9298_p0 = scmp.lt.s32.totalorder %s9292_s15, %s9292_s15 }
  0x62   :  { %p9299_p1 = por %p9298_p0, %p9297_p13 }
  0x64   :  { %p9300_p2 = pnand %p9299_p1, %p9293_p12 }
  0x66   :  { %9303 = shalt.err (!%p9300_p2)
}
  0x67   :  { %113 = dma.hbm_to_vmem [thread:$0]  %s10796_s14, 512, %s108_s24, [#allocation12], %s9361_s1, %s9361_s1, %s9362_s20  }
  0x68   :  { %9348 = dma.done.wait [#allocation6], 16  }
  0x69   :  { %9349 = vsyncadd [#allocation6], 4294967280 }
  0x6a   :  { %9350 = dma.done.wait [#allocation4], 16  }
  0x6b   :  { %9351 = vsyncadd [#allocation4], 4294967280 }
  0x6c   :  { %9352 = dma.done.wait [#allocation9], 528  }
  0x6d   :  { %9353 = vsyncadd [#allocation9], 4294966768 }
  0x6e   :  { %9354 = dma.done.wait [#allocation12], 1024  }
  0x6f   :  { %9355 = vsyncadd [#allocation12], 4294966272 }
  0x70   :  { %134 = sfence }
  0x71   :  { %v135_v0 = vld [vmem:[%s10785_s3] sm:$0xff]  ;;  %v136_v1 = vld [vmem:[%s10785_s3 + $0x8] sm:$0xff]  ;;  %v9368_v3 = vmov 0.0|0.0   ;;  %v137_v6 = vld [vmem:[%s10785_s3 + $0x10] sm:$0xff]  ;;  %s147_s24 = sld [smem:[#allocation3]]  ;;  %vm9369_vm0 = vmmov 0  }
  0x72   :  { %v139_v2 = vld [vmem:[%s10786_s4] sm:$0xff]  ;;  %8507 = vmatprep.subr.bf16.mxu0 %v9368_v3  ;;  %8513 = vmatprep.subr.bf16.mxu1 %v9368_v3  ;;  %v9548_v4 = vpack.c.bf16 %v136_v1, %v135_v0  ;;  %v140_v5 = vld [vmem:[%s10786_s4 + $0x8] sm:$0xff]  ;;  %v138_v7 = vld [vmem:[%s10785_s3 + $0x18] sm:$0xff]  ;;  %v9370_v11 = vmov 0.0   ;;  %vm150_vm1 = vcmask 261120   ;;  %s9371_s21 = smov 64  }
  0x73   :  { %v9559_v8 = vpack.c.bf16 %v140_v5, %v139_v2  ;;  %v141_v9 = vld [vmem:[%s10786_s4 + $0x10] sm:$0xff]  ;;  %v142_v10 = vld [vmem:[%s10786_s4 + $0x18] sm:$0xff]  ;;  %7611 = vmatprep.mubr.msk.f32.mxu0 %vm9369_vm0, %v9370_v11  ;;  %7622 = vmatprep.mubr.msk.f32.mxu1 %vm9369_vm0, %v9370_v11  ;;  %v9572_v12 = vpack.c.bf16 %v138_v7, %v137_v6  ;;  %v9600_v15 = vld [vmem:[#allocation7] sm:$0x1]  ;;  %s9372_s9 = smov 96   ;;  %s7077_s27 = sld [smem:[#allocation3 + $0x2]] }
  0x74   :  { %8509 = vmatpush3.bf16.msra.mxu0 %v9548_v4  ;;  %v9576_v13 = vpack.c.bf16 %v142_v10, %v141_v9  ;;  %v9607_v21 = vld [vmem:[%s10787_s5] sm:$0x1]  ;;  %s7073_s5 = sld [smem:[#allocation3 + $0x1]]  ;;  %s7081_s14 = sld [smem:[#allocation3 + $0x3]]  ;;  %vm1783_vm3 = vcmask 523264  }
  0x75   :  { %8515 = vmatpush3.bf16.msra.mxu1 %v9559_v8  ;;  %8510 = vmatprep.subr.bf16.mxu0 %v9368_v3  ;;  %s7085_s22 = sld [smem:[#allocation3 + $0x4]]  ;;  %s7089_s29 = sld [smem:[#allocation3 + $0x5]] }
  0x76   :  { %8516 = vmatprep.subr.bf16.mxu1 %v9368_v3  ;;  %s7093_s4 = sld [smem:[#allocation3 + $0x6]]  ;;  %s10809_s12 = sld [smem:[#allocation24_spill]] }
  0x77   :  { %s148_s25 = scalar_lea.vmem %s10784_s2, %s147_s24  ;;  %s10812_s8 = sld [smem:[#allocation25_spill]] }
  0x78   :  { %8512 = vmatpush3.bf16.msra.mxu0 %v9572_v12  ;;  %v149_v14 = vld [vmem:[%s148_s25] sm:$0x1] }
  0x79   :  { %8518 = vmatpush3.bf16.msra.mxu1 %v9576_v13  ;;  %8519 = vmatprep.subr.bf16.mxu0 %v9368_v3  ;;  %s517_s30 = scalar_lea.vmem %s10784_s2, %s7077_s27 }
  0x7a   :  { %8525 = vmatprep.subr.bf16.mxu1 %v9368_v3  ;;  %s332_s23 = scalar_lea.vmem %s10784_s2, %s7073_s5  ;;  %v518_v56 = vld [vmem:[%s517_s30] sm:$0x1]  ;;  %s702_s6 = scalar_lea.vmem %s10784_s2, %s7081_s14 }
  0x7b   :  { %7612 = vmatmul.mubr.msk.f32.vlgmr.msra.gmra.mrb[0].mxu0 %vm150_vm1, %v149_v14  ;;  %v333_v33 = vld [vmem:[%s332_s23] sm:$0x1]  ;;  %s887_s18 = scalar_lea.vmem %s10784_s2, %s7085_s22  ;;  %s1072_s3 = scalar_lea.vmem %s10784_s2, %s7089_s29 }
  0x7c   :  { %7623 = vmatmul.mubr.f32.vlgmr.msra.gmra.mrb[0].mxu1 %v9370_v11  ;;  %8521 = vmatpush3.bf16.msra.mxu0 %v9548_v4  ;;  %s1257_s15 = scalar_lea.vmem %s10784_s2, %s7093_s4  ;;  %s7097_s5 = sld [smem:[#allocation3 + $0x7]] }
  0x7d   :  { %8527 = vmatpush3.bf16.msra.mxu1 %v9559_v8  ;;  %8522 = vmatprep.subr.bf16.mxu0 %v9368_v3 }
  0x7e   :  { %8528 = vmatprep.subr.bf16.mxu1 %v9368_v3  ;;  %7633 = vmatprep.mubr.msk.f32.mxu0 %vm9369_vm0, %v9370_v11 }
  0x7f   :  { %7644 = vmatprep.mubr.msk.f32.mxu1 %vm9369_vm0, %v9370_v11 }
  0x80   :  { %8524 = vmatpush3.bf16.msra.mxu0 %v9572_v12 }
  0x81   :  { %8530 = vmatpush3.bf16.msra.mxu1 %v9576_v13  ;;  %8531 = vmatprep.subr.bf16.mxu0 %v9368_v3 }
  0x82   :  { %8537 = vmatprep.subr.bf16.mxu1 %v9368_v3  ;;  %s1442_s23 = scalar_lea.vmem %s10784_s2, %s7097_s5 }
  0x83   :  { %7634 = vmatmul.mubr.msk.f32.vlgmr.msra.gmra.mrb[2].mxu0 %vm150_vm1, %v333_v33 }
  0x84   :  { %8533 = vmatpush3.bf16.msra.mxu0 %v9548_v4  ;;  %7655 = vmatprep.mubr.msk.f32.mxu0 %vm9369_vm0, %v9370_v11 }
  0x85   :  { %8534 = vmatprep.subr.bf16.mxu0 %v9368_v3 }
  0x88   :  { %8536 = vmatpush3.bf16.msra.mxu0 %v9572_v12 }
  0x89   :  { %8543 = vmatprep.subr.bf16.mxu0 %v9368_v3 }
  0x8b   :  { %7656 = vmatmul.mubr.msk.f32.vlgmr.msra.gmra.mrb[4].mxu0 %vm150_vm1, %v518_v56 }
  0x8c   :  { %8545 = vmatpush3.bf16.msra.mxu0 %v9548_v4  ;;  %7677 = vmatprep.mubr.msk.f32.mxu0 %vm9369_vm0, %v9370_v11 }
  0x8d   :  { %8546 = vmatprep.subr.bf16.mxu0 %v9368_v3 }
  0x90   :  { %8548 = vmatpush3.bf16.msra.mxu0 %v9572_v12 }
  0x91   :  { %8555 = vmatprep.subr.bf16.mxu0 %v9368_v3 }
 0x14e   :  { %v220_v16 = vpop.f32.mrb[0].mxu0 }
 0x14f   :  { %v293_v17 = vpop.f32.mrb[0].mxu1  ;;  %v7613_v18 = vpop.f32.mrb[1].mxu0  ;;  %v221_v22 = vadd.f32 %v220_v16, %v9607_v21 }
 0x150   :  { %v294_v19 = vadd.f32 %v293_v17, %v9600_v15  ;;  %v7624_v20 = vpop.f32.mrb[1].mxu1 }
 0x152   :  { %305 = vrot.lane.b32.xlu0 %v294_v19, %s9371_s21  ;;  %v297_v23 = vadd.f32 %v294_v19, %v221_v22 }
 0x154   :  { %v7072_v24 = vmul.f32 -1.442695, %v297_v23  ;;  %v703_v23 = vld [vmem:[%s702_s6] sm:$0x1] }
 0x155   :  { %7678 = vmatmul.mubr.msk.f32.vlgmr.msra.gmra.mrb[6].mxu0 %vm150_vm1, %v703_v23 }
 0x156   :  { %9002 = vpow2.f32 %v7072_v24  ;;  %v403_v40 = vpop.f32.mrb[2].mxu0  ;;  %8557 = vmatpush3.bf16.msra.mxu0 %v9548_v4  ;;  %7699 = vmatprep.mubr.msk.f32.mxu0 %vm9369_vm0, %v9370_v11 }
 0x157   :  { %v7635_v41 = vpop.f32.mrb[3].mxu0  ;;  %v404_v45 = vadd.f32 %v403_v40, %v9607_v21  ;;  %8558 = vmatprep.subr.bf16.mxu0 %v9368_v3 }
 0x15a   :  { %8560 = vmatpush3.bf16.msra.mxu0 %v9572_v12 }
 0x15b   :  { %8567 = vmatprep.subr.bf16.mxu0 %v9368_v3 }
 0x15e   :  { %v588_v63 = vpop.f32.mrb[4].mxu0 }
 0x15f   :  { %v7657_v0 = vpop.f32.mrb[5].mxu0  ;;  %v589_v6 = vadd.f32 %v588_v63, %v9607_v21 }
 0x160   :  { %v9003_v25 = vpop.eup %9002 }
 0x161   :  { %v301_v26 = vadd.f32 1.0, %v9003_v25 }
 0x163   :  { %9004 = vrcp.f32 %v301_v26 }
 0x16d   :  { %v9005_v27 = vpop.eup %9004 }
 0x16e   :  { %v315_v34 = vsub.f32 1.0, %v9005_v27  ;;  %v321_v36 = vmul.f32 0.0, %v9005_v27 }
 0x1c4   :  { %v306_v28 = vpop.permute.xlu0 %305 }
 0x1c5   :  { %v308_v29 = vmul.f32 %v9005_v27, %v306_v28 }
 0x1c7   :  { %310 = vrot.lane.b32.xlu0 %v308_v29, %s9371_s21 }
 0x239   :  { %v311_v30 = vpop.permute.xlu0 %310 }
 0x23a   :  { %v313_v31 = vadd.f32 %v311_v30, %v221_v22  ;;  %v773_v30 = vpop.f32.mrb[6].mxu0 }
 0x23c   :  { %9006 = vtanh.f32 %v313_v31  ;;  %v7679_v31 = vpop.f32.mrb[7].mxu0 }
 0x246   :  { %v9007_v32 = vpop.eup %9006 }
 0x247   :  { %317 = vrot.lane.b32.xlu1 %v9007_v32, %s9372_s9 }
 0x2b9   :  { %v318_v35 = vpop.permute.xlu1 %317 }
 0x2ba   :  { %v320_v37 = vmul.f32 %v318_v35, %v315_v34  ;;  %v774_v35 = vadd.f32 %v773_v30, %v9607_v21 }
 0x2bc   :  { %v9622_v38 = vadd.f32 %v321_v36, %v320_v37 }
 0x2be   :  { %408 = vrot.lane.b32.xlu1 %v9622_v38, %s9372_s9 }
 0x330   :  { %v409_v39 = vpop.permute.xlu1 %408 }
 0x331   :  { %7645 = vmatmul.mubr.msk.f32.vlgmr.msra.gmra.mrb[2].mxu1 %vm150_vm1, %v409_v39 }
 0x332   :  { %8539 = vmatpush3.bf16.msra.mxu1 %v9559_v8  ;;  %7666 = vmatprep.mubr.msk.f32.mxu1 %vm9369_vm0, %v9370_v11 }
 0x333   :  { %8540 = vmatprep.subr.bf16.mxu1 %v9368_v3 }
 0x336   :  { %8542 = vmatpush3.bf16.msra.mxu1 %v9576_v13 }
 0x337   :  { %8549 = vmatprep.subr.bf16.mxu1 %v9368_v3 }
 0x404   :  { %v478_v42 = vpop.f32.mrb[2].mxu1 }
 0x405   :  { %v479_v43 = vadd.f32 %v478_v42, %v9600_v15  ;;  %v7646_v44 = vpop.f32.mrb[3].mxu1 }
 0x407   :  { %490 = vrot.lane.b32.xlu0 %v479_v43, %s9371_s21  ;;  %v482_v46 = vadd.f32 %v479_v43, %v404_v45 }
 0x409   :  { %v7076_v47 = vmul.f32 -1.442695, %v482_v46 }
 0x40b   :  { %9008 = vpow2.f32 %v7076_v47  ;;  %v888_v47 = vld [vmem:[%s887_s18] sm:$0x1] }
 0x40c   :  { %7700 = vmatmul.mubr.msk.f32.vlgmr.msra.gmra.mrb[8].mxu0 %vm150_vm1, %v888_v47 }
 0x40d   :  { %8569 = vmatpush3.bf16.msra.mxu0 %v9548_v4  ;;  %7721 = vmatprep.mubr.msk.f32.mxu0 %vm9369_vm0, %v9370_v11 }
 0x40e   :  { %8570 = vmatprep.subr.bf16.mxu0 %v9368_v3 }
 0x411   :  { %8572 = vmatpush3.bf16.msra.mxu0 %v9572_v12 }
 0x412   :  { %8579 = vmatprep.subr.bf16.mxu0 %v9368_v3 }
 0x415   :  { %v9009_v48 = vpop.eup %9008 }
 0x416   :  { %v486_v49 = vadd.f32 1.0, %v9009_v48 }
 0x418   :  { %9010 = vrcp.f32 %v486_v49 }
 0x422   :  { %v9011_v50 = vpop.eup %9010 }
 0x423   :  { %v500_v57 = vsub.f32 1.0, %v9011_v50  ;;  %v506_v59 = vmul.f32 %v9011_v50, %v9622_v38 }
 0x479   :  { %v491_v51 = vpop.permute.xlu0 %490 }
 0x47a   :  { %v493_v52 = vmul.f32 %v9011_v50, %v491_v51 }
 0x47c   :  { %495 = vrot.lane.b32.xlu1 %v493_v52, %s9371_s21 }
 0x4ee   :  { %v496_v53 = vpop.permute.xlu1 %495 }
 0x4ef   :  { %v498_v54 = vadd.f32 %v496_v53, %v404_v45 }
 0x4f1   :  { %9012 = vtanh.f32 %v498_v54  ;;  %v958_v54 = vpop.f32.mrb[8].mxu0 }
 0x4fb   :  { %v9013_v55 = vpop.eup %9012 }
 0x4fc   :  { %502 = vrot.lane.b32.xlu0 %v9013_v55, %s9372_s9  ;;  %v7701_v55 = vpop.f32.mrb[9].mxu0 }
 0x56e   :  { %v503_v58 = vpop.permute.xlu0 %502 }
 0x56f   :  { %v505_v60 = vmul.f32 %v503_v58, %v500_v57 }
 0x571   :  { %v9649_v61 = vadd.f32 %v506_v59, %v505_v60  ;;  %v959_v59 = vadd.f32 %v958_v54, %v9607_v21 }
 0x573   :  { %593 = vrot.lane.b32.xlu1 %v9649_v61, %s9372_s9 }
 0x5e5   :  { %v594_v62 = vpop.permute.xlu1 %593 }
 0x5e6   :  { %7667 = vmatmul.mubr.msk.f32.vlgmr.msra.gmra.mrb[4].mxu1 %vm150_vm1, %v594_v62 }
 0x5e7   :  { %8551 = vmatpush3.bf16.msra.mxu1 %v9559_v8  ;;  %7688 = vmatprep.mubr.msk.f32.mxu1 %vm9369_vm0, %v9370_v11 }
 0x5e8   :  { %8552 = vmatprep.subr.bf16.mxu1 %v9368_v3 }
 0x5eb   :  { %8554 = vmatpush3.bf16.msra.mxu1 %v9576_v13 }
 0x5ec   :  { %8561 = vmatprep.subr.bf16.mxu1 %v9368_v3 }
 0x6b9   :  { %v663_v1 = vpop.f32.mrb[4].mxu1 }
 0x6ba   :  { %v664_v2 = vadd.f32 %v663_v1, %v9600_v15  ;;  %v7668_v5 = vpop.f32.mrb[5].mxu1 }
 0x6bc   :  { %675 = vrot.lane.b32.xlu0 %v664_v2, %s9371_s21  ;;  %v667_v7 = vadd.f32 %v664_v2, %v589_v6 }
 0x6be   :  { %v7080_v9 = vmul.f32 -1.442695, %v667_v7 }
 0x6c0   :  { %9014 = vpow2.f32 %v7080_v9 }
 0x6ca   :  { %v9015_v10 = vpop.eup %9014 }
 0x6cb   :  { %v671_v14 = vadd.f32 1.0, %v9015_v10  ;;  %v1073_v10 = vld [vmem:[%s1072_s3] sm:$0x1] }
 0x6cc   :  { %7722 = vmatmul.mubr.msk.f32.vlgmr.msra.gmra.mrb[10].mxu0 %vm150_vm1, %v1073_v10 }
 0x6cd   :  { %9016 = vrcp.f32 %v671_v14  ;;  %8581 = vmatpush3.bf16.msra.mxu0 %v9548_v4  ;;  %7743 = vmatprep.mubr.msk.f32.mxu0 %vm9369_vm0, %v9370_v11 }
 0x6ce   :  { %8582 = vmatprep.subr.bf16.mxu0 %v9368_v3 }
 0x6d1   :  { %8584 = vmatpush3.bf16.msra.mxu0 %v9572_v12 }
 0x6d2   :  { %8591 = vmatprep.subr.bf16.mxu0 %v9368_v3 }
 0x6d7   :  { %v9017_v16 = vpop.eup %9016 }
 0x6d8   :  { %v685_v24 = vsub.f32 1.0, %v9017_v16  ;;  %v691_v26 = vmul.f32 %v9017_v16, %v9649_v61 }
 0x72e   :  { %v676_v17 = vpop.permute.xlu0 %675 }
 0x72f   :  { %v678_v18 = vmul.f32 %v9017_v16, %v676_v17 }
 0x731   :  { %680 = vrot.lane.b32.xlu1 %v678_v18, %s9371_s21 }
 0x7a3   :  { %v681_v19 = vpop.permute.xlu1 %680 }
 0x7a4   :  { %v683_v20 = vadd.f32 %v681_v19, %v589_v6 }
 0x7a6   :  { %9018 = vtanh.f32 %v683_v20 }
 0x7b0   :  { %v9019_v22 = vpop.eup %9018 }
 0x7b1   :  { %687 = vrot.lane.b32.xlu0 %v9019_v22, %s9372_s9  ;;  %v1143_v22 = vpop.f32.mrb[10].mxu0 }
 0x7b2   :  { %v7723_v23 = vpop.f32.mrb[11].mxu0 }
 0x823   :  { %v688_v25 = vpop.permute.xlu0 %687 }
 0x824   :  { %v690_v27 = vmul.f32 %v688_v25, %v685_v24 }
 0x826   :  { %v9676_v28 = vadd.f32 %v691_v26, %v690_v27  ;;  %v1144_v27 = vadd.f32 %v1143_v22, %v9607_v21 }
 0x828   :  { %778 = vrot.lane.b32.xlu1 %v9676_v28, %s9372_s9 }
 0x89a   :  { %v779_v29 = vpop.permute.xlu1 %778 }
 0x89b   :  { %7689 = vmatmul.mubr.msk.f32.vlgmr.msra.gmra.mrb[6].mxu1 %vm150_vm1, %v779_v29 }
 0x89c   :  { %8563 = vmatpush3.bf16.msra.mxu1 %v9559_v8  ;;  %7710 = vmatprep.mubr.msk.f32.mxu1 %vm9369_vm0, %v9370_v11 }
 0x89d   :  { %8564 = vmatprep.subr.bf16.mxu1 %v9368_v3 }
 0x8a0   :  { %8566 = vmatpush3.bf16.msra.mxu1 %v9576_v13 }
 0x8a1   :  { %8573 = vmatprep.subr.bf16.mxu1 %v9368_v3 }
 0x96e   :  { %v848_v32 = vpop.f32.mrb[6].mxu1 }
 0x96f   :  { %v849_v33 = vadd.f32 %v848_v32, %v9600_v15  ;;  %v7690_v34 = vpop.f32.mrb[7].mxu1 }
 0x971   :  { %860 = vrot.lane.b32.xlu0 %v849_v33, %s9371_s21  ;;  %v852_v36 = vadd.f32 %v849_v33, %v774_v35 }
 0x973   :  { %v7084_v37 = vmul.f32 -1.442695, %v852_v36 }
 0x975   :  { %9020 = vpow2.f32 %v7084_v37 }
 0x97f   :  { %v9021_v39 = vpop.eup %9020 }
 0x980   :  { %v856_v40 = vadd.f32 1.0, %v9021_v39 }
 0x982   :  { %9022 = vrcp.f32 %v856_v40  ;;  %v1258_v40 = vld [vmem:[%s1257_s15] sm:$0x1] }
 0x983   :  { %7744 = vmatmul.mubr.msk.f32.vlgmr.msra.gmra.mrb[12].mxu0 %vm150_vm1, %v1258_v40 }
 0x984   :  { %8593 = vmatpush3.bf16.msra.mxu0 %v9548_v4  ;;  %7765 = vmatprep.mubr.msk.f32.mxu0 %vm9369_vm0, %v9370_v11 }
 0x985   :  { %8594 = vmatprep.subr.bf16.mxu0 %v9368_v3 }
 0x988   :  { %8596 = vmatpush3.bf16.msra.mxu0 %v9572_v12 }
 0x98c   :  { %v9023_v41 = vpop.eup %9022 }
 0x98d   :  { %v870_v48 = vsub.f32 1.0, %v9023_v41  ;;  %v876_v50 = vmul.f32 %v9023_v41, %v9676_v28 }
 0x9e3   :  { %v861_v42 = vpop.permute.xlu0 %860 }
 0x9e4   :  { %v863_v43 = vmul.f32 %v9023_v41, %v861_v42 }
 0x9e6   :  { %865 = vrot.lane.b32.xlu1 %v863_v43, %s9371_s21 }
 0xa56   :  { %v1328_v4 = vpop.f32.mrb[12].mxu0 }
 0xa57   :  { %v7745_v12 = vpop.f32.mrb[13].mxu0 }
 0xa58   :  { %v866_v44 = vpop.permute.xlu1 %865 }
 0xa59   :  { %v868_v45 = vadd.f32 %v866_v44, %v774_v35 }
 0xa5b   :  { %9024 = vtanh.f32 %v868_v45 }
 0xa65   :  { %v9025_v46 = vpop.eup %9024 }
 0xa66   :  { %872 = vrot.lane.b32.xlu0 %v9025_v46, %s9372_s9 }
 0xad8   :  { %v873_v49 = vpop.permute.xlu0 %872 }
 0xad9   :  { %v875_v51 = vmul.f32 %v873_v49, %v870_v48 }
 0xadb   :  { %v9703_v52 = vadd.f32 %v876_v50, %v875_v51  ;;  %v1329_v50 = vadd.f32 %v1328_v4, %v9607_v21 }
 0xadd   :  { %963 = vrot.lane.b32.xlu1 %v9703_v52, %s9372_s9 }
 0xb4f   :  { %v964_v53 = vpop.permute.xlu1 %963 }
 0xb50   :  { %7711 = vmatmul.mubr.msk.f32.vlgmr.msra.gmra.mrb[8].mxu1 %vm150_vm1, %v964_v53 }
 0xb51   :  { %8575 = vmatpush3.bf16.msra.mxu1 %v9559_v8  ;;  %7732 = vmatprep.mubr.msk.f32.mxu1 %vm9369_vm0, %v9370_v11 }
 0xb52   :  { %8576 = vmatprep.subr.bf16.mxu1 %v9368_v3 }
 0xb55   :  { %8578 = vmatpush3.bf16.msra.mxu1 %v9576_v13 }
 0xb56   :  { %8585 = vmatprep.subr.bf16.mxu1 %v9368_v3 }
 0xc23   :  { %v1033_v56 = vpop.f32.mrb[8].mxu1 }
 0xc24   :  { %v1034_v57 = vadd.f32 %v1033_v56, %v9600_v15  ;;  %v7712_v58 = vpop.f32.mrb[9].mxu1 }
 0xc26   :  { %1045 = vrot.lane.b32.xlu0 %v1034_v57, %s9371_s21  ;;  %v1037_v60 = vadd.f32 %v1034_v57, %v959_v59 }
 0xc28   :  { %v7088_v62 = vmul.f32 -1.442695, %v1037_v60  ;;  %v1443_v60 = vld [vmem:[%s1442_s23] sm:$0x1] }
 0xc29   :  { %7766 = vmatmul.mubr.msk.f32.vlgmr.msra.gmra.mrb[14].mxu0 %vm150_vm1, %v1443_v60 }
 0xc2a   :  { %9026 = vpow2.f32 %v7088_v62 }
 0xc34   :  { %v9027_v63 = vpop.eup %9026 }
 0xc35   :  { %v1041_v0 = vadd.f32 1.0, %v9027_v63 }
 0xc37   :  { %9028 = vrcp.f32 %v1041_v0 }
 0xc41   :  { %v9029_v1 = vpop.eup %9028 }
 0xc42   :  { %v1055_v14 = vsub.f32 1.0, %v9029_v1  ;;  %v1061_v17 = vmul.f32 %v9029_v1, %v9703_v52 }
 0xc98   :  { %v1046_v2 = vpop.permute.xlu0 %1045 }
 0xc99   :  { %v1048_v5 = vmul.f32 %v9029_v1, %v1046_v2 }
 0xc9b   :  { %1050 = vrot.lane.b32.xlu1 %v1048_v5, %s9371_s21 }
 0xd0d   :  { %v1051_v6 = vpop.permute.xlu1 %1050 }
 0xd0e   :  { %v1053_v7 = vadd.f32 %v1051_v6, %v959_v59  ;;  %v1513_v6 = vpop.f32.mrb[14].mxu0 }
 0xd10   :  { %9030 = vtanh.f32 %v1053_v7  ;;  %v7767_v7 = vpop.f32.mrb[15].mxu0 }
 0xd1a   :  { %v9031_v9 = vpop.eup %9030 }
 0xd1b   :  { %1057 = vrot.lane.b32.xlu0 %v9031_v9, %s9372_s9 }
 0xd8d   :  { %v1058_v16 = vpop.permute.xlu0 %1057 }
 0xd8e   :  { %v1060_v18 = vmul.f32 %v1058_v16, %v1055_v14  ;;  %v1514_v16 = vadd.f32 %v1513_v6, %v9607_v21  ;;  %v1777_v21 = vld [vmem:[%s10784_s2 + $0x10] sm:$0xff] }
 0xd90   :  { %v9730_v19 = vadd.f32 %v1061_v17, %v1060_v18 }
 0xd92   :  { %1148 = vrot.lane.b32.xlu1 %v9730_v19, %s9372_s9 }
 0xe04   :  { %v1149_v20 = vpop.permute.xlu1 %1148 }
 0xe05   :  { %7733 = vmatmul.mubr.msk.f32.vlgmr.msra.gmra.mrb[10].mxu1 %vm150_vm1, %v1149_v20 }
 0xe06   :  { %8587 = vmatpush3.bf16.msra.mxu1 %v9559_v8  ;;  %7754 = vmatprep.mubr.msk.f32.mxu1 %vm9369_vm0, %v9370_v11 }
 0xe07   :  { %8588 = vmatprep.subr.bf16.mxu1 %v9368_v3 }
 0xe0a   :  { %8590 = vmatpush3.bf16.msra.mxu1 %v9576_v13 }
 0xe0b   :  { %8597 = vmatprep.subr.bf16.mxu1 %v9368_v3 }
 0xed8   :  { %v1218_v24 = vpop.f32.mrb[10].mxu1 }
 0xed9   :  { %v1219_v25 = vadd.f32 %v1218_v24, %v9600_v15  ;;  %v7734_v26 = vpop.f32.mrb[11].mxu1 }
 0xeda   :  { %v1776_v26 = vld [vmem:[%s10784_s2 + $0x8] sm:$0xff] }
 0xedb   :  { %1230 = vrot.lane.b32.xlu0 %v1219_v25, %s9371_s21  ;;  %v1222_v29 = vadd.f32 %v1219_v25, %v1144_v27 }
 0xedd   :  { %v7092_v30 = vmul.f32 -1.442695, %v1222_v29  ;;  %v1778_v29 = vld [vmem:[%s10784_s2 + $0x18] sm:$0xff] }
 0xedf   :  { %9032 = vpow2.f32 %v7092_v30  ;;  %v9803_v30 = vpack.c.bf16 %v1778_v29, %v1777_v21 }
 0xee9   :  { %v9033_v31 = vpop.eup %9032 }
 0xeea   :  { %v1226_v32 = vadd.f32 1.0, %v9033_v31  ;;  %v1779_v31 = vld [vmem:[%s10784_s2 + $0x20] sm:$0xff] }
 0xeec   :  { %9034 = vrcp.f32 %v1226_v32  ;;  %v1780_v32 = vld [vmem:[%s10784_s2 + $0x28] sm:$0xff] }
 0xef6   :  { %v9035_v33 = vpop.eup %9034 }
 0xef7   :  { %v1240_v41 = vsub.f32 1.0, %v9035_v33  ;;  %v1246_v43 = vmul.f32 %v9035_v33, %v9730_v19 }
 0xf4d   :  { %v1231_v34 = vpop.permute.xlu0 %1230 }
 0xf4e   :  { %v1233_v35 = vmul.f32 %v9035_v33, %v1231_v34  ;;  %v145_v33 = vlaneseq  ;;  %v9813_v34 = vpack.c.bf16 %v1780_v32, %v1779_v31 }
 0xf50   :  { %1235 = vrot.lane.b32.xlu1 %v1233_v35, %s9371_s21  ;;  %v9815_v35 = vand.u32 127, %v145_v33 }
 0xf52   :  { %vm1772_vm2 = vcmp.eq.s32.totalorder %v9815_v35, 1 }
 0xf53   :  { %v7110_v40 = vsel %vm1772_vm2, 1.0, %v9370_v11 }
 0xfc2   :  { %v1236_v36 = vpop.permute.xlu1 %1235 }
 0xfc3   :  { %v1238_v37 = vadd.f32 %v1236_v36, %v1144_v27  ;;  %v1781_v36 = vld [vmem:[%s10784_s2 + $0x30] sm:$0xff] }
 0xfc5   :  { %9036 = vtanh.f32 %v1238_v37  ;;  %v1782_v37 = vld [vmem:[%s10784_s2 + $0x38] sm:$0xff] }
 0xfcf   :  { %v9037_v39 = vpop.eup %9036 }
 0xfd0   :  { %1242 = vrot.lane.b32.xlu0 %v9037_v39, %s9372_s9  ;;  %v9825_v39 = vpack.c.bf16 %v1782_v37, %v1781_v36 }
0x1042   :  { %v1243_v42 = vpop.permute.xlu0 %1242 }
0x1043   :  { %v1245_v44 = vmul.f32 %v1243_v42, %v1240_v41 }
0x1045   :  { %v9756_v45 = vadd.f32 %v1246_v43, %v1245_v44  ;;  %v146_v44 = vshrl.u32 %v145_v33, 7 }
0x1047   :  { %1333 = vrot.lane.b32.xlu1 %v9756_v45, %s9372_s9  ;;  %vm323_vm4 = vcmp.eq.s32.totalorder %v146_v44, 0  ;;  %vm1631_vm5 = vcmp.eq.s32.totalorder %v146_v44, %v9815_v35  ;;  %vm508_vm6 = vcmp.eq.s32.totalorder %v146_v44, 1  ;;  %vm693_vm7 = vcmp.eq.s32.totalorder %v146_v44, 2 }
0x1048   :  { %vm878_vm8 = vcmp.eq.s32.totalorder %v146_v44, 3  ;;  %vm1063_vm9 = vcmp.eq.s32.totalorder %v146_v44, 4  ;;  %vm1248_vm10 = vcmp.eq.s32.totalorder %v146_v44, 5  ;;  %vm1433_vm11 = vcmp.eq.s32.totalorder %v146_v44, 6 }
0x1049   :  { %vm1618_vm12 = vcmp.eq.s32.totalorder %v146_v44, 7 }
0x10b9   :  { %v1334_v46 = vpop.permute.xlu1 %1333 }
0x10ba   :  { %7755 = vmatmul.mubr.msk.f32.vlgmr.msra.gmra.mrb[12].mxu1 %vm150_vm1, %v1334_v46  ;;  %v328_v46 = vsub.s32 0, %v146_v44 }
0x10bb   :  { %8599 = vmatpush3.bf16.msra.mxu1 %v9559_v8  ;;  %7776 = vmatprep.mubr.msk.f32.mxu1 %vm9369_vm0, %v9370_v11 }
0x10bc   :  { %8600 = vmatprep.subr.bf16.mxu1 %v9368_v3  ;;  %v329_v4 = vrot.slane %v9622_v38, %v328_v46  ;;  %v514_v12 = vrot.slane %v9649_v61, %v328_v46  ;;  %v1069_v38 = vrot.slane %v9730_v19, %v328_v46  ;;  %v1254_v61 = vrot.slane %v9756_v45, %v328_v46 }
0x10bf   :  { %8602 = vmatpush3.bf16.msra.mxu1 %v9576_v13 }
0x10c0   :  { %8603 = vmatprep.subr.bf16.mxu1 %v9368_v3 }
0x118d   :  { %v1403_v47 = vpop.f32.mrb[12].mxu1 }
0x118e   :  { %v1404_v48 = vadd.f32 %v1403_v47, %v9600_v15  ;;  %v7756_v49 = vpop.f32.mrb[13].mxu1  ;;  %v7101_v47 = vsel %vm1631_vm5, 1.0, %v9370_v11  ;;  %vm2107_vm5 = vcmask 57344  }
0x118f   :  { %7781 = vmatprep.mubr.msk.f32.mxu0 %vm150_vm1, %v7101_v47  ;;  %v330_v49 = vsel %vm323_vm4, %v329_v4, 0.0 }
0x1190   :  { %1415 = vrot.lane.b32.xlu0 %v1404_v48, %s9371_s21  ;;  %v1407_v8 = vadd.f32 %v1404_v48, %v1329_v50  ;;  %v699_v48 = vrot.slane %v9676_v28, %v328_v46 }
0x1192   :  { %v7096_v51 = vmul.f32 -1.442695, %v1407_v8 }
0x1194   :  { %9038 = vpow2.f32 %v7096_v51  ;;  %v515_v51 = vsel %vm508_vm6, %v514_v12, %v330_v49  ;;  %vm2122_vm6 = vcmask 64512  }
0x119e   :  { %v9039_v53 = vpop.eup %9038 }
0x119f   :  { %v1411_v54 = vadd.f32 1.0, %v9039_v53 }
0x11a1   :  { %9040 = vrcp.f32 %v1411_v54 }
0x11ab   :  { %v9041_v55 = vpop.eup %9040 }
0x11ac   :  { %v1425_v62 = vsub.f32 1.0, %v9041_v55  ;;  %v1431_v0 = vmul.f32 %v9041_v55, %v9756_v45 }
0x1202   :  { %v1416_v13 = vpop.permute.xlu0 %1415 }
0x1203   :  { %v1418_v56 = vmul.f32 %v9041_v55, %v1416_v13  ;;  %v700_v13 = vsel %vm693_vm7, %v699_v48, %v515_v51  ;;  %vm2414_vm7 = vcmask 516096  }
0x1205   :  { %1420 = vrot.lane.b32.xlu1 %v1418_v56, %s9371_s21 }
0x1277   :  { %v1421_v57 = vpop.permute.xlu1 %1420 }
0x1278   :  { %v1423_v58 = vadd.f32 %v1421_v57, %v1329_v50  ;;  %v884_v50 = vrot.slane %v9703_v52, %v328_v46 }
0x127a   :  { %9042 = vtanh.f32 %v1423_v58  ;;  %v885_v57 = vsel %vm878_vm8, %v884_v50, %v700_v13 }
0x127b   :  { %v1070_v52 = vsel %vm1063_vm9, %v1069_v38, %v885_v57 }
0x127c   :  { %v1255_v19 = vsel %vm1248_vm10, %v1254_v61, %v1070_v52  ;;  %v1755_v52 = vld [vmem:[%s10793_s11] sm:$0xff] }
0x1284   :  { %v9043_v59 = vpop.eup %9042 }
0x1285   :  { %1427 = vrot.lane.b32.xlu0 %v9043_v59, %s9372_s9 }
0x12f7   :  { %v1428_v63 = vpop.permute.xlu0 %1427 }
0x12f8   :  { %v1430_v1 = vmul.f32 %v1428_v63, %v1425_v62  ;;  %v1626_v63 = vadd.s32 8, %v146_v44 }
0x12fa   :  { %v9777_v2 = vadd.f32 %v1431_v0, %v1430_v1  ;;  %v1627_v0 = vadd.s32 16, %v146_v44  ;;  %vm1632_vm13 = vcmp.eq.s32.totalorder %v1626_v63, %v9815_v35  ;;  %v1745_v1 = vld [vmem:[%s10789_s7] sm:$0xff] }
0x12fb   :  { %v7102_v7 = vsel %vm1632_vm13, 1.0, %v9370_v11  ;;  %vm2442_vm13 = vcmp.eq.s32.totalorder %v9815_v35, 0 }
0x12fc   :  { %1518 = vrot.lane.b32.xlu1 %v9777_v2, %s9372_s9  ;;  %v1439_v28 = vrot.slane %v9777_v2, %v328_v46  ;;  %vm1633_vm14 = vcmp.eq.s32.totalorder %v1627_v0, %v9815_v35 }
0x12fe   :  { %v1440_v60 = vsel %vm1433_vm11, %v1439_v28, %v1255_v19 }
0x136e   :  { %v1519_v5 = vpop.permute.xlu1 %1518 }
0x136f   :  { %7777 = vmatmul.mubr.msk.f32.vlgmr.msra.gmra.mrb[14].mxu1 %vm150_vm1, %v1519_v5  ;;  %v1628_v5 = vadd.s32 24, %v146_v44 }
0x1370   :  { %7803 = vmatprep.mubr.msk.f32.mxu1 %vm9369_vm0, %v9370_v11 }
0x1371   :  { %vm1634_vm15 = vcmp.eq.s32.totalorder %v1628_v5, %v9815_v35 }
0x1442   :  { %v1588_v9 = vpop.f32.mrb[14].mxu1 }
0x1443   :  { %v1589_v10 = vadd.f32 %v1588_v9, %v9600_v15  ;;  %v7778_v14 = vpop.f32.mrb[15].mxu1  ;;  %v1775_v15 = vld [vmem:[%s10784_s2] sm:$0xff] }
0x1444   :  { %v9797_v27 = vpack.c.bf16 %v1776_v26, %v1775_v15  ;;  %v1747_v14 = vld [vmem:[%s10789_s7 + $0x10] sm:$0xff] }
0x1445   :  { %1600 = vrot.lane.b32.xlu0 %v1589_v10, %s9371_s21  ;;  %v1592_v17 = vadd.f32 %v1589_v10, %v1514_v16  ;;  %v7103_v10 = vsel %vm1633_vm14, 1.0, %v9370_v11 }
0x1446   :  { %8605 = vmatpush3.bf16.msra.mxu1 %v9797_v27 }
0x1447   :  { %v7100_v18 = vmul.f32 -1.442695, %v1592_v17  ;;  %8606 = vmatprep.subr.bf16.mxu1 %v9368_v3  ;;  %v7104_v17 = vsel %vm1634_vm15, 1.0, %v9370_v11 }
0x1449   :  { %9044 = vpow2.f32 %v7100_v18 }
0x144a   :  { %8608 = vmatpush3.bf16.msra.mxu1 %v9803_v30 }
0x144b   :  { %8609 = vmatprep.subr.bf16.mxu1 %v9368_v3 }
0x144e   :  { %8611 = vmatpush3.bf16.msra.mxu1 %v9813_v34 }
0x144f   :  { %8612 = vmatprep.subr.bf16.mxu1 %v9368_v3 }
0x1452   :  { %8614 = vmatpush3.bf16.msra.mxu1 %v9825_v39 }
0x1453   :  { %v9045_v20 = vpop.eup %9044  ;;  %8627 = vmatprep.subr.bf16.mxu1 %v9368_v3 }
0x1454   :  { %v1596_v22 = vadd.f32 1.0, %v9045_v20  ;;  %v1749_v20 = vld [vmem:[#allocation8] sm:$0xff] }
0x1455   :  { %7804 = vmatmul.mubr.msk.f32.vlgmr.msra.gmra.mrb[16].mxu1 %vm1783_vm3, %v7110_v40 }
0x1456   :  { %9046 = vrcp.f32 %v1596_v22  ;;  %7836 = vmatprep.mubr.msk.f32.mxu1 %vm9369_vm0, %v9370_v11  ;;  %v1750_v22 = vld [vmem:[#allocation8 + $0x8] sm:$0xff] }
0x1460   :  { %v9047_v23 = vpop.eup %9046 }
0x1461   :  { %v1610_v8 = vsub.f32 1.0, %v9047_v23  ;;  %v1616_v54 = vmul.f32 %v9047_v23, %v9777_v2  ;;  %v1746_v2 = vld [vmem:[%s10789_s7 + $0x8] sm:$0xff] }
0x1462   :  { %v9870_v9 = vpack.c.bf16 %v1746_v2, %v1745_v1 }
0x14b7   :  { %v1601_v24 = vpop.permute.xlu0 %1600 }
0x14b8   :  { %v1603_v25 = vmul.f32 %v9047_v23, %v1601_v24  ;;  %v9892_v23 = vpack.c.bf16 %v1750_v22, %v1749_v20  ;;  %v1751_v24 = vld [vmem:[#allocation8 + $0x10] sm:$0xff] }
0x14ba   :  { %1605 = vrot.lane.b32.xlu1 %v1603_v25, %s9371_s21  ;;  %v1752_v25 = vld [vmem:[#allocation8 + $0x18] sm:$0xff] }
0x14bb   :  { %v9897_v15 = vpack.c.bf16 %v1752_v25, %v1751_v24 }
0x1528   :  { %v1853_v58 = vpop.f32.mrb[16].mxu1 }
0x1529   :  { %v7805_v59 = vpop.f32.mrb[17].mxu1 }
0x152c   :  { %v1606_v41 = vpop.permute.xlu1 %1605 }
0x152d   :  { %v1608_v42 = vadd.f32 %v1606_v41, %v1514_v16  ;;  %v1748_v16 = vld [vmem:[%s10789_s7 + $0x18] sm:$0xff]  ;;  %v9920_v41 = vld [vmem:[%s10792_s10] sm:$0x1] }
0x152e   :  { %v9885_v18 = vpack.c.bf16 %v1748_v16, %v1747_v14 }
0x152f   :  { %9048 = vtanh.f32 %v1608_v42 }
0x1539   :  { %v9049_v43 = vpop.eup %9048 }
0x153a   :  { %1612 = vrot.lane.b32.xlu0 %v9049_v43, %s9372_s9 }
0x15ac   :  { %v1613_v53 = vpop.permute.xlu0 %1612 }
0x15ad   :  { %v1615_v55 = vmul.f32 %v1613_v53, %v1610_v8 }
0x15af   :  { %v9849_v56 = vadd.f32 %v1616_v54, %v1615_v55 }
0x15b1   :  { %1931 = vrot.lane.b32.xlu0 %v9849_v56, %s9372_s9  ;;  %v1624_v45 = vrot.slane %v9849_v56, %v328_v46  ;;  %v9924_v46 = vld [vmem:[#allocation10] sm:$0x1] }
0x15b3   :  { %v1625_v62 = vsel %vm1618_vm12, %v1624_v45, %v1440_v60  ;;  %v1758_v45 = vld [vmem:[%s10793_s11 + $0x18] sm:$0xff] }
0x15b4   :  { %1644 = vrot.lane.b32.xlu1 %v1625_v62, %s9372_s9  ;;  %v1770_v62 = vstv %s10809_s12 }
0x15b5   :  { %vm9976_vm4 = vcmp.lt.s32.totalorder %v9815_v35, %v1770_v62 }
0x1623   :  { %v1932_v26 = vpop.permute.xlu0 %1931 }
0x1626   :  { %v9862_v6 = vpop.permute.xlu1 %1644 }
0x1627   :  { %7779 = vmatprep.subr.msk.mxu0 %vm150_vm1, %v9862_v6 }
0x1628   :  { %7780 = vmatpush3.xpose.msk.msra.mxu0 %vm150_vm1, %v9862_v6 }
0x1629   :  { %8615 = vmatprep.subr.bf16.mxu0 %v9368_v3 }
0x162b   :  { %7782 = vmatmul.mubr.msk.f32.vlgmr.msra.gmra.mrb[16].mxu0 %vm150_vm1, %v7102_v7 }
0x162c   :  { %8617 = vmatpush3.bf16.msra.mxu0 %v9870_v9  ;;  %7784 = vmatprep.mubr.msk.f32.mxu0 %vm150_vm1, %v7103_v10 }
0x162d   :  { %8618 = vmatprep.subr.bf16.mxu0 %v9368_v3 }
0x162f   :  { %7785 = vmatmul.mubr.msk.f32.gmra.mrb[18].mxu0 %vm150_vm1, %v7104_v17 }
0x1630   :  { %8620 = vmatpush3.bf16.msra.mxu0 %v9885_v18  ;;  %7814 = vmatprep.mubr.msk.f32.mxu0 %vm9369_vm0, %v9370_v11 }
0x1631   :  { %8621 = vmatprep.subr.bf16.mxu0 %v9368_v3 }
0x1633   :  { %7815 = vmatmul.mubr.msk.f32.vlgmr.msra.gmra.mrb[20].mxu0 %vm150_vm1, %v1853_v58  ;;  %v1756_v58 = vld [vmem:[%s10793_s11 + $0x8] sm:$0xff] }
0x1634   :  { %8623 = vmatpush3.bf16.msra.mxu0 %v9892_v23  ;;  %7825 = vmatprep.mubr.msk.f32.mxu0 %vm9369_vm0, %v9370_v11  ;;  %v9940_v19 = vpack.c.bf16 %v1756_v58, %v1755_v52 }
0x1635   :  { %8624 = vmatprep.subr.bf16.mxu0 %v9368_v3 }
0x1638   :  { %8626 = vmatpush3.bf16.msra.mxu0 %v9897_v15 }
0x1639   :  { %7839 = vmatprep.subr.mxu0 %v9370_v11 }
0x163b   :  { %7826 = vmatmul.mubr.msk.f32.vlgmr.msra.gmra.mrb[22].mxu0 %vm150_vm1, %v1932_v26 }
0x163c   :  { %7840 = vmatpush3.msra.mxu0 %v9862_v6  ;;  %7841 = vmatprep.mubr.msk.f32.mxu0 %vm9369_vm0, %v9370_v11 }
0x163d   :  { %8633 = vmatprep.subr.bf16.mxu0 %v9368_v3 }
0x16fe   :  { %v7783_v21 = vpop.f32.mrb[16].mxu0 }
0x16ff   :  { %v1726_v29 = vpop.f32.mrb[17].mxu0 }
0x1700   :  { %v9909_v31 = vpack.c.bf16 %v7783_v21, %v1726_v29  ;;  %v1759_v21 = vld [vmem:[#allocation11] sm:$0xff]  ;;  %v1760_v29 = vld [vmem:[#allocation11 + $0x8] sm:$0xff] }
0x1702   :  { %v7786_v32 = vpop.f32.mrb[18].mxu0  ;;  %8629 = vmatpush3.bf16.msra.mxu1 %v9909_v31 }
0x1703   :  { %v1736_v33 = vpop.f32.mrb[19].mxu0  ;;  %8630 = vmatprep.subr.bf16.mxu1 %v9368_v3 }
0x1704   :  { %v9913_v36 = vpack.c.bf16 %v7786_v32, %v1736_v33  ;;  %v9986_v33 = vpack.c.bf16 %v1760_v29, %v1759_v21 }
0x1706   :  { %v1926_v37 = vpop.f32.mrb[20].mxu0  ;;  %8632 = vmatpush3.bf16.msra.mxu1 %v9913_v36 }
0x1707   :  { %v7816_v40 = vpop.f32.mrb[21].mxu0  ;;  %8639 = vmatprep.subr.bf16.mxu1 %v9368_v3  ;;  %v1927_v4 = vadd.f32 %v1926_v37, %v9924_v46 }
0x1708   :  { %v1761_v40 = vld [vmem:[#allocation11 + $0x10] sm:$0xff] }
0x170e   :  { %v2001_v42 = vpop.f32.mrb[22].mxu0 }
0x170f   :  { %v2002_v43 = vadd.f32 %v2001_v42, %v9920_v41  ;;  %v7827_v44 = vpop.f32.mrb[23].mxu0  ;;  %v1762_v42 = vld [vmem:[#allocation11 + $0x18] sm:$0xff] }
0x1711   :  { %2013 = vrot.lane.b32.xlu1 %v2002_v43, %s9371_s21  ;;  %v2005_v12 = vadd.f32 %v2002_v43, %v1927_v4  ;;  %v9990_v43 = vpack.c.bf16 %v1762_v42, %v1761_v40 }
0x1713   :  { %v7114_v47 = vmul.f32 -1.442695, %v2005_v12  ;;  %v1764_v12 = vld [vmem:[#allocation13] sm:$0xff] }
0x1715   :  { %9050 = vpow2.f32 %v7114_v47  ;;  %v1765_v47 = vld [vmem:[#allocation13 + $0x8] sm:$0xff] }
0x171f   :  { %v9051_v48 = vpop.eup %9050 }
0x1720   :  { %v2009_v49 = vadd.f32 1.0, %v9051_v48  ;;  %v1766_v48 = vld [vmem:[#allocation13 + $0x10] sm:$0xff] }
0x1722   :  { %9052 = vrcp.f32 %v2009_v49  ;;  %v10000_v49 = vpack.c.bf16 %v1765_v47, %v1764_v12 }
0x172c   :  { %v9053_v50 = vpop.eup %9052 }
0x172d   :  { %v2023_v54 = vsub.f32 1.0, %v9053_v50  ;;  %v2029_v13 = vmul.f32 %v9053_v50, %v9849_v56  ;;  %v1757_v56 = vld [vmem:[%s10793_s11 + $0x10] sm:$0xff] }
0x172e   :  { %v9953_v60 = vpack.c.bf16 %v1758_v45, %v1757_v56 }
0x1783   :  { %v2014_v8 = vpop.permute.xlu1 %2013 }
0x1784   :  { %v2016_v51 = vmul.f32 %v9053_v50, %v2014_v8  ;;  %v1767_v50 = vld [vmem:[#allocation13 + $0x18] sm:$0xff] }
0x1785   :  { %v10003_v8 = vpack.c.bf16 %v1767_v50, %v1766_v48 }
0x1786   :  { %2018 = vrot.lane.b32.xlu0 %v2016_v51, %s9371_s21  ;;  %v10011_v51 = vld [vmem:[%s10795_s13] sm:$0x1] }
0x17f8   :  { %v2019_v38 = vpop.permute.xlu0 %2018 }
0x17f9   :  { %v2021_v53 = vadd.f32 %v2019_v38, %v1927_v4 }
0x17fb   :  { %9054 = vtanh.f32 %v2021_v53 }
0x1805   :  { %v9055_v61 = vpop.eup %9054 }
0x1806   :  { %2025 = vrot.lane.b32.xlu1 %v9055_v61, %s9372_s9 }
0x1878   :  { %v2026_v55 = vpop.permute.xlu1 %2025 }
0x1879   :  { %v2028_v28 = vmul.f32 %v2026_v55, %v2023_v54 }
0x187b   :  { %v9930_v57 = vadd.f32 %v2029_v13, %v2028_v28  ;;  %v10024_v13 = vld [vmem:[%s10812_s8] sm:$0x1] }
0x187d   :  { %2032 = vrot.lane.b32.xlu0 %v9930_v57, %s9372_s9 }
0x18ef   :  { %v9948_v59 = vpop.permute.xlu0 %2032 }
0x18f0   :  { %7837 = vmatmul.mubr.msk.f32.vlgmr.msra.gmra.mrb[18].mxu1 %vm150_vm1, %v9948_v59 }
0x18f1   :  { %8641 = vmatpush3.bf16.msra.mxu1 %v9940_v19  ;;  %7863 = vmatprep.mubr.msk.f32.mxu1 %vm9369_vm0, %v9370_v11 }
0x18f2   :  { %8642 = vmatprep.subr.bf16.mxu1 %v9368_v3 }
0x18f5   :  { %8644 = vmatpush3.bf16.msra.mxu1 %v9953_v60 }
0x18f6   :  { %8651 = vmatprep.subr.bf16.mxu1 %v9368_v3 }
0x18f8   :  { %7864 = vmatmul.mubr.msk.f32.vlgmr.msra.gmra.mrb[20].mxu1 %vm150_vm1, %v9948_v59 }
0x18f9   :  { %8653 = vmatpush3.bf16.msra.mxu1 %v9797_v27  ;;  %7893 = vmatprep.mubr.msk.f32.mxu1 %vm9369_vm0, %v9370_v11 }
0x18fa   :  { %8654 = vmatprep.subr.bf16.mxu1 %v9368_v3 }
0x18fd   :  { %8656 = vmatpush3.bf16.msra.mxu1 %v9803_v30 }
0x18fe   :  { %8657 = vmatprep.subr.bf16.mxu1 %v9368_v3 }
0x1901   :  { %8659 = vmatpush3.bf16.msra.mxu1 %v9813_v34 }
0x1902   :  { %8660 = vmatprep.subr.bf16.mxu1 %v9368_v3 }
0x1905   :  { %8662 = vmatpush3.bf16.msra.mxu1 %v9825_v39 }
0x1906   :  { %8675 = vmatprep.subr.bf16.mxu1 %v9368_v3 }
0x19c3   :  { %v2102_v0 = vpop.f32.mrb[18].mxu1 }
0x19c4   :  { %v2106_v1 = vsel %vm9976_vm4, %v2102_v0, -1e+30  ;;  %v7838_v2 = vpop.f32.mrb[19].mxu1 }
0x19c5   :  { %v2108_v5 = vsel %vm2107_vm5, %v2106_v1, -inf }
0x19c6   :  { %2109 = vmax.xlane.f32.xlu1 %v2108_v5 }
0x19cb   :  { %v2335_v7 = vpop.f32.mrb[20].mxu1 }
0x19cc   :  { %v7865_v10 = vpop.f32.mrb[21].mxu1 }
0x1a53   :  { %v2110_v14 = vpop.xlane.xlu1 %2109 }
0x1a54   :  { %v2111_v16 = vsub.f32 %v2106_v1, %v2110_v14 }
0x1a56   :  { %v2112_v17 = vmul.f32 1.442695, %v2111_v16 }
0x1a58   :  { %9056 = vpow2.f32 %v2112_v17 }
0x1a62   :  { %v9057_v20 = vpop.eup %9056 }
0x1a63   :  { %v2114_v22 = vsel %vm9976_vm4, %v9057_v20, 0.0 }
0x1a64   :  { %v2115_v24 = vsel %vm2107_vm5, %v2114_v22, 0.0 }
0x1a65   :  { %2116 = vadd.xlane.f32.xlu0 %v2115_v24 }
0x1af2   :  { %v2117_v25 = vpop.xlane.xlu0 %2116 }
0x1af3   :  { %v2118_v26 = vmax.f32 %v2117_v25, 1e-30 }
0x1af5   :  { %9058 = vrcp.f32 %v2118_v26 }
0x1aff   :  { %v9059_v32 = vpop.eup %9058 }
0x1b00   :  { %v2120_v37 = vmul.f32 %v9059_v32, %v2114_v22 }
0x1b02   :  { %7842 = vmatmul.mubr.msk.f32.vlgmr.msra.gmra.mrb[24].mxu0 %vm2122_vm6, %v2120_v37 }
0x1b03   :  { %8635 = vmatpush3.bf16.msra.mxu0 %v9986_v33  ;;  %7852 = vmatprep.mubr.msk.f32.mxu0 %vm9369_vm0, %v9370_v11 }
0x1b04   :  { %8636 = vmatprep.subr.bf16.mxu0 %v9368_v3 }
0x1b07   :  { %8638 = vmatpush3.bf16.msra.mxu0 %v9990_v43 }
0x1b08   :  { %8645 = vmatprep.subr.bf16.mxu0 %v9368_v3 }
0x1bd5   :  { %v2192_v44 = vpop.f32.mrb[24].mxu0 }
0x1bd6   :  { %v7843_v4 = vpop.f32.mrb[25].mxu0  ;;  %7853 = vmatmul.mubr.msk.f32.vlgmr.msra.gmra.mrb[26].mxu0 %vm150_vm1, %v2192_v44 }
0x1bd7   :  { %7874 = vmatprep.mubr.msk.f32.mxu0 %vm9369_vm0, %v9370_v11  ;;  %8647 = vmatpush3.bf16.msra.mxu0 %v10000_v49 }
0x1bd8   :  { %8648 = vmatprep.subr.bf16.mxu0 %v9368_v3 }
0x1bdb   :  { %8650 = vmatpush3.bf16.msra.mxu0 %v10003_v8 }
0x1bdc   :  { %8663 = vmatprep.subr.bf16.mxu0 %v9368_v3 }
0x1ca9   :  { %v2265_v38 = vpop.f32.mrb[26].mxu0 }
0x1caa   :  { %v2336_v53 = vadd.f32 %v2335_v7, %v2265_v38  ;;  %v7854_v61 = vpop.f32.mrb[27].mxu0 }
0x1cac   :  { %v2339_v54 = vadd.f32 %v2336_v53, %v10011_v51 }
0x1cae   :  { %9060 = vtanh.f32 %v2339_v54 }
0x1cb8   :  { %v9061_v55 = vpop.eup %9060 }
0x1cb9   :  { %7875 = vmatmul.mubr.msk.f32.vlgmr.msra.gmra.mrb[28].mxu0 %vm150_vm1, %v9061_v55 }
0x1cba   :  { %8665 = vmatpush3.bf16.msra.mxu0 %v9870_v9  ;;  %7904 = vmatprep.mubr.msk.f32.mxu0 %vm9369_vm0, %v9370_v11 }
0x1cbb   :  { %8666 = vmatprep.subr.bf16.mxu0 %v9368_v3 }
0x1cbe   :  { %8668 = vmatpush3.bf16.msra.mxu0 %v9885_v18 }
0x1cbf   :  { %8669 = vmatprep.subr.bf16.mxu0 %v9368_v3 }
0x1d8c   :  { %v2410_v28 = vpop.f32.mrb[28].mxu0 }
0x1d8d   :  { %v10027_v52 = vadd.f32 %v2410_v28, %v10024_v13  ;;  %v7876_v58 = vpop.f32.mrb[29].mxu0 }
0x1d8f   :  { %v2415_v56 = vsel %vm2414_vm7, %v10027_v52, -inf }
0x1d90   :  { %2416 = vmax.xlane.f32.xlu0 %v2415_v56 }
0x1e1d   :  { %v10031_v45 = vpop.xlane.xlu0 %2416 }
0x1e1e   :  { %vm2418_vm8 = vcmp.eq.f32.partialorder %v10027_v52, %v10031_v45 }
0x1e1f   :  { %v2419_v62 = vsel %vm2418_vm8, %v9815_v35, 64 }
0x1e20   :  { %v2420_v0 = vsel %vm2414_vm7, %v2419_v62, 2147483647 }
0x1e21   :  { %v2422_v1 = vshra.s32 %v2420_v0, 16  ;;  %v2421_v5 = vand.u32 65535, %v2420_v0 }
0x1e23   :  { %v2424_v2 = vcvt.s32.f32 %v2422_v1  ;;  %v2423_v10 = vcvt.s32.f32 %v2421_v5 }
0x1e25   :  { %2425 = vmin.xlane.f32.xlu1 %v2424_v2 }
0x1eb2   :  { %v2426_v7 = vpop.xlane.xlu1 %2425 }
0x1eb3   :  { %vm2427_vm9 = vcmp.eq.f32.partialorder %v2424_v2, %v2426_v7  ;;  %v2432_v16 = vcvt.f32.s32 %v2426_v7 }
0x1eb4   :  { %v2428_v14 = vsel %vm2427_vm9, %v2423_v10, inf  ;;  %vm3751_vm9 = vcmp.eq.s32.totalorder %v9815_v35, 2 }
0x1eb5   :  { %2429 = vmin.xlane.f32.xlu0 %v2428_v14  ;;  %v2433_v20 = vshll.u32 %v2432_v16, 16 }
0x1f42   :  { %v2430_v17 = vpop.xlane.xlu0 %2429 }
0x1f43   :  { %v2431_v22 = vcvt.f32.s32 %v2430_v17 }
0x1f45   :  { %v10037_v24 = vadd.s32 %v2433_v20, %v2431_v22 }
0x1f47   :  { %vm2445_vm10 = vcmp.eq.s32.totalorder %v9815_v35, %v10037_v24 }
0x1f48   :  { %v7120_v25 = vsel %vm2445_vm10, 1.0, %v9370_v11 }
0x1f49   :  { %7894 = vmatmul.mubr.msk.f32.vlgmr.msra.gmra.mrb[22].mxu1 %vm1783_vm3, %v7120_v25 }
0x1f4a   :  { %8677 = vmatpush3.bf16.msra.mxu1 %v9909_v31  ;;  %7926 = vmatprep.mubr.msk.f32.mxu1 %vm9369_vm0, %v9370_v11 }
0x1f4b   :  { %8678 = vmatprep.subr.bf16.mxu1 %v9368_v3 }
0x1f4e   :  { %8680 = vmatpush3.bf16.msra.mxu1 %v9913_v36 }
0x1f4f   :  { %8681 = vmatprep.subr.bf16.mxu1 %v9368_v3 }
0x201c   :  { %v2517_v26 = vpop.f32.mrb[22].mxu1 }
0x201d   :  { %v7895_v21 = vpop.f32.mrb[23].mxu1  ;;  %7905 = vmatmul.mubr.msk.f32.vlgmr.msra.gmra.mrb[30].mxu0 %vm150_vm1, %v2517_v26 }
0x201e   :  { %8671 = vmatpush3.bf16.msra.mxu0 %v9892_v23  ;;  %7915 = vmatprep.mubr.msk.f32.mxu0 %vm9369_vm0, %v9370_v11 }
0x201f   :  { %8672 = vmatprep.subr.bf16.mxu0 %v9368_v3 }
0x2022   :  { %8674 = vmatpush3.bf16.msra.mxu0 %v9897_v15 }
0x2023   :  { %7929 = vmatprep.subr.mxu0 %v9370_v11 }
0x2025   :  { %7916 = vmatmul.mubr.msk.f32.vlgmr.msra.gmra.mrb[32].mxu0 %vm150_vm1, %v9948_v59 }
0x2026   :  { %7930 = vmatpush3.msra.mxu0 %v9862_v6  ;;  %7931 = vmatprep.mubr.msk.f32.mxu0 %vm9369_vm0, %v9370_v11 }
0x2027   :  { %8687 = vmatprep.subr.bf16.mxu0 %v9368_v3 }
0x20f0   :  { %v2590_v29 = vpop.f32.mrb[30].mxu0 }
0x20f1   :  { %v7906_v32 = vpop.f32.mrb[31].mxu0  ;;  %v2591_v44 = vadd.f32 %v2590_v29, %v9924_v46 }
0x20f8   :  { %v2660_v37 = vpop.f32.mrb[32].mxu0 }
0x20f9   :  { %v2661_v40 = vadd.f32 %v2660_v37, %v9920_v41  ;;  %v7917_v42 = vpop.f32.mrb[33].mxu0 }
0x20fb   :  { %2672 = vrot.lane.b32.xlu1 %v2661_v40, %s9371_s21  ;;  %v2664_v4 = vadd.f32 %v2661_v40, %v2591_v44 }
0x20fd   :  { %v7124_v12 = vmul.f32 -1.442695, %v2664_v4 }
0x20ff   :  { %9062 = vpow2.f32 %v7124_v12 }
0x2109   :  { %v9063_v59 = vpop.eup %9062 }
0x210a   :  { %v2668_v47 = vadd.f32 1.0, %v9063_v59 }
0x210c   :  { %9064 = vrcp.f32 %v2668_v47 }
0x2116   :  { %v9065_v48 = vpop.eup %9064 }
0x2117   :  { %v2682_v55 = vsub.f32 1.0, %v9065_v48  ;;  %v2688_v58 = vmul.f32 %v9065_v48, %v9930_v57 }
0x216d   :  { %v2673_v50 = vpop.permute.xlu1 %2672 }
0x216e   :  { %v2675_v38 = vmul.f32 %v9065_v48, %v2673_v50 }
0x2170   :  { %2677 = vrot.lane.b32.xlu0 %v2675_v38, %s9371_s21 }
0x21e2   :  { %v2678_v53 = vpop.permute.xlu0 %2677 }
0x21e3   :  { %v2680_v61 = vadd.f32 %v2678_v53, %v2591_v44 }
0x21e5   :  { %9066 = vtanh.f32 %v2680_v61 }
0x21ef   :  { %v9067_v54 = vpop.eup %9066 }
0x21f0   :  { %2684 = vrot.lane.b32.xlu1 %v9067_v54, %s9372_s9 }
0x2262   :  { %v2685_v28 = vpop.permute.xlu1 %2684 }
0x2263   :  { %v2687_v56 = vmul.f32 %v2685_v28, %v2682_v55 }
0x2265   :  { %v10068_v62 = vadd.f32 %v2688_v58, %v2687_v56 }
0x2267   :  { %2691 = vrot.lane.b32.xlu1 %v10068_v62, %s9372_s9 }
0x22d9   :  { %v10072_v0 = vpop.permute.xlu1 %2691 }
0x22da   :  { %7927 = vmatmul.mubr.msk.f32.vlgmr.msra.gmra.mrb[24].mxu1 %vm150_vm1, %v10072_v0 }
0x22db   :  { %8683 = vmatpush3.bf16.msra.mxu1 %v9986_v33  ;;  %7942 = vmatprep.mubr.msk.f32.mxu1 %vm9369_vm0, %v9370_v11 }
0x22dc   :  { %8684 = vmatprep.subr.bf16.mxu1 %v9368_v3 }
0x22df   :  { %8686 = vmatpush3.bf16.msra.mxu1 %v9990_v43 }
0x22e0   :  { %8693 = vmatprep.subr.bf16.mxu1 %v9368_v3 }
0x23ad   :  { %v2761_v57 = vpop.f32.mrb[24].mxu1 }
0x23ae   :  { %v2765_v1 = vsel %vm9976_vm4, %v2761_v57, -1e+30  ;;  %v7928_v2 = vpop.f32.mrb[25].mxu1 }
0x23af   :  { %v2766_v5 = vsel %vm2107_vm5, %v2765_v1, -inf }
0x23b0   :  { %2767 = vmax.xlane.f32.xlu0 %v2766_v5 }
0x243d   :  { %v2768_v7 = vpop.xlane.xlu0 %2767 }
0x243e   :  { %v2769_v10 = vsub.f32 %v2765_v1, %v2768_v7 }
0x2440   :  { %v2770_v14 = vmul.f32 1.442695, %v2769_v10 }
0x2442   :  { %9068 = vpow2.f32 %v2770_v14 }
0x244c   :  { %v9069_v16 = vpop.eup %9068 }
0x244d   :  { %v2772_v17 = vsel %vm9976_vm4, %v9069_v16, 0.0  ;;  %v2443_v16 = vsel %vm2442_vm13, %v10037_v24, 0 }
0x244e   :  { %v2773_v20 = vsel %vm2107_vm5, %v2772_v17, 0.0 }
0x244f   :  { %2774 = vadd.xlane.f32.xlu1 %v2773_v20 }
0x24dc   :  { %v2775_v22 = vpop.xlane.xlu1 %2774 }
0x24dd   :  { %v2776_v25 = vmax.f32 %v2775_v22, 1e-30 }
0x24df   :  { %9070 = vrcp.f32 %v2776_v25 }
0x24e9   :  { %v9071_v26 = vpop.eup %9070 }
0x24ea   :  { %v2778_v21 = vmul.f32 %v9071_v26, %v2772_v17 }
0x24ec   :  { %7932 = vmatmul.mubr.msk.f32.vlgmr.msra.gmra.mrb[34].mxu0 %vm2122_vm6, %v2778_v21 }
0x24ed   :  { %8689 = vmatpush3.bf16.msra.mxu0 %v9940_v19  ;;  %7953 = vmatprep.mubr.msk.f32.mxu0 %vm9369_vm0, %v9370_v11 }
0x24ee   :  { %8690 = vmatprep.subr.bf16.mxu0 %v9368_v3 }
0x24f1   :  { %8692 = vmatpush3.bf16.msra.mxu0 %v9953_v60 }
0x24f2   :  { %8699 = vmatprep.subr.bf16.mxu0 %v9368_v3 }
0x24f4   :  { %7954 = vmatmul.mubr.msk.f32.vlgmr.msra.gmra.mrb[36].mxu0 %vm150_vm1, %v10072_v0 }
0x24f5   :  { %8701 = vmatpush3.bf16.msra.mxu0 %v9797_v27  ;;  %7983 = vmatprep.mubr.msk.f32.mxu0 %vm9369_vm0, %v9370_v11 }
0x24f6   :  { %8702 = vmatprep.subr.bf16.mxu0 %v9368_v3 }
0x24f9   :  { %8704 = vmatpush3.bf16.msra.mxu0 %v9803_v30 }
0x24fa   :  { %8705 = vmatprep.subr.bf16.mxu0 %v9368_v3 }
0x24fd   :  { %8707 = vmatpush3.bf16.msra.mxu0 %v9813_v34 }
0x24fe   :  { %8708 = vmatprep.subr.bf16.mxu0 %v9368_v3 }
0x2501   :  { %8710 = vmatpush3.bf16.msra.mxu0 %v9825_v39 }
0x2502   :  { %8723 = vmatprep.subr.bf16.mxu0 %v9368_v3 }
0x25bf   :  { %v2848_v29 = vpop.f32.mrb[34].mxu0 }
0x25c0   :  { %v7933_v32 = vpop.f32.mrb[35].mxu0  ;;  %7943 = vmatmul.mubr.msk.f32.vlgmr.msra.gmra.mrb[26].mxu1 %vm150_vm1, %v2848_v29 }
0x25c1   :  { %8695 = vmatpush3.bf16.msra.mxu1 %v10000_v49  ;;  %7964 = vmatprep.mubr.msk.f32.mxu1 %vm9369_vm0, %v9370_v11 }
0x25c2   :  { %8696 = vmatprep.subr.bf16.mxu1 %v9368_v3 }
0x25c5   :  { %8698 = vmatpush3.bf16.msra.mxu1 %v10003_v8 }
0x25c6   :  { %8711 = vmatprep.subr.bf16.mxu1 %v9368_v3 }
0x25c7   :  { %v2991_v37 = vpop.f32.mrb[36].mxu0 }
0x25c8   :  { %v7955_v40 = vpop.f32.mrb[37].mxu0 }
0x2693   :  { %v2921_v42 = vpop.f32.mrb[26].mxu1 }
0x2694   :  { %v2992_v44 = vadd.f32 %v2991_v37, %v2921_v42  ;;  %v7944_v4 = vpop.f32.mrb[27].mxu1 }
0x2696   :  { %v2995_v12 = vadd.f32 %v2992_v44, %v10011_v51 }
0x2698   :  { %9072 = vtanh.f32 %v2995_v12 }
0x26a2   :  { %v9073_v59 = vpop.eup %9072 }
0x26a3   :  { %7965 = vmatmul.mubr.msk.f32.vlgmr.msra.gmra.mrb[28].mxu1 %vm150_vm1, %v9073_v59 }
0x26a4   :  { %8713 = vmatpush3.bf16.msra.mxu1 %v9870_v9  ;;  %7994 = vmatprep.mubr.msk.f32.mxu1 %vm9369_vm0, %v9370_v11 }
0x26a5   :  { %8714 = vmatprep.subr.bf16.mxu1 %v9368_v3 }
0x26a8   :  { %8716 = vmatpush3.bf16.msra.mxu1 %v9885_v18 }
0x26a9   :  { %8717 = vmatprep.subr.bf16.mxu1 %v9368_v3 }
0x2776   :  { %v3066_v47 = vpop.f32.mrb[28].mxu1 }
0x2777   :  { %v10123_v48 = vadd.f32 %v3066_v47, %v10024_v13  ;;  %v7966_v50 = vpop.f32.mrb[29].mxu1 }
0x2779   :  { %v3070_v38 = vsel %vm2414_vm7, %v10123_v48, -inf }
0x277a   :  { %3071 = vmax.xlane.f32.xlu0 %v3070_v38 }
0x2807   :  { %v10127_v53 = vpop.xlane.xlu0 %3071 }
0x2808   :  { %vm3073_vm11 = vcmp.eq.f32.partialorder %v10123_v48, %v10127_v53 }
0x2809   :  { %v3074_v61 = vsel %vm3073_vm11, %v9815_v35, 64 }
0x280a   :  { %v3075_v54 = vsel %vm2414_vm7, %v3074_v61, 2147483647 }
0x280b   :  { %v3077_v55 = vshra.s32 %v3075_v54, 16  ;;  %v3076_v58 = vand.u32 65535, %v3075_v54 }
0x280d   :  { %v3079_v28 = vcvt.s32.f32 %v3077_v55  ;;  %v3078_v57 = vcvt.s32.f32 %v3076_v58 }
0x280f   :  { %3080 = vmin.xlane.f32.xlu0 %v3079_v28 }
0x289c   :  { %v3081_v56 = vpop.xlane.xlu0 %3080 }
0x289d   :  { %vm3082_vm12 = vcmp.eq.f32.partialorder %v3079_v28, %v3081_v56  ;;  %v3087_v2 = vcvt.f32.s32 %v3081_v56 }
0x289e   :  { %v3083_v1 = vsel %vm3082_vm12, %v3078_v57, inf }
0x289f   :  { %3084 = vmin.xlane.f32.xlu1 %v3083_v1  ;;  %v3088_v7 = vshll.u32 %v3087_v2, 16 }
0x292c   :  { %v3085_v5 = vpop.xlane.xlu1 %3084 }
0x292d   :  { %v3086_v10 = vcvt.f32.s32 %v3085_v5 }
0x292f   :  { %v3089_v14 = vadd.s32 %v3088_v7, %v3086_v10 }
0x2931   :  { %v10139_v17 = vsel %vm1772_vm2, %v3089_v14, %v2443_v16  ;;  %vm3099_vm14 = vcmp.eq.s32.totalorder %v9815_v35, %v3089_v14 }
0x2932   :  { %v7130_v20 = vsel %vm3099_vm14, 1.0, %v9370_v11  ;;  %vm4406_vm14 = vcmp.eq.s32.totalorder %v9815_v35, 3 }
0x2933   :  { %7984 = vmatmul.mubr.msk.f32.vlgmr.msra.gmra.mrb[38].mxu0 %vm1783_vm3, %v7130_v20 }
0x2934   :  { %8725 = vmatpush3.bf16.msra.mxu0 %v9909_v31  ;;  %8016 = vmatprep.mubr.msk.f32.mxu0 %vm9369_vm0, %v9370_v11 }
0x2935   :  { %8726 = vmatprep.subr.bf16.mxu0 %v9368_v3 }
0x2938   :  { %8728 = vmatpush3.bf16.msra.mxu0 %v9913_v36 }
0x2939   :  { %8729 = vmatprep.subr.bf16.mxu0 %v9368_v3 }
0x2a06   :  { %v3171_v24 = vpop.f32.mrb[38].mxu0 }
0x2a07   :  { %v7985_v22 = vpop.f32.mrb[39].mxu0  ;;  %7995 = vmatmul.mubr.msk.f32.vlgmr.msra.gmra.mrb[30].mxu1 %vm150_vm1, %v3171_v24 }
0x2a08   :  { %8719 = vmatpush3.bf16.msra.mxu1 %v9892_v23  ;;  %8005 = vmatprep.mubr.msk.f32.mxu1 %vm9369_vm0, %v9370_v11 }
0x2a09   :  { %8720 = vmatprep.subr.bf16.mxu1 %v9368_v3 }
0x2a0c   :  { %8722 = vmatpush3.bf16.msra.mxu1 %v9897_v15 }
0x2a0d   :  { %8019 = vmatprep.subr.mxu1 %v9370_v11 }
0x2a0f   :  { %8006 = vmatmul.mubr.msk.f32.vlgmr.msra.gmra.mrb[32].mxu1 %vm150_vm1, %v10072_v0 }
0x2a10   :  { %8020 = vmatpush3.msra.mxu1 %v9862_v6  ;;  %8021 = vmatprep.mubr.msk.f32.mxu1 %vm9369_vm0, %v9370_v11 }
0x2a11   :  { %8735 = vmatprep.subr.bf16.mxu1 %v9368_v3 }
0x2ada   :  { %v3244_v25 = vpop.f32.mrb[30].mxu1 }
0x2adb   :  { %v7996_v26 = vpop.f32.mrb[31].mxu1  ;;  %v3245_v37 = vadd.f32 %v3244_v25, %v9924_v46 }
0x2ae2   :  { %v3314_v21 = vpop.f32.mrb[32].mxu1 }
0x2ae3   :  { %v3315_v29 = vadd.f32 %v3314_v21, %v9920_v41  ;;  %v8007_v32 = vpop.f32.mrb[33].mxu1 }
0x2ae5   :  { %3326 = vrot.lane.b32.xlu0 %v3315_v29, %s9371_s21  ;;  %v3318_v40 = vadd.f32 %v3315_v29, %v3245_v37 }
0x2ae7   :  { %v7134_v42 = vmul.f32 -1.442695, %v3318_v40 }
0x2ae9   :  { %9074 = vpow2.f32 %v7134_v42 }
0x2af3   :  { %v9075_v0 = vpop.eup %9074 }
0x2af4   :  { %v3322_v44 = vadd.f32 1.0, %v9075_v0 }
0x2af6   :  { %9076 = vrcp.f32 %v3322_v44 }
0x2b00   :  { %v9077_v4 = vpop.eup %9076 }
0x2b01   :  { %v3336_v61 = vsub.f32 1.0, %v9077_v4  ;;  %v3342_v55 = vmul.f32 %v9077_v4, %v10068_v62 }
0x2b57   :  { %v3327_v12 = vpop.permute.xlu0 %3326 }
0x2b58   :  { %v3329_v59 = vmul.f32 %v9077_v4, %v3327_v12 }
0x2b5a   :  { %3331 = vrot.lane.b32.xlu1 %v3329_v59, %s9371_s21 }
0x2bcc   :  { %v3332_v47 = vpop.permute.xlu1 %3331 }
0x2bcd   :  { %v3334_v50 = vadd.f32 %v3332_v47, %v3245_v37 }
0x2bcf   :  { %9078 = vtanh.f32 %v3334_v50 }
0x2bd9   :  { %v9079_v38 = vpop.eup %9078 }
0x2bda   :  { %3338 = vrot.lane.b32.xlu1 %v9079_v38, %s9372_s9 }
0x2c4c   :  { %v3339_v54 = vpop.permute.xlu1 %3338 }
0x2c4d   :  { %v3341_v28 = vmul.f32 %v3339_v54, %v3336_v61 }
0x2c4f   :  { %v10169_v58 = vadd.f32 %v3342_v55, %v3341_v28 }
0x2c51   :  { %3345 = vrot.lane.b32.xlu0 %v10169_v58, %s9372_s9 }
0x2cc3   :  { %v10173_v56 = vpop.permute.xlu0 %3345 }
0x2cc4   :  { %8017 = vmatmul.mubr.msk.f32.vlgmr.msra.gmra.mrb[40].mxu0 %vm150_vm1, %v10173_v56 }
0x2cc5   :  { %8731 = vmatpush3.bf16.msra.mxu0 %v9986_v33  ;;  %8032 = vmatprep.mubr.msk.f32.mxu0 %vm9369_vm0, %v9370_v11 }
0x2cc6   :  { %8732 = vmatprep.subr.bf16.mxu0 %v9368_v3 }
0x2cc9   :  { %8734 = vmatpush3.bf16.msra.mxu0 %v9990_v43 }
0x2cca   :  { %8741 = vmatprep.subr.bf16.mxu0 %v9368_v3 }
0x2d97   :  { %v3415_v62 = vpop.f32.mrb[40].mxu0 }
0x2d98   :  { %v3419_v57 = vsel %vm9976_vm4, %v3415_v62, -1e+30  ;;  %v8018_v1 = vpop.f32.mrb[41].mxu0 }
0x2d99   :  { %v3420_v2 = vsel %vm2107_vm5, %v3419_v57, -inf }
0x2d9a   :  { %3421 = vmax.xlane.f32.xlu1 %v3420_v2 }
0x2e27   :  { %v3422_v5 = vpop.xlane.xlu1 %3421 }
0x2e28   :  { %v3423_v7 = vsub.f32 %v3419_v57, %v3422_v5 }
0x2e2a   :  { %v3424_v10 = vmul.f32 1.442695, %v3423_v7 }
0x2e2c   :  { %9080 = vpow2.f32 %v3424_v10 }
0x2e36   :  { %v9081_v14 = vpop.eup %9080 }
0x2e37   :  { %v3426_v16 = vsel %vm9976_vm4, %v9081_v14, 0.0 }
0x2e38   :  { %v3427_v20 = vsel %vm2107_vm5, %v3426_v16, 0.0 }
0x2e39   :  { %3428 = vadd.xlane.f32.xlu0 %v3427_v20 }
0x2ec6   :  { %v3429_v24 = vpop.xlane.xlu0 %3428 }
0x2ec7   :  { %v3430_v22 = vmax.f32 %v3429_v24, 1e-30 }
0x2ec9   :  { %9082 = vrcp.f32 %v3430_v22 }
0x2ed3   :  { %v9083_v25 = vpop.eup %9082 }
0x2ed4   :  { %v3432_v26 = vmul.f32 %v9083_v25, %v3426_v16 }
0x2ed6   :  { %8022 = vmatmul.mubr.msk.f32.vlgmr.msra.gmra.mrb[34].mxu1 %vm2122_vm6, %v3432_v26 }
0x2ed7   :  { %8737 = vmatpush3.bf16.msra.mxu1 %v9940_v19  ;;  %8043 = vmatprep.mubr.msk.f32.mxu1 %vm9369_vm0, %v9370_v11 }
0x2ed8   :  { %8738 = vmatprep.subr.bf16.mxu1 %v9368_v3 }
0x2edb   :  { %8740 = vmatpush3.bf16.msra.mxu1 %v9953_v60 }
0x2edc   :  { %8747 = vmatprep.subr.bf16.mxu1 %v9368_v3 }
0x2ede   :  { %8044 = vmatmul.mubr.msk.f32.vlgmr.msra.gmra.mrb[36].mxu1 %vm150_vm1, %v10173_v56 }
0x2edf   :  { %8749 = vmatpush3.bf16.msra.mxu1 %v9797_v27  ;;  %8073 = vmatprep.mubr.msk.f32.mxu1 %vm9369_vm0, %v9370_v11 }
0x2ee0   :  { %8750 = vmatprep.subr.bf16.mxu1 %v9368_v3 }
0x2ee3   :  { %8752 = vmatpush3.bf16.msra.mxu1 %v9803_v30 }
0x2ee4   :  { %8753 = vmatprep.subr.bf16.mxu1 %v9368_v3 }
0x2ee7   :  { %8755 = vmatpush3.bf16.msra.mxu1 %v9813_v34 }
0x2ee8   :  { %8756 = vmatprep.subr.bf16.mxu1 %v9368_v3 }
0x2eeb   :  { %8758 = vmatpush3.bf16.msra.mxu1 %v9825_v39 }
0x2eec   :  { %8771 = vmatprep.subr.bf16.mxu1 %v9368_v3 }
0x2fa9   :  { %v3502_v21 = vpop.f32.mrb[34].mxu1 }
0x2faa   :  { %v8023_v29 = vpop.f32.mrb[35].mxu1  ;;  %8033 = vmatmul.mubr.msk.f32.vlgmr.msra.gmra.mrb[42].mxu0 %vm150_vm1, %v3502_v21 }
0x2fab   :  { %8743 = vmatpush3.bf16.msra.mxu0 %v10000_v49  ;;  %8054 = vmatprep.mubr.msk.f32.mxu0 %vm9369_vm0, %v9370_v11 }
0x2fac   :  { %8744 = vmatprep.subr.bf16.mxu0 %v9368_v3 }
0x2faf   :  { %8746 = vmatpush3.bf16.msra.mxu0 %v10003_v8 }
0x2fb0   :  { %8759 = vmatprep.subr.bf16.mxu0 %v9368_v3 }
0x2fb1   :  { %v3645_v32 = vpop.f32.mrb[36].mxu1 }
0x2fb2   :  { %v8045_v37 = vpop.f32.mrb[37].mxu1 }
0x307d   :  { %v3575_v40 = vpop.f32.mrb[42].mxu0 }
0x307e   :  { %v3646_v42 = vadd.f32 %v3645_v32, %v3575_v40  ;;  %v8034_v0 = vpop.f32.mrb[43].mxu0 }
0x3080   :  { %v3649_v44 = vadd.f32 %v3646_v42, %v10011_v51 }
0x3082   :  { %9084 = vtanh.f32 %v3649_v44 }
0x308c   :  { %v9085_v4 = vpop.eup %9084 }
0x308d   :  { %8055 = vmatmul.mubr.msk.f32.vlgmr.msra.gmra.mrb[44].mxu0 %vm150_vm1, %v9085_v4 }
0x308e   :  { %8761 = vmatpush3.bf16.msra.mxu0 %v9870_v9  ;;  %8084 = vmatprep.mubr.msk.f32.mxu0 %vm9369_vm0, %v9370_v11 }
0x308f   :  { %8762 = vmatprep.subr.bf16.mxu0 %v9368_v3 }
0x3092   :  { %8764 = vmatpush3.bf16.msra.mxu0 %v9885_v18 }
0x3093   :  { %8765 = vmatprep.subr.bf16.mxu0 %v9368_v3 }
0x3160   :  { %v3720_v12 = vpop.f32.mrb[44].mxu0 }
0x3161   :  { %v10224_v59 = vadd.f32 %v3720_v12, %v10024_v13  ;;  %v8056_v47 = vpop.f32.mrb[45].mxu0 }
0x3163   :  { %v3724_v50 = vsel %vm2414_vm7, %v10224_v59, -inf }
0x3164   :  { %3725 = vmax.xlane.f32.xlu0 %v3724_v50 }
0x31f1   :  { %v10228_v38 = vpop.xlane.xlu0 %3725 }
0x31f2   :  { %vm3727_vm15 = vcmp.eq.f32.partialorder %v10224_v59, %v10228_v38 }
0x31f3   :  { %v3728_v61 = vsel %vm3727_vm15, %v9815_v35, 64 }
0x31f4   :  { %v3729_v54 = vsel %vm2414_vm7, %v3728_v61, 2147483647 }
0x31f5   :  { %v3731_v55 = vshra.s32 %v3729_v54, 16  ;;  %v3730_v62 = vand.u32 65535, %v3729_v54 }
0x31f7   :  { %v3733_v28 = vcvt.s32.f32 %v3731_v55  ;;  %v3732_v1 = vcvt.s32.f32 %v3730_v62 }
0x31f9   :  { %3734 = vmin.xlane.f32.xlu1 %v3733_v28 }
0x3286   :  { %v3735_v57 = vpop.xlane.xlu1 %3734 }
0x3287   :  { %vm3736_vm8 = vcmp.eq.f32.partialorder %v3733_v28, %v3735_v57  ;;  %v3741_v5 = vcvt.f32.s32 %v3735_v57 }
0x3288   :  { %v3737_v2 = vsel %vm3736_vm8, %v3732_v1, inf }
0x3289   :  { %3738 = vmin.xlane.f32.xlu0 %v3737_v2  ;;  %v3742_v10 = vshll.u32 %v3741_v5, 16 }
0x3316   :  { %v3739_v7 = vpop.xlane.xlu0 %3738 }
0x3317   :  { %v3740_v14 = vcvt.f32.s32 %v3739_v7 }
0x3319   :  { %v3743_v16 = vadd.s32 %v3742_v10, %v3740_v14 }
0x331b   :  { %v10238_v20 = vsel %vm3751_vm9, %v3743_v16, %v10139_v17  ;;  %vm3754_vm10 = vcmp.eq.s32.totalorder %v9815_v35, %v3743_v16 }
0x331c   :  { %v7140_v24 = vsel %vm3754_vm10, 1.0, %v9370_v11 }
0x331d   :  { %8074 = vmatmul.mubr.msk.f32.vlgmr.msra.gmra.mrb[38].mxu1 %vm1783_vm3, %v7140_v24 }
0x331e   :  { %8773 = vmatpush3.bf16.msra.mxu1 %v9909_v31  ;;  %8106 = vmatprep.mubr.msk.f32.mxu1 %vm9369_vm0, %v9370_v11 }
0x331f   :  { %8774 = vmatprep.subr.bf16.mxu1 %v9368_v3 }
0x3322   :  { %8776 = vmatpush3.bf16.msra.mxu1 %v9913_v36 }
0x3323   :  { %8777 = vmatprep.subr.bf16.mxu1 %v9368_v3 }
0x33f0   :  { %v3826_v22 = vpop.f32.mrb[38].mxu1 }
0x33f1   :  { %v8075_v17 = vpop.f32.mrb[39].mxu1  ;;  %8085 = vmatmul.mubr.msk.f32.vlgmr.msra.gmra.mrb[46].mxu0 %vm150_vm1, %v3826_v22 }
0x33f2   :  { %8767 = vmatpush3.bf16.msra.mxu0 %v9892_v23  ;;  %8095 = vmatprep.mubr.msk.f32.mxu0 %vm9369_vm0, %v9370_v11 }
0x33f3   :  { %8768 = vmatprep.subr.bf16.mxu0 %v9368_v3 }
0x33f6   :  { %8770 = vmatpush3.bf16.msra.mxu0 %v9897_v15 }
0x33f7   :  { %8109 = vmatprep.subr.mxu0 %v9370_v11 }
0x33f9   :  { %8096 = vmatmul.mubr.msk.f32.vlgmr.msra.gmra.mrb[48].mxu0 %vm150_vm1, %v10173_v56 }
0x33fa   :  { %8110 = vmatpush3.msra.mxu0 %v9862_v6  ;;  %8111 = vmatprep.mubr.msk.f32.mxu0 %vm9369_vm0, %v9370_v11 }
0x33fb   :  { %8783 = vmatprep.subr.bf16.mxu0 %v9368_v3 }
0x34c4   :  { %v3899_v25 = vpop.f32.mrb[46].mxu0 }
0x34c5   :  { %v8086_v26 = vpop.f32.mrb[47].mxu0  ;;  %v3900_v37 = vadd.f32 %v3899_v25, %v9924_v46 }
0x34cc   :  { %v3969_v21 = vpop.f32.mrb[48].mxu0 }
0x34cd   :  { %v3970_v29 = vadd.f32 %v3969_v21, %v9920_v41  ;;  %v8097_v32 = vpop.f32.mrb[49].mxu0 }
0x34cf   :  { %3981 = vrot.lane.b32.xlu1 %v3970_v29, %s9371_s21  ;;  %v3973_v40 = vadd.f32 %v3970_v29, %v3900_v37 }
0x34d1   :  { %v7144_v42 = vmul.f32 -1.442695, %v3973_v40 }
0x34d3   :  { %9086 = vpow2.f32 %v7144_v42 }
0x34dd   :  { %v9087_v56 = vpop.eup %9086 }
0x34de   :  { %v3977_v0 = vadd.f32 1.0, %v9087_v56 }
0x34e0   :  { %9088 = vrcp.f32 %v3977_v0 }
0x34ea   :  { %v9089_v44 = vpop.eup %9088 }
0x34eb   :  { %v3991_v61 = vsub.f32 1.0, %v9089_v44  ;;  %v3997_v46 = vmul.f32 %v9089_v44, %v10169_v58 }
0x3541   :  { %v3982_v4 = vpop.permute.xlu1 %3981 }
0x3542   :  { %v3984_v12 = vmul.f32 %v9089_v44, %v3982_v4 }
0x3544   :  { %3986 = vrot.lane.b32.xlu0 %v3984_v12, %s9371_s21 }
0x35b6   :  { %v3987_v47 = vpop.permute.xlu0 %3986 }
0x35b7   :  { %v3989_v50 = vadd.f32 %v3987_v47, %v3900_v37 }
0x35b9   :  { %9090 = vtanh.f32 %v3989_v50 }
0x35c3   :  { %v9091_v41 = vpop.eup %9090 }
0x35c4   :  { %3993 = vrot.lane.b32.xlu1 %v9091_v41, %s9372_s9 }
0x3636   :  { %v3994_v54 = vpop.permute.xlu1 %3993 }
0x3637   :  { %v3996_v55 = vmul.f32 %v3994_v54, %v3991_v61 }
0x3639   :  { %v10268_v28 = vadd.f32 %v3997_v46, %v3996_v55 }
0x363b   :  { %4000 = vrot.lane.b32.xlu1 %v10268_v28, %s9372_s9 }
0x36ad   :  { %v10272_v62 = vpop.permute.xlu1 %4000 }
0x36ae   :  { %8107 = vmatmul.mubr.msk.f32.vlgmr.msra.gmra.mrb[40].mxu1 %vm150_vm1, %v10272_v62 }
0x36af   :  { %8779 = vmatpush3.bf16.msra.mxu1 %v9986_v33  ;;  %8122 = vmatprep.mubr.msk.f32.mxu1 %vm9369_vm0, %v9370_v11 }
0x36b0   :  { %8780 = vmatprep.subr.bf16.mxu1 %v9368_v3 }
0x36b3   :  { %8782 = vmatpush3.bf16.msra.mxu1 %v9990_v43 }
0x36b4   :  { %8789 = vmatprep.subr.bf16.mxu1 %v9368_v3 }
0x3781   :  { %v4070_v58 = vpop.f32.mrb[40].mxu1 }
0x3782   :  { %v4074_v57 = vsel %vm9976_vm4, %v4070_v58, -1e+30  ;;  %v8108_v1 = vpop.f32.mrb[41].mxu1 }
0x3783   :  { %v4075_v2 = vsel %vm2107_vm5, %v4074_v57, -inf }
0x3784   :  { %4076 = vmax.xlane.f32.xlu0 %v4075_v2 }
0x3811   :  { %v4077_v5 = vpop.xlane.xlu0 %4076 }
0x3812   :  { %v4078_v7 = vsub.f32 %v4074_v57, %v4077_v5 }
0x3814   :  { %v4079_v10 = vmul.f32 1.442695, %v4078_v7 }
0x3816   :  { %9092 = vpow2.f32 %v4079_v10 }
0x3820   :  { %v9093_v14 = vpop.eup %9092 }
0x3821   :  { %v4081_v16 = vsel %vm9976_vm4, %v9093_v14, 0.0 }
0x3822   :  { %v4082_v24 = vsel %vm2107_vm5, %v4081_v16, 0.0 }
0x3823   :  { %4083 = vadd.xlane.f32.xlu1 %v4082_v24 }
0x38b0   :  { %v4084_v22 = vpop.xlane.xlu1 %4083 }
0x38b1   :  { %v4085_v17 = vmax.f32 %v4084_v22, 1e-30 }
0x38b3   :  { %9094 = vrcp.f32 %v4085_v17 }
0x38bd   :  { %v9095_v25 = vpop.eup %9094 }
0x38be   :  { %v4087_v26 = vmul.f32 %v9095_v25, %v4081_v16 }
0x38c0   :  { %8112 = vmatmul.mubr.msk.f32.vlgmr.msra.gmra.mrb[50].mxu0 %vm2122_vm6, %v4087_v26  ;;  %v10364_v26 = vld [vmem:[%s10792_s10] sm:$0x1] }
0x38c1   :  { %8785 = vmatpush3.bf16.msra.mxu0 %v9940_v19  ;;  %8133 = vmatprep.mubr.msk.f32.mxu0 %vm9369_vm0, %v9370_v11 }
0x38c2   :  { %8786 = vmatprep.subr.bf16.mxu0 %v9368_v3 }
0x38c5   :  { %8788 = vmatpush3.bf16.msra.mxu0 %v9953_v60 }
0x38c6   :  { %8795 = vmatprep.subr.bf16.mxu0 %v9368_v3 }
0x38c8   :  { %8134 = vmatmul.mubr.msk.f32.vlgmr.msra.gmra.mrb[52].mxu0 %vm150_vm1, %v10272_v62 }
0x38c9   :  { %8797 = vmatpush3.bf16.msra.mxu0 %v9797_v27  ;;  %8163 = vmatprep.mubr.msk.f32.mxu0 %vm9369_vm0, %v9370_v11 }
0x38ca   :  { %8798 = vmatprep.subr.bf16.mxu0 %v9368_v3 }
0x38cd   :  { %8800 = vmatpush3.bf16.msra.mxu0 %v9803_v30 }
0x38ce   :  { %8801 = vmatprep.subr.bf16.mxu0 %v9368_v3 }
0x38d1   :  { %8803 = vmatpush3.bf16.msra.mxu0 %v9813_v34 }
0x38d2   :  { %8804 = vmatprep.subr.bf16.mxu0 %v9368_v3 }
0x38d5   :  { %8806 = vmatpush3.bf16.msra.mxu0 %v9825_v39 }
0x38d6   :  { %8819 = vmatprep.subr.bf16.mxu0 %v9368_v3 }
0x3993   :  { %v4157_v21 = vpop.f32.mrb[50].mxu0 }
0x3994   :  { %v8113_v29 = vpop.f32.mrb[51].mxu0  ;;  %8123 = vmatmul.mubr.msk.f32.vlgmr.msra.gmra.mrb[42].mxu1 %vm150_vm1, %v4157_v21 }
0x3995   :  { %8791 = vmatpush3.bf16.msra.mxu1 %v10000_v49  ;;  %8144 = vmatprep.mubr.msk.f32.mxu1 %vm9369_vm0, %v9370_v11 }
0x3996   :  { %8792 = vmatprep.subr.bf16.mxu1 %v9368_v3 }
0x3999   :  { %8794 = vmatpush3.bf16.msra.mxu1 %v10003_v8 }
0x399a   :  { %8807 = vmatprep.subr.bf16.mxu1 %v9368_v3 }
0x399b   :  { %v4300_v32 = vpop.f32.mrb[52].mxu0 }
0x399c   :  { %v8135_v37 = vpop.f32.mrb[53].mxu0 }
0x3a67   :  { %v4230_v40 = vpop.f32.mrb[42].mxu1 }
0x3a68   :  { %v4301_v42 = vadd.f32 %v4300_v32, %v4230_v40  ;;  %v8124_v56 = vpop.f32.mrb[43].mxu1 }
0x3a6a   :  { %v4304_v0 = vadd.f32 %v4301_v42, %v10011_v51 }
0x3a6c   :  { %9096 = vtanh.f32 %v4304_v0 }
0x3a76   :  { %v9097_v44 = vpop.eup %9096 }
0x3a77   :  { %8145 = vmatmul.mubr.msk.f32.vlgmr.msra.gmra.mrb[44].mxu1 %vm150_vm1, %v9097_v44 }
0x3a78   :  { %8809 = vmatpush3.bf16.msra.mxu1 %v9870_v9  ;;  %8174 = vmatprep.mubr.msk.f32.mxu1 %vm9369_vm0, %v9370_v11 }
0x3a79   :  { %8810 = vmatprep.subr.bf16.mxu1 %v9368_v3 }
0x3a7c   :  { %8812 = vmatpush3.bf16.msra.mxu1 %v9885_v18 }
0x3a7d   :  { %8813 = vmatprep.subr.bf16.mxu1 %v9368_v3 }
0x3b4a   :  { %v4375_v4 = vpop.f32.mrb[44].mxu1 }
0x3b4b   :  { %v10323_v12 = vadd.f32 %v4375_v4, %v10024_v13  ;;  %v8146_v51 = vpop.f32.mrb[45].mxu1 }
0x3b4d   :  { %v4379_v47 = vsel %vm2414_vm7, %v10323_v12, -inf }
0x3b4e   :  { %4380 = vmax.xlane.f32.xlu0 %v4379_v47 }
0x3bdb   :  { %v10327_v50 = vpop.xlane.xlu0 %4380 }
0x3bdc   :  { %vm4382_vm11 = vcmp.eq.f32.partialorder %v10323_v12, %v10327_v50 }
0x3bdd   :  { %v4383_v41 = vsel %vm4382_vm11, %v9815_v35, 64  ;;  %vm5061_vm11 = vcmp.eq.s32.totalorder %v9815_v35, 4 }
0x3bde   :  { %v4384_v61 = vsel %vm2414_vm7, %v4383_v41, 2147483647 }
0x3bdf   :  { %v4386_v54 = vshra.s32 %v4384_v61, 16  ;;  %v4385_v55 = vand.u32 65535, %v4384_v61 }
0x3be1   :  { %v4388_v46 = vcvt.s32.f32 %v4386_v54  ;;  %v4387_v58 = vcvt.s32.f32 %v4385_v55 }
0x3be3   :  { %4389 = vmin.xlane.f32.xlu0 %v4388_v46 }
0x3c70   :  { %v4390_v13 = vpop.xlane.xlu0 %4389 }
0x3c71   :  { %vm4391_vm12 = vcmp.eq.f32.partialorder %v4388_v46, %v4390_v13  ;;  %v4396_v1 = vcvt.f32.s32 %v4390_v13 }
0x3c72   :  { %v4392_v57 = vsel %vm4391_vm12, %v4387_v58, inf }
0x3c73   :  { %4393 = vmin.xlane.f32.xlu1 %v4392_v57  ;;  %v4397_v5 = vshll.u32 %v4396_v1, 16 }
0x3d00   :  { %v4394_v2 = vpop.xlane.xlu1 %4393 }
0x3d01   :  { %v4395_v7 = vcvt.f32.s32 %v4394_v2 }
0x3d03   :  { %v4398_v10 = vadd.s32 %v4397_v5, %v4395_v7 }
0x3d05   :  { %v10337_v14 = vsel %vm4406_vm14, %v4398_v10, %v10238_v20  ;;  %vm4409_vm15 = vcmp.eq.s32.totalorder %v9815_v35, %v4398_v10 }
0x3d06   :  { %v7150_v16 = vsel %vm4409_vm15, 1.0, %v9370_v11 }
0x3d07   :  { %8164 = vmatmul.mubr.msk.f32.vlgmr.msra.gmra.mrb[54].mxu0 %vm1783_vm3, %v7150_v16 }
0x3d08   :  { %8821 = vmatpush3.bf16.msra.mxu0 %v9909_v31  ;;  %8196 = vmatprep.mubr.msk.f32.mxu0 %vm9369_vm0, %v9370_v11 }
0x3d09   :  { %8822 = vmatprep.subr.bf16.mxu0 %v9368_v3 }
0x3d0c   :  { %8824 = vmatpush3.bf16.msra.mxu0 %v9913_v36 }
0x3d0d   :  { %8825 = vmatprep.subr.bf16.mxu0 %v9368_v3 }
0x3dda   :  { %v4481_v24 = vpop.f32.mrb[54].mxu0 }
0x3ddb   :  { %v8165_v20 = vpop.f32.mrb[55].mxu0  ;;  %8175 = vmatmul.mubr.msk.f32.vlgmr.msra.gmra.mrb[46].mxu1 %vm150_vm1, %v4481_v24 }
0x3ddc   :  { %8815 = vmatpush3.bf16.msra.mxu1 %v9892_v23  ;;  %8185 = vmatprep.mubr.msk.f32.mxu1 %vm9369_vm0, %v9370_v11 }
0x3ddd   :  { %8816 = vmatprep.subr.bf16.mxu1 %v9368_v3 }
0x3de0   :  { %8818 = vmatpush3.bf16.msra.mxu1 %v9897_v15 }
0x3de1   :  { %8199 = vmatprep.subr.mxu1 %v9370_v11 }
0x3de3   :  { %8186 = vmatmul.mubr.msk.f32.vlgmr.msra.gmra.mrb[48].mxu1 %vm150_vm1, %v10272_v62  ;;  %v10368_v62 = vld [vmem:[#allocation10] sm:$0x1] }
0x3de4   :  { %8200 = vmatpush3.msra.mxu1 %v9862_v6  ;;  %8201 = vmatprep.mubr.msk.f32.mxu1 %vm9369_vm0, %v9370_v11 }
0x3de5   :  { %8831 = vmatprep.subr.bf16.mxu1 %v9368_v3 }
0x3eae   :  { %v4554_v22 = vpop.f32.mrb[46].mxu1 }
0x3eaf   :  { %v8176_v17 = vpop.f32.mrb[47].mxu1  ;;  %v4555_v32 = vadd.f32 %v10368_v62, %v4554_v22 }
0x3eb6   :  { %v4624_v25 = vpop.f32.mrb[48].mxu1 }
0x3eb7   :  { %v4625_v21 = vadd.f32 %v10364_v26, %v4624_v25  ;;  %v8187_v29 = vpop.f32.mrb[49].mxu1 }
0x3eb9   :  { %4636 = vrot.lane.b32.xlu0 %v4625_v21, %s9371_s21  ;;  %v4628_v37 = vadd.f32 %v4625_v21, %v4555_v32 }
0x3ebb   :  { %v7154_v40 = vmul.f32 -1.442695, %v4628_v37 }
0x3ebd   :  { %9098 = vpow2.f32 %v7154_v40 }
0x3ec7   :  { %v9099_v42 = vpop.eup %9098 }
0x3ec8   :  { %v4632_v56 = vadd.f32 1.0, %v9099_v42 }
0x3eca   :  { %9100 = vrcp.f32 %v4632_v56 }
0x3ed4   :  { %v9101_v0 = vpop.eup %9100 }
0x3ed5   :  { %v4646_v61 = vsub.f32 1.0, %v9101_v0  ;;  %v4652_v46 = vmul.f32 %v9101_v0, %v10268_v28 }
0x3f2b   :  { %v4637_v44 = vpop.permute.xlu0 %4636 }
0x3f2c   :  { %v4639_v4 = vmul.f32 %v9101_v0, %v4637_v44  ;;  %v10423_v44 = vld [vmem:[%s10795_s13] sm:$0x1] }
0x3f2e   :  { %4641 = vrot.lane.b32.xlu1 %v4639_v4, %s9371_s21 }
0x3fa0   :  { %v4642_v51 = vpop.permute.xlu1 %4641 }
0x3fa1   :  { %v4644_v47 = vadd.f32 %v4642_v51, %v4555_v32 }
0x3fa3   :  { %9102 = vtanh.f32 %v4644_v47 }
0x3fad   :  { %v9103_v41 = vpop.eup %9102 }
0x3fae   :  { %4648 = vrot.lane.b32.xlu1 %v9103_v41, %s9372_s9  ;;  %v10436_v41 = vld [vmem:[%s10812_s8] sm:$0x1] }
0x4020   :  { %v4649_v54 = vpop.permute.xlu1 %4648 }
0x4021   :  { %v4651_v55 = vmul.f32 %v4649_v54, %v4646_v61 }
0x4023   :  { %v10374_v13 = vadd.f32 %v4652_v46, %v4651_v55 }
0x4025   :  { %4655 = vrot.lane.b32.xlu0 %v10374_v13, %s9372_s9 }
0x4097   :  { %v10378_v58 = vpop.permute.xlu0 %4655 }
0x4098   :  { %8197 = vmatmul.mubr.msk.f32.vlgmr.msra.gmra.mrb[56].mxu0 %vm150_vm1, %v10378_v58 }
0x4099   :  { %8827 = vmatpush3.bf16.msra.mxu0 %v9986_v33  ;;  %8212 = vmatprep.mubr.msk.f32.mxu0 %vm9369_vm0, %v9370_v11 }
0x409a   :  { %8828 = vmatprep.subr.bf16.mxu0 %v9368_v3 }
0x409d   :  { %8830 = vmatpush3.bf16.msra.mxu0 %v9990_v43 }
0x409e   :  { %8837 = vmatprep.subr.bf16.mxu0 %v9368_v3 }
0x416b   :  { %v4725_v28 = vpop.f32.mrb[56].mxu0 }
0x416c   :  { %v4729_v57 = vsel %vm9976_vm4, %v4725_v28, -1e+30  ;;  %v8198_v1 = vpop.f32.mrb[57].mxu0 }
0x416d   :  { %v4730_v2 = vsel %vm2107_vm5, %v4729_v57, -inf }
0x416e   :  { %4731 = vmax.xlane.f32.xlu1 %v4730_v2 }
0x41fb   :  { %v4732_v5 = vpop.xlane.xlu1 %4731 }
0x41fc   :  { %v4733_v7 = vsub.f32 %v4729_v57, %v4732_v5 }
0x41fe   :  { %v4734_v10 = vmul.f32 1.442695, %v4733_v7 }
0x4200   :  { %9104 = vpow2.f32 %v4734_v10 }
0x420a   :  { %v9105_v16 = vpop.eup %9104 }
0x420b   :  { %v4736_v24 = vsel %vm9976_vm4, %v9105_v16, 0.0 }
0x420c   :  { %v4737_v20 = vsel %vm2107_vm5, %v4736_v24, 0.0 }
0x420d   :  { %4738 = vadd.xlane.f32.xlu0 %v4737_v20 }
0x429a   :  { %v4739_v22 = vpop.xlane.xlu0 %4738 }
0x429b   :  { %v4740_v17 = vmax.f32 %v4739_v22, 1e-30 }
0x429d   :  { %9106 = vrcp.f32 %v4740_v17 }
0x42a7   :  { %v9107_v25 = vpop.eup %9106 }
0x42a8   :  { %v4742_v21 = vmul.f32 %v9107_v25, %v4736_v24 }
0x42aa   :  { %8202 = vmatmul.mubr.msk.f32.vlgmr.msra.gmra.mrb[50].mxu1 %vm2122_vm6, %v4742_v21 }
0x42ab   :  { %8833 = vmatpush3.bf16.msra.mxu1 %v9940_v19  ;;  %8223 = vmatprep.mubr.msk.f32.mxu1 %vm9369_vm0, %v9370_v11 }
0x42ac   :  { %8834 = vmatprep.subr.bf16.mxu1 %v9368_v3 }
0x42af   :  { %8836 = vmatpush3.bf16.msra.mxu1 %v9953_v60 }
0x42b0   :  { %8843 = vmatprep.subr.bf16.mxu1 %v9368_v3 }
0x42b2   :  { %8224 = vmatmul.mubr.msk.f32.vlgmr.msra.gmra.mrb[52].mxu1 %vm150_vm1, %v10378_v58 }
0x42b3   :  { %8845 = vmatpush3.bf16.msra.mxu1 %v9797_v27  ;;  %8253 = vmatprep.mubr.msk.f32.mxu1 %vm9369_vm0, %v9370_v11 }
0x42b4   :  { %8846 = vmatprep.subr.bf16.mxu1 %v9368_v3 }
0x42b7   :  { %8848 = vmatpush3.bf16.msra.mxu1 %v9803_v30 }
0x42b8   :  { %8849 = vmatprep.subr.bf16.mxu1 %v9368_v3 }
0x42bb   :  { %8851 = vmatpush3.bf16.msra.mxu1 %v9813_v34 }
0x42bc   :  { %8852 = vmatprep.subr.bf16.mxu1 %v9368_v3 }
0x42bf   :  { %8854 = vmatpush3.bf16.msra.mxu1 %v9825_v39 }
0x42c0   :  { %8867 = vmatprep.subr.bf16.mxu1 %v9368_v3 }
0x437d   :  { %v4812_v29 = vpop.f32.mrb[50].mxu1 }
0x437e   :  { %v8203_v32 = vpop.f32.mrb[51].mxu1  ;;  %8213 = vmatmul.mubr.msk.f32.vlgmr.msra.gmra.mrb[58].mxu0 %vm150_vm1, %v4812_v29 }
0x437f   :  { %8839 = vmatpush3.bf16.msra.mxu0 %v10000_v49  ;;  %8234 = vmatprep.mubr.msk.f32.mxu0 %vm9369_vm0, %v9370_v11 }
0x4380   :  { %8840 = vmatprep.subr.bf16.mxu0 %v9368_v3 }
0x4383   :  { %8842 = vmatpush3.bf16.msra.mxu0 %v10003_v8 }
0x4384   :  { %8855 = vmatprep.subr.bf16.mxu0 %v9368_v3 }
0x4385   :  { %v4955_v37 = vpop.f32.mrb[52].mxu1 }
0x4386   :  { %v8225_v40 = vpop.f32.mrb[53].mxu1 }
0x4451   :  { %v4885_v42 = vpop.f32.mrb[58].mxu0 }
0x4452   :  { %v4956_v56 = vadd.f32 %v4955_v37, %v4885_v42  ;;  %v8214_v0 = vpop.f32.mrb[59].mxu0 }
0x4454   :  { %v4959_v4 = vadd.f32 %v10423_v44, %v4956_v56 }
0x4456   :  { %9108 = vtanh.f32 %v4959_v4 }
0x4460   :  { %v9109_v51 = vpop.eup %9108 }
0x4461   :  { %8235 = vmatmul.mubr.msk.f32.vlgmr.msra.gmra.mrb[60].mxu0 %vm150_vm1, %v9109_v51 }
0x4462   :  { %8857 = vmatpush3.bf16.msra.mxu0 %v9870_v9  ;;  %8264 = vmatprep.mubr.msk.f32.mxu0 %vm9369_vm0, %v9370_v11 }
0x4463   :  { %8858 = vmatprep.subr.bf16.mxu0 %v9368_v3 }
0x4466   :  { %8860 = vmatpush3.bf16.msra.mxu0 %v9885_v18 }
0x4467   :  { %8861 = vmatprep.subr.bf16.mxu0 %v9368_v3 }
0x4534   :  { %v5030_v47 = vpop.f32.mrb[60].mxu0 }
0x4535   :  { %v10439_v61 = vadd.f32 %v10436_v41, %v5030_v47  ;;  %v8236_v54 = vpop.f32.mrb[61].mxu0 }
0x4537   :  { %v5034_v46 = vsel %vm2414_vm7, %v10439_v61, -inf }
0x4538   :  { %5035 = vmax.xlane.f32.xlu0 %v5034_v46 }
0x45c5   :  { %v10443_v55 = vpop.xlane.xlu0 %5035 }
0x45c6   :  { %vm5037_vm8 = vcmp.eq.f32.partialorder %v10439_v61, %v10443_v55 }
0x45c7   :  { %v5038_v28 = vsel %vm5037_vm8, %v9815_v35, 64 }
0x45c8   :  { %v5039_v57 = vsel %vm2414_vm7, %v5038_v28, 2147483647 }
0x45c9   :  { %v5041_v1 = vshra.s32 %v5039_v57, 16  ;;  %v5040_v5 = vand.u32 65535, %v5039_v57 }
0x45cb   :  { %v5043_v2 = vcvt.s32.f32 %v5041_v1  ;;  %v5042_v10 = vcvt.s32.f32 %v5040_v5 }
0x45cd   :  { %5044 = vmin.xlane.f32.xlu1 %v5043_v2 }
0x465a   :  { %v5045_v7 = vpop.xlane.xlu1 %5044 }
0x465b   :  { %vm5046_vm10 = vcmp.eq.f32.partialorder %v5043_v2, %v5045_v7  ;;  %v5051_v24 = vcvt.f32.s32 %v5045_v7 }
0x465c   :  { %v5047_v16 = vsel %vm5046_vm10, %v5042_v10, inf  ;;  %vm5716_vm10 = vcmp.eq.s32.totalorder %v9815_v35, 5 }
0x465d   :  { %5048 = vmin.xlane.f32.xlu0 %v5047_v16  ;;  %v5052_v22 = vshll.u32 %v5051_v24, 16 }
0x46ea   :  { %v5049_v20 = vpop.xlane.xlu0 %5048 }
0x46eb   :  { %v5050_v17 = vcvt.f32.s32 %v5049_v20 }
0x46ed   :  { %v5053_v25 = vadd.s32 %v5052_v22, %v5050_v17 }
0x46ef   :  { %v10453_v21 = vsel %vm5061_vm11, %v5053_v25, %v10337_v14  ;;  %vm5064_vm12 = vcmp.eq.s32.totalorder %v9815_v35, %v5053_v25 }
0x46f0   :  { %v7160_v29 = vsel %vm5064_vm12, 1.0, %v9370_v11 }
0x46f1   :  { %8254 = vmatmul.mubr.msk.f32.vlgmr.msra.gmra.mrb[54].mxu1 %vm1783_vm3, %v7160_v29 }
0x46f2   :  { %8869 = vmatpush3.bf16.msra.mxu1 %v9909_v31  ;;  %8286 = vmatprep.mubr.msk.f32.mxu1 %vm9369_vm0, %v9370_v11 }
0x46f3   :  { %8870 = vmatprep.subr.bf16.mxu1 %v9368_v3 }
0x46f6   :  { %8872 = vmatpush3.bf16.msra.mxu1 %v9913_v36 }
0x46f7   :  { %8873 = vmatprep.subr.bf16.mxu1 %v9368_v3 }
0x47c4   :  { %v5136_v32 = vpop.f32.mrb[54].mxu1 }
0x47c5   :  { %v8255_v14 = vpop.f32.mrb[55].mxu1  ;;  %8265 = vmatmul.mubr.msk.f32.vlgmr.msra.gmra.mrb[62].mxu0 %vm150_vm1, %v5136_v32 }
0x47c6   :  { %8863 = vmatpush3.bf16.msra.mxu0 %v9892_v23  ;;  %8275 = vmatprep.mubr.msk.f32.mxu0 %vm9369_vm0, %v9370_v11 }
0x47c7   :  { %8864 = vmatprep.subr.bf16.mxu0 %v9368_v3 }
0x47ca   :  { %8866 = vmatpush3.bf16.msra.mxu0 %v9897_v15 }
0x47cb   :  { %8289 = vmatprep.subr.mxu0 %v9370_v11 }
0x47cd   :  { %8276 = vmatmul.mubr.msk.f32.vlgmr.msra.gmra.mrb[64].mxu0 %vm150_vm1, %v10378_v58 }
0x47ce   :  { %8290 = vmatpush3.msra.mxu0 %v9862_v6  ;;  %8291 = vmatprep.mubr.msk.f32.mxu0 %vm9369_vm0, %v9370_v11 }
0x47cf   :  { %8879 = vmatprep.subr.bf16.mxu0 %v9368_v3 }
0x4898   :  { %v5209_v37 = vpop.f32.mrb[62].mxu0 }
0x4899   :  { %v8266_v40 = vpop.f32.mrb[63].mxu0  ;;  %v5210_v4 = vadd.f32 %v10368_v62, %v5209_v37 }
0x48a0   :  { %v5279_v42 = vpop.f32.mrb[64].mxu0 }
0x48a1   :  { %v5280_v56 = vadd.f32 %v10364_v26, %v5279_v42  ;;  %v8277_v0 = vpop.f32.mrb[65].mxu0 }
0x48a3   :  { %5291 = vrot.lane.b32.xlu1 %v5280_v56, %s9371_s21  ;;  %v5283_v51 = vadd.f32 %v5280_v56, %v5210_v4 }
0x48a5   :  { %v7164_v47 = vmul.f32 -1.442695, %v5283_v51 }
0x48a7   :  { %9110 = vpow2.f32 %v7164_v47 }
0x48b1   :  { %v9111_v58 = vpop.eup %9110 }
0x48b2   :  { %v5287_v54 = vadd.f32 1.0, %v9111_v58 }
0x48b4   :  { %9112 = vrcp.f32 %v5287_v54 }
0x48be   :  { %v9113_v46 = vpop.eup %9112 }
0x48bf   :  { %v5301_v7 = vsub.f32 1.0, %v9113_v46  ;;  %v5307_v16 = vmul.f32 %v9113_v46, %v10374_v13 }
0x4915   :  { %v5292_v28 = vpop.permute.xlu1 %5291 }
0x4916   :  { %v5294_v57 = vmul.f32 %v9113_v46, %v5292_v28 }
0x4918   :  { %5296 = vrot.lane.b32.xlu0 %v5294_v57, %s9371_s21 }
0x498a   :  { %v5297_v1 = vpop.permute.xlu0 %5296 }
0x498b   :  { %v5299_v2 = vadd.f32 %v5297_v1, %v5210_v4 }
0x498d   :  { %9114 = vtanh.f32 %v5299_v2 }
0x4997   :  { %v9115_v5 = vpop.eup %9114 }
0x4998   :  { %5303 = vrot.lane.b32.xlu1 %v9115_v5, %s9372_s9 }
0x4a0a   :  { %v5304_v10 = vpop.permute.xlu1 %5303 }
0x4a0b   :  { %v5306_v24 = vmul.f32 %v5304_v10, %v5301_v7 }
0x4a0d   :  { %v10483_v20 = vadd.f32 %v5307_v16, %v5306_v24 }
0x4a0f   :  { %5310 = vrot.lane.b32.xlu1 %v10483_v20, %s9372_s9 }
0x4a81   :  { %v10487_v22 = vpop.permute.xlu1 %5310 }
0x4a82   :  { %8287 = vmatmul.mubr.msk.f32.vlgmr.msra.gmra.mrb[56].mxu1 %vm150_vm1, %v10487_v22 }
0x4a83   :  { %8875 = vmatpush3.bf16.msra.mxu1 %v9986_v33  ;;  %8302 = vmatprep.mubr.msk.f32.mxu1 %vm9369_vm0, %v9370_v11 }
0x4a84   :  { %8876 = vmatprep.subr.bf16.mxu1 %v9368_v3 }
0x4a87   :  { %8878 = vmatpush3.bf16.msra.mxu1 %v9990_v43 }
0x4a88   :  { %8885 = vmatprep.subr.bf16.mxu1 %v9368_v3 }
0x4b55   :  { %v5380_v13 = vpop.f32.mrb[56].mxu1 }
0x4b56   :  { %v5384_v17 = vsel %vm9976_vm4, %v5380_v13, -1e+30  ;;  %v8288_v25 = vpop.f32.mrb[57].mxu1 }
0x4b57   :  { %v5385_v29 = vsel %vm2107_vm5, %v5384_v17, -inf }
0x4b58   :  { %5386 = vmax.xlane.f32.xlu0 %v5385_v29 }
0x4be5   :  { %v5387_v32 = vpop.xlane.xlu0 %5386 }
0x4be6   :  { %v5388_v14 = vsub.f32 %v5384_v17, %v5387_v32 }
0x4be8   :  { %v5389_v37 = vmul.f32 1.442695, %v5388_v14 }
0x4bea   :  { %9116 = vpow2.f32 %v5389_v37 }
0x4bf4   :  { %v9117_v40 = vpop.eup %9116 }
0x4bf5   :  { %v5391_v42 = vsel %vm9976_vm4, %v9117_v40, 0.0 }
0x4bf6   :  { %v5392_v56 = vsel %vm2107_vm5, %v5391_v42, 0.0 }
0x4bf7   :  { %5393 = vadd.xlane.f32.xlu1 %v5392_v56 }
0x4c84   :  { %v5394_v0 = vpop.xlane.xlu1 %5393 }
0x4c85   :  { %v5395_v4 = vmax.f32 %v5394_v0, 1e-30 }
0x4c87   :  { %9118 = vrcp.f32 %v5395_v4 }
0x4c91   :  { %v9119_v51 = vpop.eup %9118 }
0x4c92   :  { %v5397_v47 = vmul.f32 %v9119_v51, %v5391_v42 }
0x4c94   :  { %8292 = vmatmul.mubr.msk.f32.vlgmr.msra.gmra.mrb[66].mxu0 %vm2122_vm6, %v5397_v47 }
0x4c95   :  { %8881 = vmatpush3.bf16.msra.mxu0 %v9940_v19  ;;  %8313 = vmatprep.mubr.msk.f32.mxu0 %vm9369_vm0, %v9370_v11 }
0x4c96   :  { %8882 = vmatprep.subr.bf16.mxu0 %v9368_v3 }
0x4c99   :  { %8884 = vmatpush3.bf16.msra.mxu0 %v9953_v60 }
0x4c9a   :  { %8891 = vmatprep.subr.bf16.mxu0 %v9368_v3 }
0x4c9c   :  { %8314 = vmatmul.mubr.msk.f32.vlgmr.msra.gmra.mrb[68].mxu0 %vm150_vm1, %v10487_v22 }
0x4c9d   :  { %8893 = vmatpush3.bf16.msra.mxu0 %v9797_v27  ;;  %8343 = vmatprep.mubr.msk.f32.mxu0 %vm9369_vm0, %v9370_v11 }
0x4c9e   :  { %8894 = vmatprep.subr.bf16.mxu0 %v9368_v3 }
0x4ca1   :  { %8896 = vmatpush3.bf16.msra.mxu0 %v9803_v30 }
0x4ca2   :  { %8897 = vmatprep.subr.bf16.mxu0 %v9368_v3 }
0x4ca5   :  { %8899 = vmatpush3.bf16.msra.mxu0 %v9813_v34 }
0x4ca6   :  { %8900 = vmatprep.subr.bf16.mxu0 %v9368_v3 }
0x4ca9   :  { %8902 = vmatpush3.bf16.msra.mxu0 %v9825_v39 }
0x4caa   :  { %8915 = vmatprep.subr.bf16.mxu0 %v9368_v3 }
0x4d67   :  { %v5467_v58 = vpop.f32.mrb[66].mxu0 }
0x4d68   :  { %v8293_v54 = vpop.f32.mrb[67].mxu0  ;;  %8303 = vmatmul.mubr.msk.f32.vlgmr.msra.gmra.mrb[58].mxu1 %vm150_vm1, %v5467_v58 }
0x4d69   :  { %8887 = vmatpush3.bf16.msra.mxu1 %v10000_v49  ;;  %8324 = vmatprep.mubr.msk.f32.mxu1 %vm9369_vm0, %v9370_v11 }
0x4d6a   :  { %8888 = vmatprep.subr.bf16.mxu1 %v9368_v3 }
0x4d6d   :  { %8890 = vmatpush3.bf16.msra.mxu1 %v10003_v8 }
0x4d6e   :  { %8903 = vmatprep.subr.bf16.mxu1 %v9368_v3 }
0x4d6f   :  { %v5610_v46 = vpop.f32.mrb[68].mxu0 }
0x4d70   :  { %v8315_v28 = vpop.f32.mrb[69].mxu0 }
0x4e3b   :  { %v5540_v57 = vpop.f32.mrb[58].mxu1 }
0x4e3c   :  { %v5611_v1 = vadd.f32 %v5610_v46, %v5540_v57  ;;  %v8304_v2 = vpop.f32.mrb[59].mxu1 }
0x4e3e   :  { %v5614_v5 = vadd.f32 %v10423_v44, %v5611_v1 }
0x4e40   :  { %9120 = vtanh.f32 %v5614_v5 }
0x4e4a   :  { %v9121_v7 = vpop.eup %9120 }
0x4e4b   :  { %8325 = vmatmul.mubr.msk.f32.vlgmr.msra.gmra.mrb[60].mxu1 %vm150_vm1, %v9121_v7 }
0x4e4c   :  { %8905 = vmatpush3.bf16.msra.mxu1 %v9870_v9  ;;  %8354 = vmatprep.mubr.msk.f32.mxu1 %vm9369_vm0, %v9370_v11 }
0x4e4d   :  { %8906 = vmatprep.subr.bf16.mxu1 %v9368_v3 }
0x4e50   :  { %8908 = vmatpush3.bf16.msra.mxu1 %v9885_v18 }
0x4e51   :  { %8909 = vmatprep.subr.bf16.mxu1 %v9368_v3 }
0x4f1e   :  { %v5685_v10 = vpop.f32.mrb[60].mxu1 }
0x4f1f   :  { %v10538_v16 = vadd.f32 %v10436_v41, %v5685_v10  ;;  %v8326_v24 = vpop.f32.mrb[61].mxu1 }
0x4f21   :  { %v5689_v13 = vsel %vm2414_vm7, %v10538_v16, -inf }
0x4f22   :  { %5690 = vmax.xlane.f32.xlu0 %v5689_v13 }
0x4faf   :  { %v10542_v17 = vpop.xlane.xlu0 %5690 }
0x4fb0   :  { %vm5692_vm15 = vcmp.eq.f32.partialorder %v10538_v16, %v10542_v17 }
0x4fb1   :  { %v5693_v25 = vsel %vm5692_vm15, %v9815_v35, 64 }
0x4fb2   :  { %v5694_v29 = vsel %vm2414_vm7, %v5693_v25, 2147483647 }
0x4fb3   :  { %v5696_v32 = vshra.s32 %v5694_v29, 16  ;;  %v5695_v37 = vand.u32 65535, %v5694_v29 }
0x4fb5   :  { %v5698_v14 = vcvt.s32.f32 %v5696_v32  ;;  %v5697_v42 = vcvt.s32.f32 %v5695_v37 }
0x4fb7   :  { %5699 = vmin.xlane.f32.xlu0 %v5698_v14 }
0x5044   :  { %v5700_v40 = vpop.xlane.xlu0 %5699 }
0x5045   :  { %vm5701_vm8 = vcmp.eq.f32.partialorder %v5698_v14, %v5700_v40  ;;  %v5706_v0 = vcvt.f32.s32 %v5700_v40 }
0x5046   :  { %v5702_v56 = vsel %vm5701_vm8, %v5697_v42, inf }
0x5047   :  { %5703 = vmin.xlane.f32.xlu1 %v5702_v56  ;;  %v5707_v51 = vshll.u32 %v5706_v0, 16 }
0x50d4   :  { %v5704_v4 = vpop.xlane.xlu1 %5703 }
0x50d5   :  { %v5705_v47 = vcvt.f32.s32 %v5704_v4 }
0x50d7   :  { %v5708_v58 = vadd.s32 %v5707_v51, %v5705_v47 }
0x50d9   :  { %vm5719_vm12 = vcmp.eq.s32.totalorder %v9815_v35, %v5708_v58  ;;  %v10553_v54 = vsel %vm5716_vm10, %v5708_v58, %v10453_v21 }
0x50da   :  { %v7170_v46 = vsel %vm5719_vm12, 1.0, %v9370_v11  ;;  %vm6371_vm12 = vcmp.eq.s32.totalorder %v9815_v35, 6 }
0x50db   :  { %8344 = vmatmul.mubr.msk.f32.vlgmr.msra.gmra.mrb[70].mxu0 %vm1783_vm3, %v7170_v46 }
0x50dc   :  { %8917 = vmatpush3.bf16.msra.mxu0 %v9909_v31  ;;  %8376 = vmatprep.mubr.msk.f32.mxu0 %vm9369_vm0, %v9370_v11 }
0x50dd   :  { %8918 = vmatprep.subr.bf16.mxu0 %v9368_v3 }
0x50e0   :  { %8920 = vmatpush3.bf16.msra.mxu0 %v9913_v36 }
0x50e1   :  { %8921 = vmatprep.subr.bf16.mxu0 %v9368_v3 }
0x51ae   :  { %v5791_v28 = vpop.f32.mrb[70].mxu0 }
0x51af   :  { %v8345_v57 = vpop.f32.mrb[71].mxu0  ;;  %8355 = vmatmul.mubr.msk.f32.vlgmr.msra.gmra.mrb[62].mxu1 %vm150_vm1, %v5791_v28 }
0x51b0   :  { %8911 = vmatpush3.bf16.msra.mxu1 %v9892_v23  ;;  %8365 = vmatprep.mubr.msk.f32.mxu1 %vm9369_vm0, %v9370_v11 }
0x51b1   :  { %8912 = vmatprep.subr.bf16.mxu1 %v9368_v3 }
0x51b4   :  { %8914 = vmatpush3.bf16.msra.mxu1 %v9897_v15 }
0x51b5   :  { %8379 = vmatprep.subr.mxu1 %v9370_v11 }
0x51b7   :  { %8366 = vmatmul.mubr.msk.f32.vlgmr.msra.gmra.mrb[64].mxu1 %vm150_vm1, %v10487_v22 }
0x51b8   :  { %8380 = vmatpush3.msra.mxu1 %v9862_v6  ;;  %8381 = vmatprep.mubr.msk.f32.mxu1 %vm9369_vm0, %v9370_v11 }
0x51b9   :  { %8927 = vmatprep.subr.bf16.mxu1 %v9368_v3 }
0x5282   :  { %v5864_v21 = vpop.f32.mrb[62].mxu1 }
0x5283   :  { %v8356_v1 = vpop.f32.mrb[63].mxu1  ;;  %v5865_v10 = vadd.f32 %v10368_v62, %v5864_v21 }
0x528a   :  { %v5934_v2 = vpop.f32.mrb[64].mxu1 }
0x528b   :  { %v5935_v5 = vadd.f32 %v10364_v26, %v5934_v2  ;;  %v8367_v7 = vpop.f32.mrb[65].mxu1 }
0x528d   :  { %5946 = vrot.lane.b32.xlu0 %v5935_v5, %s9371_s21  ;;  %v5938_v24 = vadd.f32 %v5935_v5, %v5865_v10 }
0x528f   :  { %v7174_v13 = vmul.f32 -1.442695, %v5938_v24 }
0x5291   :  { %9122 = vpow2.f32 %v7174_v13 }
0x529b   :  { %v9123_v22 = vpop.eup %9122 }
0x529c   :  { %v5942_v25 = vadd.f32 1.0, %v9123_v22 }
0x529e   :  { %9124 = vrcp.f32 %v5942_v25 }
0x52a8   :  { %v9125_v29 = vpop.eup %9124 }
0x52a9   :  { %v5956_v56 = vsub.f32 1.0, %v9125_v29  ;;  %v5962_v4 = vmul.f32 %v9125_v29, %v10483_v20 }
0x52ff   :  { %v5947_v32 = vpop.permute.xlu0 %5946 }
0x5300   :  { %v5949_v14 = vmul.f32 %v9125_v29, %v5947_v32 }
0x5302   :  { %5951 = vrot.lane.b32.xlu1 %v5949_v14, %s9371_s21 }
0x5374   :  { %v5952_v37 = vpop.permute.xlu1 %5951 }
0x5375   :  { %v5954_v40 = vadd.f32 %v5952_v37, %v5865_v10 }
0x5377   :  { %9126 = vtanh.f32 %v5954_v40 }
0x5381   :  { %v9127_v42 = vpop.eup %9126 }
0x5382   :  { %5958 = vrot.lane.b32.xlu1 %v9127_v42, %s9372_s9 }
0x53f4   :  { %v5959_v0 = vpop.permute.xlu1 %5958 }
0x53f5   :  { %v5961_v51 = vmul.f32 %v5959_v0, %v5956_v56 }
0x53f7   :  { %v10582_v47 = vadd.f32 %v5962_v4, %v5961_v51 }
0x53f9   :  { %5965 = vrot.lane.b32.xlu0 %v10582_v47, %s9372_s9 }
0x546b   :  { %v10586_v58 = vpop.permute.xlu0 %5965 }
0x546c   :  { %8377 = vmatmul.mubr.msk.f32.vlgmr.msra.gmra.mrb[72].mxu0 %vm150_vm1, %v10586_v58 }
0x546d   :  { %8923 = vmatpush3.bf16.msra.mxu0 %v9986_v33  ;;  %8392 = vmatprep.mubr.msk.f32.mxu0 %vm9369_vm0, %v9370_v11 }
0x546e   :  { %8924 = vmatprep.subr.bf16.mxu0 %v9368_v3 }
0x5471   :  { %8926 = vmatpush3.bf16.msra.mxu0 %v9990_v43 }
0x5472   :  { %8933 = vmatprep.subr.bf16.mxu0 %v9368_v3 }
0x553f   :  { %v6035_v20 = vpop.f32.mrb[72].mxu0 }
0x5540   :  { %v6039_v46 = vsel %vm9976_vm4, %v6035_v20, -1e+30  ;;  %v8378_v28 = vpop.f32.mrb[73].mxu0 }
0x5541   :  { %v6040_v57 = vsel %vm2107_vm5, %v6039_v46, -inf }
0x5542   :  { %6041 = vmax.xlane.f32.xlu1 %v6040_v57 }
0x55cf   :  { %v6042_v21 = vpop.xlane.xlu1 %6041 }
0x55d0   :  { %v6043_v1 = vsub.f32 %v6039_v46, %v6042_v21 }
0x55d2   :  { %v6044_v2 = vmul.f32 1.442695, %v6043_v1 }
0x55d4   :  { %9128 = vpow2.f32 %v6044_v2 }
0x55de   :  { %v9129_v5 = vpop.eup %9128 }
0x55df   :  { %v6046_v7 = vsel %vm9976_vm4, %v9129_v5, 0.0 }
0x55e0   :  { %v6047_v10 = vsel %vm2107_vm5, %v6046_v7, 0.0 }
0x55e1   :  { %6048 = vadd.xlane.f32.xlu0 %v6047_v10 }
0x566e   :  { %v6049_v24 = vpop.xlane.xlu0 %6048 }
0x566f   :  { %v6050_v13 = vmax.f32 %v6049_v24, 1e-30 }
0x5671   :  { %9130 = vrcp.f32 %v6050_v13 }
0x567b   :  { %v9131_v22 = vpop.eup %9130 }
0x567c   :  { %v6052_v25 = vmul.f32 %v9131_v22, %v6046_v7 }
0x567e   :  { %8382 = vmatmul.mubr.msk.f32.vlgmr.msra.gmra.mrb[66].mxu1 %vm2122_vm6, %v6052_v25 }
0x567f   :  { %8929 = vmatpush3.bf16.msra.mxu1 %v9940_v19  ;;  %8403 = vmatprep.mubr.msk.f32.mxu1 %vm9369_vm0, %v9370_v11 }
0x5680   :  { %8930 = vmatprep.subr.bf16.mxu1 %v9368_v3 }
0x5683   :  { %8932 = vmatpush3.bf16.msra.mxu1 %v9953_v60 }
0x5684   :  { %8939 = vmatprep.subr.bf16.mxu1 %v9368_v3 }
0x5686   :  { %8404 = vmatmul.mubr.msk.f32.vlgmr.msra.gmra.mrb[68].mxu1 %vm150_vm1, %v10586_v58 }
0x5687   :  { %8941 = vmatpush3.bf16.msra.mxu1 %v9797_v27  ;;  %8433 = vmatprep.mubr.msk.f32.mxu1 %vm9369_vm0, %v9370_v11 }
0x5688   :  { %8942 = vmatprep.subr.bf16.mxu1 %v9368_v3 }
0x568b   :  { %8944 = vmatpush3.bf16.msra.mxu1 %v9803_v30 }
0x568c   :  { %8945 = vmatprep.subr.bf16.mxu1 %v9368_v3 }
0x568f   :  { %8947 = vmatpush3.bf16.msra.mxu1 %v9813_v34 }
0x5690   :  { %8948 = vmatprep.subr.bf16.mxu1 %v9368_v3 }
0x5693   :  { %8950 = vmatpush3.bf16.msra.mxu1 %v9825_v39 }
0x5694   :  { %8963 = vmatprep.subr.bf16.mxu1 %v9368_v3 }
0x5751   :  { %v6122_v29 = vpop.f32.mrb[66].mxu1 }
0x5752   :  { %v8383_v32 = vpop.f32.mrb[67].mxu1  ;;  %8393 = vmatmul.mubr.msk.f32.vlgmr.msra.gmra.mrb[74].mxu0 %vm150_vm1, %v6122_v29 }
0x5753   :  { %8935 = vmatpush3.bf16.msra.mxu0 %v10000_v49  ;;  %8414 = vmatprep.mubr.msk.f32.mxu0 %vm9369_vm0, %v9370_v11 }
0x5754   :  { %8936 = vmatprep.subr.bf16.mxu0 %v9368_v3 }
0x5757   :  { %8938 = vmatpush3.bf16.msra.mxu0 %v10003_v8 }
0x5758   :  { %8951 = vmatprep.subr.bf16.mxu0 %v9368_v3 }
0x5759   :  { %v6265_v27 = vpop.f32.mrb[68].mxu1 }
0x575a   :  { %v8405_v30 = vpop.f32.mrb[69].mxu1 }
0x5825   :  { %v6195_v34 = vpop.f32.mrb[74].mxu0 }
0x5826   :  { %v6266_v39 = vadd.f32 %v6265_v27, %v6195_v34  ;;  %v8394_v14 = vpop.f32.mrb[75].mxu0 }
0x5828   :  { %v6269_v37 = vadd.f32 %v10423_v44, %v6266_v39 }
0x582a   :  { %9132 = vtanh.f32 %v6269_v37 }
0x5834   :  { %v9133_v40 = vpop.eup %9132 }
0x5835   :  { %8415 = vmatmul.mubr.msk.f32.vlgmr.msra.gmra.mrb[76].mxu0 %vm150_vm1, %v9133_v40 }
0x5836   :  { %8953 = vmatpush3.bf16.msra.mxu0 %v9870_v9  ;;  %8444 = vmatprep.mubr.msk.f32.mxu0 %vm9369_vm0, %v9370_v11 }
0x5837   :  { %8954 = vmatprep.subr.bf16.mxu0 %v9368_v3 }
0x583a   :  { %8956 = vmatpush3.bf16.msra.mxu0 %v9885_v18 }
0x583b   :  { %8957 = vmatprep.subr.bf16.mxu0 %v9368_v3 }
0x5908   :  { %v6340_v42 = vpop.f32.mrb[76].mxu0 }
0x5909   :  { %v10637_v56 = vadd.f32 %v10436_v41, %v6340_v42  ;;  %v8416_v0 = vpop.f32.mrb[77].mxu0 }
0x590b   :  { %v6344_v4 = vsel %vm2414_vm7, %v10637_v56, -inf }
0x590c   :  { %6345 = vmax.xlane.f32.xlu0 %v6344_v4 }
0x5999   :  { %v10641_v51 = vpop.xlane.xlu0 %6345 }
0x599a   :  { %vm6347_vm15 = vcmp.eq.f32.partialorder %v10637_v56, %v10641_v51 }
0x599b   :  { %v6348_v9 = vsel %vm6347_vm15, %v9815_v35, 64 }
0x599c   :  { %v6349_v18 = vsel %vm2414_vm7, %v6348_v9, 2147483647 }
0x599d   :  { %v6351_v20 = vshra.s32 %v6349_v18, 16  ;;  %v6350_v28 = vand.u32 65535, %v6349_v18 }
0x599f   :  { %v6353_v46 = vcvt.s32.f32 %v6351_v20  ;;  %v6352_v21 = vcvt.s32.f32 %v6350_v28 }
0x59a1   :  { %6354 = vmin.xlane.f32.xlu1 %v6353_v46 }
0x5a2e   :  { %v6355_v57 = vpop.xlane.xlu1 %6354 }
0x5a2f   :  { %vm6356_vm8 = vcmp.eq.f32.partialorder %v6353_v46, %v6355_v57  ;;  %v6361_v2 = vcvt.f32.s32 %v6355_v57 }
0x5a30   :  { %v6357_v1 = vsel %vm6356_vm8, %v6352_v21, inf }
0x5a31   :  { %6358 = vmin.xlane.f32.xlu0 %v6357_v1  ;;  %v6362_v7 = vshll.u32 %v6361_v2, 16 }
0x5abe   :  { %v6359_v5 = vpop.xlane.xlu0 %6358 }
0x5abf   :  { %v6360_v10 = vcvt.f32.s32 %v6359_v5 }
0x5ac1   :  { %v6363_v24 = vadd.s32 %v6362_v7, %v6360_v10  ;;  %v5054_v7 = vsub.f32 %v10439_v61, %v10443_v55 }
0x5ac3   :  { %vm6374_vm15 = vcmp.eq.s32.totalorder %v9815_v35, %v6363_v24  ;;  %v10652_v13 = vsel %vm6371_vm12, %v6363_v24, %v10553_v54  ;;  %v5055_v10 = vmul.f32 1.442695, %v5054_v7  ;;  %v6364_v24 = vsub.f32 %v10637_v56, %v10641_v51 }
0x5ac4   :  { %v7180_v22 = vsel %vm6374_vm15, 1.0, %v9370_v11 }
0x5ac5   :  { %8434 = vmatmul.mubr.msk.f32.vlgmr.msra.gmra.mrb[70].mxu1 %vm1783_vm3, %v7180_v22 }
0x5ac6   :  { %8965 = vmatpush3.bf16.msra.mxu1 %v9909_v31  ;;  %8466 = vmatprep.mubr.msk.f32.mxu1 %vm9369_vm0, %v9370_v11 }
0x5ac7   :  { %8966 = vmatprep.subr.bf16.mxu1 %v9368_v3 }
0x5aca   :  { %8968 = vmatpush3.bf16.msra.mxu1 %v9913_v36 }
0x5acb   :  { %8969 = vmatprep.subr.bf16.mxu1 %v9368_v3 }
0x5b98   :  { %v6446_v25 = vpop.f32.mrb[70].mxu1 }
0x5b99   :  { %v8435_v29 = vpop.f32.mrb[71].mxu1  ;;  %8445 = vmatmul.mubr.msk.f32.vlgmr.msra.gmra.mrb[78].mxu0 %vm150_vm1, %v6446_v25 }
0x5b9a   :  { %8959 = vmatpush3.bf16.msra.mxu0 %v9892_v23  ;;  %8455 = vmatprep.mubr.msk.f32.mxu0 %vm9369_vm0, %v9370_v11 }
0x5b9b   :  { %8960 = vmatprep.subr.bf16.mxu0 %v9368_v3 }
0x5b9e   :  { %8962 = vmatpush3.bf16.msra.mxu0 %v9897_v15 }
0x5b9f   :  { %8469 = vmatprep.subr.mxu0 %v9370_v11 }
0x5ba1   :  { %8456 = vmatmul.mubr.msk.f32.vlgmr.msra.gmra.mrb[80].mxu0 %vm150_vm1, %v10586_v58 }
0x5ba2   :  { %8470 = vmatpush3.msra.mxu0 %v9862_v6  ;;  %8471 = vmatprep.mubr.msk.f32.mxu0 %vm9369_vm0, %v9370_v11 }
0x5ba3   :  { %8975 = vmatprep.subr.bf16.mxu0 %v9368_v3 }
0x5c6c   :  { %v6519_v23 = vpop.f32.mrb[78].mxu0 }
0x5c6d   :  { %v8446_v31 = vpop.f32.mrb[79].mxu0  ;;  %v6520_v15 = vadd.f32 %v10368_v62, %v6519_v23 }
0x5c74   :  { %v6589_v36 = vpop.f32.mrb[80].mxu0 }
0x5c75   :  { %v6590_v54 = vadd.f32 %v10364_v26, %v6589_v36  ;;  %v8457_v32 = vpop.f32.mrb[81].mxu0 }
0x5c77   :  { %6601 = vrot.lane.b32.xlu1 %v6590_v54, %s9371_s21  ;;  %v6593_v27 = vadd.f32 %v6590_v54, %v6520_v15 }
0x5c79   :  { %v7184_v30 = vmul.f32 -1.442695, %v6593_v27 }
0x5c7b   :  { %9134 = vpow2.f32 %v7184_v30 }
0x5c85   :  { %v9135_v58 = vpop.eup %9134 }
0x5c86   :  { %v6597_v6 = vadd.f32 1.0, %v9135_v58 }
0x5c88   :  { %9136 = vrcp.f32 %v6597_v6 }
0x5c92   :  { %v9137_v34 = vpop.eup %9136 }
0x5c93   :  { %v6611_v42 = vsub.f32 1.0, %v9137_v34  ;;  %v6617_v62 = vmul.f32 %v9137_v34, %v10582_v47 }
0x5ce9   :  { %v6602_v39 = vpop.permute.xlu1 %6601 }
0x5cea   :  { %v6604_v14 = vmul.f32 %v9137_v34, %v6602_v39 }
0x5cec   :  { %6606 = vrot.lane.b32.xlu0 %v6604_v14, %s9371_s21  ;;  %s9373_s21 = smov [#allocation15]  }
0x5d5e   :  { %v6607_v37 = vpop.permute.xlu0 %6606 }
0x5d5f   :  { %v6609_v40 = vadd.f32 %v6607_v37, %v6520_v15  ;;  %v4399_v37 = vsub.f32 %v10323_v12, %v10327_v50 }
0x5d61   :  { %9138 = vtanh.f32 %v6609_v40  ;;  %v5709_v40 = vsub.f32 %v10538_v16, %v10542_v17 }
0x5d6b   :  { %v9139_v26 = vpop.eup %9138 }
0x5d6c   :  { %6613 = vrot.lane.b32.xlu1 %v9139_v26, %s9372_s9 }
0x5dde   :  { %v6614_v0 = vpop.permute.xlu1 %6613 }
0x5ddf   :  { %v6616_v4 = vmul.f32 %v6614_v0, %v6611_v42 }
0x5de1   :  { %v6618_v9 = vadd.f32 %v6617_v62, %v6616_v4 }
0x5de3   :  { %6620 = vrot.lane.b32.xlu1 %v6618_v9, %s9372_s9  ;;  %s7047_s9 = sshll.u32 %s9373_s21, 4  ;;  %s7048_s9 = int_to_ptr.vmem [resolvable:$true] %s7047_s9 }
0x5de4   :  { %s9304_s16 = scalar_lea.vmem %s7048_s9, 16  ;;  %s9308_s15 = scalar_lea.vmem %s7048_s9, 32 }
0x5de5   :  { %p9305_p3 = scmp.ne.s32.totalorder %s7048_s9, %s9304_s16  ;;  %p9309_p4 = scmp.lt.s32.totalorder %s7048_s9, %s7048_s9 }
0x5de6   :  { %p9310_p5 = scmp.lt.s32.totalorder %s9308_s15, %s9304_s16 }
0x5de8   :  { %p9311_p6 = por %p9310_p5, %p9309_p4 }
0x5dea   :  { %p9312_p7 = pnand %p9311_p6, %p9305_p3 }
0x5e55   :  { %v6621_v18 = vpop.permute.xlu1 %6620 }
0x5e56   :  { %8467 = vmatmul.mubr.msk.f32.vlgmr.msra.gmra.mrb[72].mxu1 %vm150_vm1, %v6621_v18 }
0x5e57   :  { %8971 = vmatpush3.bf16.msra.mxu1 %v9986_v33  ;;  %8482 = vmatprep.mubr.msk.f32.mxu1 %vm9369_vm0, %v9370_v11  ;;  %v2435_v33 = vsub.f32 %v10027_v52, %v10031_v45  ;;  %v6365_v52 = vmul.f32 1.442695, %v6364_v24 }
0x5e58   :  { %8972 = vmatprep.subr.bf16.mxu1 %v9368_v3 }
0x5e59   :  { %v2436_v2 = vmul.f32 1.442695, %v2435_v33 }
0x5e5b   :  { %8974 = vmatpush3.bf16.msra.mxu1 %v9990_v43  ;;  %v3744_v43 = vsub.f32 %v10224_v59, %v10228_v38 }
0x5e5c   :  { %8981 = vmatprep.subr.bf16.mxu1 %v9368_v3 }
0x5e5d   :  { %v3745_v5 = vmul.f32 1.442695, %v3744_v43 }
0x5f29   :  { %v6690_v20 = vpop.f32.mrb[72].mxu1 }
0x5f2a   :  { %v6694_v47 = vsel %vm9976_vm4, %v6690_v20, -1e+30  ;;  %v8468_v46 = vpop.f32.mrb[73].mxu1 }
0x5f2b   :  { %v6695_v28 = vsel %vm2107_vm5, %v6694_v47, -inf }
0x5f2c   :  { %6696 = vmax.xlane.f32.xlu0 %v6695_v28 }
0x5fb9   :  { %v6697_v57 = vpop.xlane.xlu0 %6696 }
0x5fba   :  { %v6698_v21 = vsub.f32 %v6694_v47, %v6697_v57 }
0x5fbc   :  { %v6699_v1 = vmul.f32 1.442695, %v6698_v21 }
0x5fbe   :  { %9140 = vpow2.f32 %v6699_v1 }
0x5fbf   :  { %9142 = vpow2.f32 %v2436_v2 }
0x5fc0   :  { %9144 = vpow2.f32 %v3745_v5 }
0x5fc1   :  { %9146 = vpow2.f32 %v5055_v10 }
0x5fc2   :  { %9148 = vpow2.f32 %v6365_v52 }
0x5fc8   :  { %v9141_v22 = vpop.eup %9140 }
0x5fc9   :  { %v6701_v45 = vsel %vm9976_vm4, %v9141_v22, 0.0  ;;  %v9143_v59 = vpop.eup %9142 }
0x5fca   :  { %v6702_v25 = vsel %vm2107_vm5, %v6701_v45, 0.0  ;;  %v2438_v38 = vsel %vm2414_vm7, %v9143_v59, 0.0  ;;  %v9145_v29 = vpop.eup %9144 }
0x5fcb   :  { %6703 = vadd.xlane.f32.xlu1 %v6702_v25  ;;  %v3747_v61 = vsel %vm2414_vm7, %v9145_v29, 0.0  ;;  %v9147_v55 = vpop.eup %9146 }
0x5fcc   :  { %v5057_v56 = vsel %vm2414_vm7, %v9147_v55, 0.0  ;;  %v9149_v51 = vpop.eup %9148 }
0x5fcd   :  { %v6367_v63 = vsel %vm2414_vm7, %v9149_v51, 0.0 }
0x5fcf   :  { %2439 = vadd.xlane.f32.xlu1 %v2438_v38 }
0x5fd3   :  { %3748 = vadd.xlane.f32.xlu1 %v3747_v61 }
0x5fd7   :  { %5058 = vadd.xlane.f32.xlu1 %v5057_v56 }
0x5fdb   :  { %6368 = vadd.xlane.f32.xlu1 %v6367_v63 }
0x6058   :  { %v6704_v23 = vpop.xlane.xlu1 %6703 }
0x6059   :  { %v6705_v31 = vmax.f32 %v6704_v23, 1e-30 }
0x605b   :  { %9150 = vrcp.f32 %v6705_v31 }
0x605c   :  { %v2440_v46 = vpop.xlane.xlu1 %2439 }
0x6060   :  { %v3749_v21 = vpop.xlane.xlu1 %3748 }
0x6064   :  { %v5059_v43 = vpop.xlane.xlu1 %5058 }
0x6065   :  { %v9151_v36 = vpop.eup %9150 }
0x6066   :  { %v6707_v54 = vmul.f32 %v9151_v36, %v6701_v45 }
0x6068   :  { %8472 = vmatmul.mubr.msk.f32.vlgmr.msra.gmra.mrb[82].mxu0 %vm2122_vm6, %v6707_v54  ;;  %v6369_v24 = vpop.xlane.xlu1 %6368 }
0x6069   :  { %8977 = vmatpush3.bf16.msra.mxu0 %v9940_v19  ;;  %8493 = vmatprep.mubr.msk.f32.mxu0 %vm9369_vm0, %v9370_v11 }
0x606a   :  { %8978 = vmatprep.subr.bf16.mxu0 %v9368_v3 }
0x606d   :  { %8980 = vmatpush3.bf16.msra.mxu0 %v9953_v60 }
0x6070   :  { %8494 = vmatmul.mubr.msk.f32.vlgmr.msra.gmra.mrb[84].mxu0 %vm150_vm1, %v6621_v18 }
0x613b   :  { %v6777_v32 = vpop.f32.mrb[82].mxu0 }
0x613c   :  { %v8473_v15 = vpop.f32.mrb[83].mxu0  ;;  %8483 = vmatmul.mubr.msk.f32.vlgmr.msra.gmra.mrb[74].mxu1 %vm150_vm1, %v6777_v32 }
0x613d   :  { %8983 = vmatpush3.bf16.msra.mxu1 %v10000_v49  ;;  %8504 = vmatprep.mubr.msk.f32.mxu1 %vm9369_vm0, %v9370_v11 }
0x613e   :  { %8984 = vmatprep.subr.bf16.mxu1 %v9368_v3  ;;  %v3090_v3 = vsub.f32 %v10123_v48, %v10127_v53 }
0x6141   :  { %8986 = vmatpush3.bf16.msra.mxu1 %v10003_v8  ;;  %v3091_v8 = vmul.f32 1.442695, %v3090_v3 }
0x6143   :  { %v6920_v19 = vpop.f32.mrb[84].mxu0 }
0x6144   :  { %v8495_v27 = vpop.f32.mrb[85].mxu0 }
0x620f   :  { %v6850_v30 = vpop.f32.mrb[74].mxu1 }
0x6210   :  { %v6921_v58 = vadd.f32 %v6920_v19, %v6850_v30  ;;  %v8484_v60 = vpop.f32.mrb[75].mxu1 }
0x6212   :  { %v6924_v6 = vadd.f32 %v10423_v44, %v6921_v58  ;;  %v4400_v44 = vmul.f32 1.442695, %v4399_v37 }
0x6214   :  { %9152 = vtanh.f32 %v6924_v6 }
0x6215   :  { %9154 = vpow2.f32 %v3091_v8 }
0x6216   :  { %9156 = vpow2.f32 %v4400_v44 }
0x621e   :  { %v9153_v34 = vpop.eup %9152 }
0x621f   :  { %8505 = vmatmul.mubr.msk.f32.vlgmr.msra.gmra.mrb[76].mxu1 %vm150_vm1, %v9153_v34  ;;  %v9155_v9 = vpop.eup %9154 }
0x6220   :  { %v3093_v12 = vsel %vm2414_vm7, %v9155_v9, 0.0  ;;  %v9157_v50 = vpop.eup %9156 }
0x6221   :  { %v4402_v16 = vsel %vm2414_vm7, %v9157_v50, 0.0 }
0x62f2   :  { %v6995_v39 = vpop.f32.mrb[76].mxu1 }
0x62f3   :  { %v6996_v49 = vadd.f32 %v10436_v41, %v6995_v39  ;;  %v8506_v14 = vpop.f32.mrb[77].mxu1  ;;  %v5710_v41 = vmul.f32 1.442695, %v5709_v40 }
0x62f5   :  { %v6999_v11 = vsel %vm2414_vm7, %v6996_v49, -inf  ;;  %9158 = vpow2.f32 %v5710_v41 }
0x62f6   :  { %7000 = vmax.xlane.f32.xlu0 %v6999_v11 }
0x62ff   :  { %v9159_v17 = vpop.eup %9158 }
0x6300   :  { %v5712_v18 = vsel %vm2414_vm7, %v9159_v17, 0.0 }
0x6383   :  { %v7001_v26 = vpop.xlane.xlu0 %7000 }
0x6384   :  { %vm7002_vm0 = vcmp.eq.f32.partialorder %v6996_v49, %v7001_v26  ;;  %v7019_v0 = vsub.f32 %v6996_v49, %v7001_v26 }
0x6385   :  { %v7003_v42 = vsel %vm7002_vm0, %v9815_v35, 64 }
0x6386   :  { %v7004_v62 = vsel %vm2414_vm7, %v7003_v42, 2147483647  ;;  %v7020_v48 = vmul.f32 1.442695, %v7019_v0 }
0x6387   :  { %v7006_v4 = vshra.s32 %v7004_v62, 16  ;;  %v7005_v28 = vand.u32 65535, %v7004_v62 }
0x6388   :  { %9160 = vpow2.f32 %v7020_v48 }
0x6389   :  { %v7008_v53 = vcvt.s32.f32 %v7006_v4  ;;  %v7007_v57 = vcvt.s32.f32 %v7005_v28  ;;  %9162 = vrcp.f32 %v2440_v46 }
0x638b   :  { %7009 = vmin.xlane.f32.xlu0 %v7008_v53 }
0x638f   :  { %3094 = vadd.xlane.f32.xlu0 %v3093_v12 }
0x6392   :  { %v9161_v20 = vpop.eup %9160 }
0x6393   :  { %4403 = vadd.xlane.f32.xlu0 %v4402_v16  ;;  %v7022_v47 = vsel %vm2414_vm7, %v9161_v20, 0.0  ;;  %v9163_v7 = vpop.eup %9162 }
0x6394   :  { %v2444_v52 = vsel %vm2442_vm13, %v9163_v7, 0.0 }
0x6397   :  { %5713 = vadd.xlane.f32.xlu0 %v5712_v18 }
0x639b   :  { %7023 = vadd.xlane.f32.xlu0 %v7022_v47 }
0x6418   :  { %v7010_v33 = vpop.xlane.xlu0 %7009 }
0x6419   :  { %vm7011_vm1 = vcmp.eq.f32.partialorder %v7008_v53, %v7010_v33 }
0x641a   :  { %v7012_v1 = vsel %vm7011_vm1, %v7007_v57, inf }
0x641b   :  { %7013 = vmin.xlane.f32.xlu1 %v7012_v1 }
0x641c   :  { %v3095_v2 = vpop.xlane.xlu0 %3094 }
0x641d   :  { %9164 = vrcp.f32 %v3095_v2 }
0x641e   :  { %9166 = vrcp.f32 %v3749_v21 }
0x6420   :  { %v4404_v5 = vpop.xlane.xlu0 %4403 }
0x6421   :  { %9168 = vrcp.f32 %v4404_v5 }
0x6422   :  { %9170 = vrcp.f32 %v5059_v43 }
0x6424   :  { %v5714_v10 = vpop.xlane.xlu0 %5713 }
0x6425   :  { %9172 = vrcp.f32 %v5714_v10 }
0x6426   :  { %9174 = vrcp.f32 %v6369_v24 }
0x6427   :  { %v9165_v22 = vpop.eup %9164 }
0x6428   :  { %v7024_v45 = vpop.xlane.xlu0 %7023  ;;  %v3098_v25 = vsel %vm1772_vm2, %v9165_v22, %v2444_v52  ;;  %v9167_v59 = vpop.eup %9166  ;;  %vm7026_vm2 = vcmp.eq.s32.totalorder %v9815_v35, 7 }
0x6429   :  { %9176 = vrcp.f32 %v7024_v45  ;;  %v3753_v29 = vsel %vm3751_vm9, %v9167_v59, %v3098_v25 }
0x642b   :  { %v9169_v38 = vpop.eup %9168 }
0x642c   :  { %v4408_v61 = vsel %vm4406_vm14, %v9169_v38, %v3753_v29  ;;  %v9171_v55 = vpop.eup %9170 }
0x642d   :  { %v5063_v51 = vsel %vm5061_vm11, %v9171_v55, %v4408_v61 }
0x642f   :  { %v9173_v56 = vpop.eup %9172 }
0x6430   :  { %v5718_v63 = vsel %vm5716_vm10, %v9173_v56, %v5063_v51  ;;  %v9175_v23 = vpop.eup %9174 }
0x6431   :  { %v6373_v36 = vsel %vm6371_vm12, %v9175_v23, %v5718_v63 }
0x6433   :  { %v9177_v31 = vpop.eup %9176 }
0x6434   :  { %v7028_v54 = vsel %vm7026_vm2, %v9177_v31, %v6373_v36 }
0x6435   :  { %7030 = vst.msk [vmem:[#allocation15] sm:$0x1] %vm2107_vm5, %v7028_v54 }
0x6436   :  { %9315 = shalt.err (!%p9312_p7)
}
0x6437   :  { %s10813_s17 = sld [smem:[#allocation27_spill]] }
0x643d   :  { %s9316_s7 = scalar_lea.hbm %s10813_s17, 16 }
0x643e   :  { %p9317_p8 = scmp.ne.s32.totalorder %s10813_s17, %s9316_s7  ;;  %p9320_p9 = scmp.lt.u32.totalorder %s9316_s7, %s10813_s17 }
0x6440   :  { %p9322_p10 = pnand %p9320_p9, %p9317_p8 }
0x6442   :  { %9325 = shalt.err (!%p9322_p10)
}
0x6443   :  { %7050 = dma.vmem_to_hbm [thread:$0]  %s7048_s9, 16, %s10813_s17, [#allocation16]   ;;  %v7016_v32 = vcvt.f32.s32 %v7010_v33 }
0x6444   :  { %s9374_s1 = smov [#allocation14]  }
0x6445   :  { %v7017_v19 = vshll.u32 %v7016_v32, 16  ;;  %s7037_s20 = sshll.u32 %s9374_s1, 4  ;;  %s7038_s20 = int_to_ptr.vmem [resolvable:$true] %s7037_s20 }
0x6446   :  { %s9326_s6 = scalar_lea.vmem %s7038_s20, 16  ;;  %s9330_s11 = scalar_lea.vmem %s7038_s20, 32 }
0x6447   :  { %p9327_p11 = scmp.ne.s32.totalorder %s7038_s20, %s9326_s6  ;;  %p9331_p12 = scmp.lt.s32.totalorder %s7038_s20, %s7038_s20 }
0x6448   :  { %p9332_p13 = scmp.lt.s32.totalorder %s9330_s11, %s9326_s6 }
0x644a   :  { %p9333_p0 = por %p9332_p13, %p9331_p12 }
0x644c   :  { %p9334_p1 = pnand %p9333_p0, %p9327_p11 }
0x64a8   :  { %v7014_v15 = vpop.xlane.xlu1 %7013 }
0x64a9   :  { %v7015_v27 = vcvt.f32.s32 %v7014_v15 }
0x64ab   :  { %v7018_v30 = vadd.s32 %v7017_v19, %v7015_v27 }
0x64ad   :  { %v7027_v58 = vsel %vm7026_vm2, %v7018_v30, %v10652_v13 }
0x64ae   :  { %7029 = vst.msk [vmem:[#allocation14] sm:$0x1] %vm2107_vm5, %v7027_v58 }
0x64af   :  { %9337 = shalt.err (!%p9334_p1)
}
0x64b0   :  { %s10814_s24 = sld [smem:[#allocation26_spill]] }
0x64b6   :  { %s9338_s18 = scalar_lea.hbm %s10814_s24, 16 }
0x64b7   :  { %p9339_p2 = scmp.ne.s32.totalorder %s10814_s24, %s9338_s18  ;;  %p9342_p3 = scmp.lt.u32.totalorder %s9338_s18, %s10814_s24 }
0x64b9   :  { %p9344_p4 = pnand %p9342_p3, %p9339_p2 }
0x64bb   :  { %9347 = shalt.err (!%p9344_p4)
}
0x64bc   :  { %7040 = dma.vmem_to_hbm [thread:$0]  %s7038_s20, 16, %s10814_s24, [#allocation5]  }
0x64bd   :  { %9356 = dma.done.wait [#allocation5], 16  }
0x64be   :  { %9357 = vsyncadd [#allocation5], 4294967280 }
0x64bf   :  { %9358 = dma.done.wait [#allocation16], 16  }
0x64c0   :  { %9359 = vsyncadd [#allocation16], 4294967280 }
0x64c1   :  { %7057 = vsyncpa [#allocation4], 1 }
0x64c2   :  { %7058 = vsyncpa [#allocation9], 1 }
0x64c3   :  { %7059 = vsyncpa [#allocation12], 1 }
0x64c4   :  { %7060 = vsyncpa [#allocation5], 1 }
0x64c5   :  { %7061 = vsyncpa [#allocation16], 1 }
0x64c6   :  { %7062 = vsyncpa [#allocation6], 1 }

</bundles_post_ra>
